<compile_context>
chip_gen: v5e
topology: v5e:2x2
jax: 0.10.0
libtpu: 0.0.40
codegen_flags: <defaults>
</compile_context>

<pallas_src>
import jax
import jax.numpy as jnp
from jax import lax
from jax.experimental import pallas as pl
from jax.experimental.pallas import tpu as pltpu

C_IN, C1, C2 = 21, 64, 32          # conv channels
K1, K2 = 16, 8                     # conv kernel sizes
PAD1 = (7, 8)                      # torch padding='same', even k: left=(k-1)//2
PAD2 = (3, 4)
H1, H2 = 64, 32                    # fc hidden sizes
EPS = 1e-5
HALO = 8                           # sublane-aligned halo (>= max(PAD2))


def _make_kernel(B, L):
    def kernel(p1_ref, w1_ref, s1_ref, b1_ref, w2_ref, s2_ref, b2_ref,
               wf1_ref, bf1_ref, wf2_ref, bf2_ref, wf3_ref, bf3_ref,
               out_ref, h1pad_ref):
        # ---- conv1: single im2col matmul over the whole batch (M = B*L) ----
        h1 = jnp.maximum(
            jnp.dot(p1_ref[...], w1_ref[...],
                    preferred_element_type=jnp.float32)
            * s1_ref[...] + b1_ref[...], 0.0)                    # (B*L, C1)

        # ---- stage h1 into an aligned padded scratch (zero halo for conv2) ----
        halo_zero = jnp.zeros((HALO, C1), jnp.float32)           # hoisted
        for b in range(B):
            h1pad_ref[b, pl.ds(0, HALO), :] = halo_zero          # left halo
            h1pad_ref[b, pl.ds(HALO + L, HALO), :] = halo_zero   # right halo
            # sublane-aligned store (offset 8), unmasked full-row slab
            h1pad_ref[b, pl.ds(HALO, L), :] = h1[b * L:(b + 1) * L, :]

        # ---- conv2: in-kernel im2col -> single (B*L, K2*C1)x(K2*C1, C2) dot ----
        base = HALO - PAD2[0]                                    # = 5
        p2 = jnp.concatenate(
            [jnp.concatenate(
                [h1pad_ref[b, pl.ds(base + j, L), :] for j in range(K2)],
                axis=-1)                                         # (L, K2*C1)
             for b in range(B)], axis=0)                         # (B*L, K2*C1)
        h2 = jnp.maximum(
            jnp.dot(p2, w2_ref[...], preferred_element_type=jnp.float32)
            * s2_ref[...] + b2_ref[...], 0.0)                    # (B*L, C2)

        # ---- global average pool over time (per batch row block) ----
        pooled = jnp.concatenate(
            [jnp.mean(h2[b * L:(b + 1) * L, :], axis=0, keepdims=True)
             for b in range(B)], axis=0)                         # (B, C2)

        # ---- MLP head on the whole batch at once ----
        z1 = jnp.maximum(
            jnp.dot(pooled, wf1_ref[...], preferred_element_type=jnp.float32)
            + bf1_ref[...], 0.0)                                 # (B, H1)
        z2 = jnp.maximum(
            jnp.dot(z1, wf2_ref[...], preferred_element_type=jnp.float32)
            + bf2_ref[...], 0.0)                                 # (B, H2)
        logit = jnp.dot(z2, wf3_ref[...],
                        preferred_element_type=jnp.float32) + bf3_ref[...]
        out_ref[...] = jax.nn.sigmoid(logit)                     # (B, 1), one store

    return kernel


def neural_network_forward(x, params):
    """x: [B, L, 21] float32 -> [B, 1] float32 (sigmoid probabilities)."""
    B, L, _ = x.shape
    (w1, cb1, g1, be1, m1, v1,
     w2, cb2, g2, be2, m2, v2,
     wf1, bf1, wf2, bf2, wf3, bf3) = params

    # Fold conv bias + eval-mode BatchNorm into per-channel scale/bias.
    s1 = g1 / jnp.sqrt(v1 + EPS)
    b1 = (cb1 - m1) * s1 + be1
    s2 = g2 / jnp.sqrt(v2 + EPS)
    b2 = (cb2 - m2) * s2 + be2

    # conv1 im2col in the wrapper: tap-major patches matching w1.reshape rows.
    x_pad = jnp.pad(x, ((0, 0), PAD1, (0, 0)))                  # (B, L+K1-1, C_IN)
    p1 = jnp.concatenate([x_pad[:, j:j + L, :] for j in range(K1)], axis=-1)
    p1 = p1.reshape(B * L, K1 * C_IN)                           # (B*L, 336)

    w1r = w1.reshape(K1 * C_IN, C1)                             # (336, 64)
    w2r = w2.reshape(K2 * C1, C2)                               # (512, 32)

    kernel = _make_kernel(B, L)
    vmem = pl.BlockSpec(memory_space=pltpu.MemorySpace.VMEM)
    return pl.pallas_call(
        kernel,
        out_shape=jax.ShapeDtypeStruct((B, 1), jnp.float32),
        in_specs=[vmem] * 13,
        out_specs=vmem,
        scratch_shapes=[pltpu.VMEM((B, L + 2 * HALO, C1), jnp.float32)],
    )(p1,
      w1r, s1.reshape(1, -1), b1.reshape(1, -1),
      w2r, s2.reshape(1, -1), b2.reshape(1, -1),
      wf1, bf1.reshape(1, -1),
      wf2, bf2.reshape(1, -1),
      wf3, bf3.reshape(1, -1))


def init_params(key):
    """Deterministic parameter init (PyTorch-like uniform fan-in bounds)."""
    ks = jax.random.split(key, 10)

    def u(k, shape, fan_in):
        bound = 1.0 / jnp.sqrt(jnp.float32(fan_in))
        return jax.random.uniform(k, shape, jnp.float32, -bound, bound)

    # conv weights stored tap-major: [k, in, out] (= torch weight.transpose(2,1,0))
    w1 = u(ks[0], (K1, C_IN, C1), C_IN * K1)
    cb1 = u(ks[1], (C1,), C_IN * K1)
    w2 = u(ks[2], (K2, C1, C2), C1 * K2)
    cb2 = u(ks[3], (C2,), C1 * K2)
    # BatchNorm default params / running stats (eval mode)
    g1, be1, m1, v1 = (jnp.ones(C1), jnp.zeros(C1), jnp.zeros(C1), jnp.ones(C1))
    g2, be2, m2, v2 = (jnp.ones(C2), jnp.zeros(C2), jnp.zeros(C2), jnp.ones(C2))
    # Linear weights stored [in, out] (= torch weight.T)
    wf1 = u(ks[4], (C2, H1), C2); bf1 = u(ks[5], (H1,), C2)
    wf2 = u(ks[6], (H1, H2), H1); bf2 = u(ks[7], (H2,), H1)
    wf3 = u(ks[8], (H2, 1), H2);  bf3 = u(ks[9], (1,), H2)
    return (w1, cb1, g1, be1, m1, v1,
            w2, cb2, g2, be2, m2, v2,
            wf1, bf1, wf2, bf2, wf3, bf3)


def reference_forward(x, params):
    """Pure-JAX (XLA) reference of the PyTorch forward in eval mode."""
    (w1, cb1, g1, be1, m1, v1,
     w2, cb2, g2, be2, m2, v2,
     wf1, bf1, wf2, bf2, wf3, bf3) = params
    dn = ('NWC', 'WIO', 'NWC')
    y = lax.conv_general_dilated(x, w1, (1,), [PAD1], dimension_numbers=dn) + cb1
    y = (y - m1) / jnp.sqrt(v1 + EPS) * g1 + be1
    y = jnp.maximum(y, 0.0)                               # dropout1: identity (eval)
    y = lax.conv_general_dilated(y, w2, (1,), [PAD2], dimension_numbers=dn) + cb2
    y = (y - m2) / jnp.sqrt(v2 + EPS) * g2 + be2
    y = jnp.maximum(y, 0.0)                               # dropout2: identity (eval)
    p = jnp.mean(y, axis=1)                               # global avg pool + squeeze
    z = jnp.maximum(p @ wf1 + bf1, 0.0)                   # dropout3: identity
    z = jnp.maximum(z @ wf2 + bf2, 0.0)                   # dropout4: identity
    return jax.nn.sigmoid(z @ wf3 + bf3)


if __name__ == "__main__":
    key = jax.random.PRNGKey(0)
    kx, kp = jax.random.split(key)
    B, L = 2, 128
    x = jax.random.normal(kx, (B, L, C_IN), jnp.float32)
    params = init_params(kp)

    out = neural_network_forward(x, params)
    out = jax.block_until_ready(out)

    ref = reference_forward(x, params)
    assert out.shape == (B, 1)
    assert jnp.allclose(out, ref, atol=1e-5, rtol=1e-5), (out, ref)
    print("KERNEL_OK")
</pallas_src>

<mosaic_0001>
module attributes {stable_mosaic.version = 11 : i64} {
  func.func @kernel(%arg0: memref<256x336xf32, #tpu.memory_space<vmem>>, %arg1: memref<336x64xf32, #tpu.memory_space<vmem>>, %arg2: memref<1x64xf32, #tpu.memory_space<vmem>>, %arg3: memref<1x64xf32, #tpu.memory_space<vmem>>, %arg4: memref<512x32xf32, #tpu.memory_space<vmem>>, %arg5: memref<1x32xf32, #tpu.memory_space<vmem>>, %arg6: memref<1x32xf32, #tpu.memory_space<vmem>>, %arg7: memref<32x64xf32, #tpu.memory_space<vmem>>, %arg8: memref<1x64xf32, #tpu.memory_space<vmem>>, %arg9: memref<64x32xf32, #tpu.memory_space<vmem>>, %arg10: memref<1x32xf32, #tpu.memory_space<vmem>>, %arg11: memref<32x1xf32, #tpu.memory_space<vmem>>, %arg12: memref<1x1xf32, #tpu.memory_space<vmem>>, %arg13: memref<2x1xf32, #tpu.memory_space<vmem>>, %arg14: memref<2x144x64xf32, #tpu.memory_space<vmem>>) attributes {dimension_semantics = [], scalar_prefetch = 0 : i64, scratch_operands = 1 : i64, tpu.core_type = #tpu.core_type<tc>} {
    %c0 = arith.constant 0 : index
    %c0_0 = arith.constant 0 : index
    %0 = vector.load %arg0[%c0, %c0_0] : memref<256x336xf32, #tpu.memory_space<vmem>>, vector<256x336xf32>
    %c0_1 = arith.constant 0 : index
    %c0_2 = arith.constant 0 : index
    %1 = vector.load %arg1[%c0_1, %c0_2] : memref<336x64xf32, #tpu.memory_space<vmem>>, vector<336x64xf32>
    %cst = arith.constant dense<0.000000e+00> : vector<256x64xf32>
    %2 = tpu.matmul %0, %1, %cst {dimension_numbers = #tpu.dot_dimension_numbers<[1], [0], [0], [1], [0, 0, 1, 1], [], []>} : vector<256x336xf32>, vector<336x64xf32>, vector<256x64xf32> -> vector<256x64xf32>
    %c0_3 = arith.constant 0 : index
    %c0_4 = arith.constant 0 : index
    %3 = vector.load %arg2[%c0_3, %c0_4] : memref<1x64xf32, #tpu.memory_space<vmem>>, vector<1x64xf32>
    %4 = vector.broadcast %3 : vector<1x64xf32> to vector<256x64xf32>
    %5 = arith.mulf %2, %4 : vector<256x64xf32>
    %c0_5 = arith.constant 0 : index
    %c0_6 = arith.constant 0 : index
    %6 = vector.load %arg3[%c0_5, %c0_6] : memref<1x64xf32, #tpu.memory_space<vmem>>, vector<1x64xf32>
    %7 = vector.broadcast %6 : vector<1x64xf32> to vector<256x64xf32>
    %8 = arith.addf %5, %7 : vector<256x64xf32>
    %cst_7 = arith.constant 0.000000e+00 : f32
    %9 = vector.broadcast %cst_7 : f32 to vector<256x64xf32>
    %10 = arith.maximumf %8, %9 : vector<256x64xf32>
    %cst_8 = arith.constant 0.000000e+00 : f32
    %11 = vector.broadcast %cst_8 : f32 to vector<8x64xf32>
    %c0_9 = arith.constant 0 : index
    %c0_10 = arith.constant 0 : index
    %c0_11 = arith.constant 0 : index
    %12 = vector.load %arg14[%c0_9, %c0_10, %c0_11] : memref<2x144x64xf32, #tpu.memory_space<vmem>>, vector<1x8x64xf32>
    %13 = vector.shape_cast %12 : vector<1x8x64xf32> to vector<8x64xf32>
    %14 = vector.shape_cast %11 : vector<8x64xf32> to vector<1x8x64xf32>
    tpu.vector_store %arg14[%c0_9, %c0_10, %c0_11], %14 {strides = array<i32>} : memref<2x144x64xf32, #tpu.memory_space<vmem>>, vector<1x8x64xf32>,
    %c0_12 = arith.constant 0 : index
    %c136 = arith.constant 136 : index
    %c0_13 = arith.constant 0 : index
    %15 = vector.load %arg14[%c0_12, %c136, %c0_13] : memref<2x144x64xf32, #tpu.memory_space<vmem>>, vector<1x8x64xf32>
    %16 = vector.shape_cast %15 : vector<1x8x64xf32> to vector<8x64xf32>
    %17 = vector.shape_cast %11 : vector<8x64xf32> to vector<1x8x64xf32>
    tpu.vector_store %arg14[%c0_12, %c136, %c0_13], %17 {strides = array<i32>} : memref<2x144x64xf32, #tpu.memory_space<vmem>>, vector<1x8x64xf32>,
    %18 = vector.extract_strided_slice %10 {offsets = [0, 0], sizes = [128, 64], strides = [1, 1]} : vector<256x64xf32> to vector<128x64xf32>
    %c0_14 = arith.constant 0 : index
    %c8 = arith.constant 8 : index
    %c0_15 = arith.constant 0 : index
    %19 = vector.load %arg14[%c0_14, %c8, %c0_15] : memref<2x144x64xf32, #tpu.memory_space<vmem>>, vector<1x128x64xf32>
    %20 = vector.shape_cast %19 : vector<1x128x64xf32> to vector<128x64xf32>
    %21 = vector.shape_cast %18 : vector<128x64xf32> to vector<1x128x64xf32>
    tpu.vector_store %arg14[%c0_14, %c8, %c0_15], %21 {strides = array<i32>} : memref<2x144x64xf32, #tpu.memory_space<vmem>>, vector<1x128x64xf32>,
    %c1 = arith.constant 1 : index
    %c0_16 = arith.constant 0 : index
    %c0_17 = arith.constant 0 : index
    %22 = vector.load %arg14[%c1, %c0_16, %c0_17] : memref<2x144x64xf32, #tpu.memory_space<vmem>>, vector<1x8x64xf32>
    %23 = vector.shape_cast %22 : vector<1x8x64xf32> to vector<8x64xf32>
    %24 = vector.shape_cast %11 : vector<8x64xf32> to vector<1x8x64xf32>
    tpu.vector_store %arg14[%c1, %c0_16, %c0_17], %24 {strides = array<i32>} : memref<2x144x64xf32, #tpu.memory_space<vmem>>, vector<1x8x64xf32>,
    %c1_18 = arith.constant 1 : index
    %c136_19 = arith.constant 136 : index
    %c0_20 = arith.constant 0 : index
    %25 = vector.load %arg14[%c1_18, %c136_19, %c0_20] : memref<2x144x64xf32, #tpu.memory_space<vmem>>, vector<1x8x64xf32>
    %26 = vector.shape_cast %25 : vector<1x8x64xf32> to vector<8x64xf32>
    %27 = vector.shape_cast %11 : vector<8x64xf32> to vector<1x8x64xf32>
    tpu.vector_store %arg14[%c1_18, %c136_19, %c0_20], %27 {strides = array<i32>} : memref<2x144x64xf32, #tpu.memory_space<vmem>>, vector<1x8x64xf32>,
    %28 = vector.extract_strided_slice %10 {offsets = [128, 0], sizes = [128, 64], strides = [1, 1]} : vector<256x64xf32> to vector<128x64xf32>
    %c1_21 = arith.constant 1 : index
    %c8_22 = arith.constant 8 : index
    %c0_23 = arith.constant 0 : index
    %29 = vector.load %arg14[%c1_21, %c8_22, %c0_23] : memref<2x144x64xf32, #tpu.memory_space<vmem>>, vector<1x128x64xf32>
    %30 = vector.shape_cast %29 : vector<1x128x64xf32> to vector<128x64xf32>
    %31 = vector.shape_cast %28 : vector<128x64xf32> to vector<1x128x64xf32>
    tpu.vector_store %arg14[%c1_21, %c8_22, %c0_23], %31 {strides = array<i32>} : memref<2x144x64xf32, #tpu.memory_space<vmem>>, vector<1x128x64xf32>,
    %c0_24 = arith.constant 0 : index
    %c5 = arith.constant 5 : index
    %c0_25 = arith.constant 0 : index
    %32 = vector.load %arg14[%c0_24, %c5, %c0_25] : memref<2x144x64xf32, #tpu.memory_space<vmem>>, vector<1x128x64xf32>
    %33 = vector.shape_cast %32 : vector<1x128x64xf32> to vector<128x64xf32>
    %c0_26 = arith.constant 0 : index
    %c6 = arith.constant 6 : index
    %c0_27 = arith.constant 0 : index
    %34 = vector.load %arg14[%c0_26, %c6, %c0_27] : memref<2x144x64xf32, #tpu.memory_space<vmem>>, vector<1x128x64xf32>
    %35 = vector.shape_cast %34 : vector<1x128x64xf32> to vector<128x64xf32>
    %c0_28 = arith.constant 0 : index
    %c7 = arith.constant 7 : index
    %c0_29 = arith.constant 0 : index
    %36 = vector.load %arg14[%c0_28, %c7, %c0_29] : memref<2x144x64xf32, #tpu.memory_space<vmem>>, vector<1x128x64xf32>
    %37 = vector.shape_cast %36 : vector<1x128x64xf32> to vector<128x64xf32>
    %c0_30 = arith.constant 0 : index
    %c8_31 = arith.constant 8 : index
    %c0_32 = arith.constant 0 : index
    %38 = vector.load %arg14[%c0_30, %c8_31, %c0_32] : memref<2x144x64xf32, #tpu.memory_space<vmem>>, vector<1x128x64xf32>
    %39 = vector.shape_cast %38 : vector<1x128x64xf32> to vector<128x64xf32>
    %c0_33 = arith.constant 0 : index
    %c9 = arith.constant 9 : index
    %c0_34 = arith.constant 0 : index
    %40 = vector.load %arg14[%c0_33, %c9, %c0_34] : memref<2x144x64xf32, #tpu.memory_space<vmem>>, vector<1x128x64xf32>
    %41 = vector.shape_cast %40 : vector<1x128x64xf32> to vector<128x64xf32>
    %c0_35 = arith.constant 0 : index
    %c10 = arith.constant 10 : index
    %c0_36 = arith.constant 0 : index
    %42 = vector.load %arg14[%c0_35, %c10, %c0_36] : memref<2x144x64xf32, #tpu.memory_space<vmem>>, vector<1x128x64xf32>
    %43 = vector.shape_cast %42 : vector<1x128x64xf32> to vector<128x64xf32>
    %c0_37 = arith.constant 0 : index
    %c11 = arith.constant 11 : index
    %c0_38 = arith.constant 0 : index
    %44 = vector.load %arg14[%c0_37, %c11, %c0_38] : memref<2x144x64xf32, #tpu.memory_space<vmem>>, vector<1x128x64xf32>
    %45 = vector.shape_cast %44 : vector<1x128x64xf32> to vector<128x64xf32>
    %c0_39 = arith.constant 0 : index
    %c12 = arith.constant 12 : index
    %c0_40 = arith.constant 0 : index
    %46 = vector.load %arg14[%c0_39, %c12, %c0_40] : memref<2x144x64xf32, #tpu.memory_space<vmem>>, vector<1x128x64xf32>
    %47 = vector.shape_cast %46 : vector<1x128x64xf32> to vector<128x64xf32>
    %48 = tpu.concatenate %33, %35, %37, %39, %41, %43, %45, %47 in 1 : vector<128x64xf32>, vector<128x64xf32>, vector<128x64xf32>, vector<128x64xf32>, vector<128x64xf32>, vector<128x64xf32>, vector<128x64xf32>, vector<128x64xf32> -> vector<128x512xf32>
    %c1_41 = arith.constant 1 : index
    %c5_42 = arith.constant 5 : index
    %c0_43 = arith.constant 0 : index
    %49 = vector.load %arg14[%c1_41, %c5_42, %c0_43] : memref<2x144x64xf32, #tpu.memory_space<vmem>>, vector<1x128x64xf32>
    %50 = vector.shape_cast %49 : vector<1x128x64xf32> to vector<128x64xf32>
    %c1_44 = arith.constant 1 : index
    %c6_45 = arith.constant 6 : index
    %c0_46 = arith.constant 0 : index
    %51 = vector.load %arg14[%c1_44, %c6_45, %c0_46] : memref<2x144x64xf32, #tpu.memory_space<vmem>>, vector<1x128x64xf32>
    %52 = vector.shape_cast %51 : vector<1x128x64xf32> to vector<128x64xf32>
    %c1_47 = arith.constant 1 : index
    %c7_48 = arith.constant 7 : index
    %c0_49 = arith.constant 0 : index
    %53 = vector.load %arg14[%c1_47, %c7_48, %c0_49] : memref<2x144x64xf32, #tpu.memory_space<vmem>>, vector<1x128x64xf32>
    %54 = vector.shape_cast %53 : vector<1x128x64xf32> to vector<128x64xf32>
    %c1_50 = arith.constant 1 : index
    %c8_51 = arith.constant 8 : index
    %c0_52 = arith.constant 0 : index
    %55 = vector.load %arg14[%c1_50, %c8_51, %c0_52] : memref<2x144x64xf32, #tpu.memory_space<vmem>>, vector<1x128x64xf32>
    %56 = vector.shape_cast %55 : vector<1x128x64xf32> to vector<128x64xf32>
    %c1_53 = arith.constant 1 : index
    %c9_54 = arith.constant 9 : index
    %c0_55 = arith.constant 0 : index
    %57 = vector.load %arg14[%c1_53, %c9_54, %c0_55] : memref<2x144x64xf32, #tpu.memory_space<vmem>>, vector<1x128x64xf32>
    %58 = vector.shape_cast %57 : vector<1x128x64xf32> to vector<128x64xf32>
    %c1_56 = arith.constant 1 : index
    %c10_57 = arith.constant 10 : index
    %c0_58 = arith.constant 0 : index
    %59 = vector.load %arg14[%c1_56, %c10_57, %c0_58] : memref<2x144x64xf32, #tpu.memory_space<vmem>>, vector<1x128x64xf32>
    %60 = vector.shape_cast %59 : vector<1x128x64xf32> to vector<128x64xf32>
    %c1_59 = arith.constant 1 : index
    %c11_60 = arith.constant 11 : index
    %c0_61 = arith.constant 0 : index
    %61 = vector.load %arg14[%c1_59, %c11_60, %c0_61] : memref<2x144x64xf32, #tpu.memory_space<vmem>>, vector<1x128x64xf32>
    %62 = vector.shape_cast %61 : vector<1x128x64xf32> to vector<128x64xf32>
    %c1_62 = arith.constant 1 : index
    %c12_63 = arith.constant 12 : index
    %c0_64 = arith.constant 0 : index
    %63 = vector.load %arg14[%c1_62, %c12_63, %c0_64] : memref<2x144x64xf32, #tpu.memory_space<vmem>>, vector<1x128x64xf32>
    %64 = vector.shape_cast %63 : vector<1x128x64xf32> to vector<128x64xf32>
    %65 = tpu.concatenate %50, %52, %54, %56, %58, %60, %62, %64 in 1 : vector<128x64xf32>, vector<128x64xf32>, vector<128x64xf32>, vector<128x64xf32>, vector<128x64xf32>, vector<128x64xf32>, vector<128x64xf32>, vector<128x64xf32> -> vector<128x512xf32>
    %66 = tpu.concatenate %48, %65 in 0 : vector<128x512xf32>, vector<128x512xf32> -> vector<256x512xf32>
    %c0_65 = arith.constant 0 : index
    %c0_66 = arith.constant 0 : index
    %67 = vector.load %arg4[%c0_65, %c0_66] : memref<512x32xf32, #tpu.memory_space<vmem>>, vector<512x32xf32>
    %cst_67 = arith.constant dense<0.000000e+00> : vector<256x32xf32>
    %68 = tpu.matmul %66, %67, %cst_67 {dimension_numbers = #tpu.dot_dimension_numbers<[1], [0], [0], [1], [0, 0, 1, 1], [], []>} : vector<256x512xf32>, vector<512x32xf32>, vector<256x32xf32> -> vector<256x32xf32>
    %c0_68 = arith.constant 0 : index
    %c0_69 = arith.constant 0 : index
    %69 = vector.load %arg5[%c0_68, %c0_69] : memref<1x32xf32, #tpu.memory_space<vmem>>, vector<1x32xf32>
    %70 = vector.broadcast %69 : vector<1x32xf32> to vector<256x32xf32>
    %71 = arith.mulf %68, %70 : vector<256x32xf32>
    %c0_70 = arith.constant 0 : index
    %c0_71 = arith.constant 0 : index
    %72 = vector.load %arg6[%c0_70, %c0_71] : memref<1x32xf32, #tpu.memory_space<vmem>>, vector<1x32xf32>
    %73 = vector.broadcast %72 : vector<1x32xf32> to vector<256x32xf32>
    %74 = arith.addf %71, %73 : vector<256x32xf32>
    %cst_72 = arith.constant 0.000000e+00 : f32
    %75 = vector.broadcast %cst_72 : f32 to vector<256x32xf32>
    %76 = arith.maximumf %74, %75 : vector<256x32xf32>
    %77 = vector.extract_strided_slice %76 {offsets = [0, 0], sizes = [128, 32], strides = [1, 1]} : vector<256x32xf32> to vector<128x32xf32>
    %cst_73 = arith.constant dense<0.000000e+00> : vector<32xf32>
    %78 = vector.multi_reduction <add>, %77, %cst_73 [0] : vector<128x32xf32> to vector<32xf32>
    %79 = vector.shape_cast %78 : vector<32xf32> to vector<1x32xf32>
    %cst_74 = arith.constant 1.280000e+02 : f32
    %80 = vector.broadcast %cst_74 : f32 to vector<1x32xf32>
    %81 = arith.divf %79, %80 : vector<1x32xf32>
    %82 = vector.extract_strided_slice %76 {offsets = [128, 0], sizes = [128, 32], strides = [1, 1]} : vector<256x32xf32> to vector<128x32xf32>
    %cst_75 = arith.constant dense<0.000000e+00> : vector<32xf32>
    %83 = vector.multi_reduction <add>, %82, %cst_75 [0] : vector<128x32xf32> to vector<32xf32>
    %84 = vector.shape_cast %83 : vector<32xf32> to vector<1x32xf32>
    %cst_76 = arith.constant 1.280000e+02 : f32
    %85 = vector.broadcast %cst_76 : f32 to vector<1x32xf32>
    %86 = arith.divf %84, %85 : vector<1x32xf32>
    %87 = tpu.concatenate %81, %86 in 0 : vector<1x32xf32>, vector<1x32xf32> -> vector<2x32xf32>
    %c0_77 = arith.constant 0 : index
    %c0_78 = arith.constant 0 : index
    %88 = vector.load %arg7[%c0_77, %c0_78] : memref<32x64xf32, #tpu.memory_space<vmem>>, vector<32x64xf32>
    %cst_79 = arith.constant dense<0.000000e+00> : vector<2x64xf32>
    %89 = tpu.matmul %87, %88, %cst_79 {dimension_numbers = #tpu.dot_dimension_numbers<[1], [0], [0], [1], [0, 0, 1, 1], [], []>} : vector<2x32xf32>, vector<32x64xf32>, vector<2x64xf32> -> vector<2x64xf32>
    %c0_80 = arith.constant 0 : index
    %c0_81 = arith.constant 0 : index
    %90 = vector.load %arg8[%c0_80, %c0_81] : memref<1x64xf32, #tpu.memory_space<vmem>>, vector<1x64xf32>
    %91 = vector.broadcast %90 : vector<1x64xf32> to vector<2x64xf32>
    %92 = arith.addf %89, %91 : vector<2x64xf32>
    %cst_82 = arith.constant 0.000000e+00 : f32
    %93 = vector.broadcast %cst_82 : f32 to vector<2x64xf32>
    %94 = arith.maximumf %92, %93 : vector<2x64xf32>
    %c0_83 = arith.constant 0 : index
    %c0_84 = arith.constant 0 : index
    %95 = vector.load %arg9[%c0_83, %c0_84] : memref<64x32xf32, #tpu.memory_space<vmem>>, vector<64x32xf32>
    %cst_85 = arith.constant dense<0.000000e+00> : vector<2x32xf32>
    %96 = tpu.matmul %94, %95, %cst_85 {dimension_numbers = #tpu.dot_dimension_numbers<[1], [0], [0], [1], [0, 0, 1, 1], [], []>} : vector<2x64xf32>, vector<64x32xf32>, vector<2x32xf32> -> vector<2x32xf32>
    %c0_86 = arith.constant 0 : index
    %c0_87 = arith.constant 0 : index
    %97 = vector.load %arg10[%c0_86, %c0_87] : memref<1x32xf32, #tpu.memory_space<vmem>>, vector<1x32xf32>
    %98 = vector.broadcast %97 : vector<1x32xf32> to vector<2x32xf32>
    %99 = arith.addf %96, %98 : vector<2x32xf32>
    %cst_88 = arith.constant 0.000000e+00 : f32
    %100 = vector.broadcast %cst_88 : f32 to vector<2x32xf32>
    %101 = arith.maximumf %99, %100 : vector<2x32xf32>
    %c0_89 = arith.constant 0 : index
    %c0_90 = arith.constant 0 : index
    %102 = vector.load %arg11[%c0_89, %c0_90] : memref<32x1xf32, #tpu.memory_space<vmem>>, vector<32x1xf32>
    %cst_91 = arith.constant dense<0.000000e+00> : vector<2x1xf32>
    %103 = tpu.matmul %101, %102, %cst_91 {dimension_numbers = #tpu.dot_dimension_numbers<[1], [0], [0], [1], [0, 0, 1, 1], [], []>} : vector<2x32xf32>, vector<32x1xf32>, vector<2x1xf32> -> vector<2x1xf32>
    %c0_92 = arith.constant 0 : index
    %c0_93 = arith.constant 0 : index
    %104 = vector.load %arg12[%c0_92, %c0_93] : memref<1x1xf32, #tpu.memory_space<vmem>>, vector<1x1xf32>
    %105 = vector.broadcast %104 : vector<1x1xf32> to vector<2x1xf32>
    %106 = arith.addf %103, %105 : vector<2x1xf32>
    %107 = arith.negf %106 : vector<2x1xf32>
    %108 = math.exp %107 : vector<2x1xf32>
    %cst_94 = arith.constant 1.000000e+00 : f32
    %109 = vector.broadcast %cst_94 : f32 to vector<2x1xf32>
    %110 = arith.addf %109, %108 : vector<2x1xf32>
    %111 = arith.divf %109, %110 : vector<2x1xf32>
    %c0_95 = arith.constant 0 : index
    %c0_96 = arith.constant 0 : index
    %112 = vector.load %arg13[%c0_95, %c0_96] : memref<2x1xf32, #tpu.memory_space<vmem>>, vector<2x1xf32>
    tpu.vector_store %arg13[%c0_95, %c0_96], %111 {strides = array<i32>} : memref<2x1xf32, #tpu.memory_space<vmem>>, vector<2x1xf32>,
    return
  }
}

</mosaic_0001>

<bundles_post_ra>
// kernel: tpu_custom_call.1
= control target key start
LH: loop header
LB: loop body
LE: loop exit
PB: predicated region body
PF: predicated region fallthrough
CT: control target
= control target key end

     0   :  { %vm184_vm0 = vcmask 654336   ;;  %vm724_vm1 = vcmask 523264   ;;  %s2907_s22 = smov 64   ;;  %vm2278_vm2 = vcmask 261120   ;;  %vm2362_vm4 = vcmask 1040384   ;;  %s4264_s1 = inlined_call_operand.vmem [shape: f32[336,64], index: 1, kind: input, shape index: {}]   ;;  %s4265_s0 = inlined_call_operand.vmem [shape: f32[256,336], index: 0, kind: input, shape index: {}]   ;;  %s4266_s2 = inlined_call_operand.vmem [shape: f32[1,64], index: 2, kind: input, shape index: {}]   ;;  %s4267_s3 = inlined_call_operand.vmem [shape: f32[1,64], index: 3, kind: input, shape index: {}]   ;;  %s4268_s4 = inlined_call_operand.vmem [shape: f32[512,32], index: 4, kind: input, shape index: {}]   ;;  %s4269_s5 = inlined_call_operand.vmem [shape: f32[1,32], index: 5, kind: input, shape index: {}]   ;;  %s4270_s6 = inlined_call_operand.vmem [shape: f32[1,32], index: 6, kind: input, shape index: {}]   ;;  %s4271_s7 = inlined_call_operand.vmem [shape: f32[32,64], index: 7, kind: input, shape index: {}]   ;;  %s4272_s8 = inlined_call_operand.vmem [shape: f32[1,64], index: 8, kind: input, shape index: {}]   ;;  %s4273_s9 = inlined_call_operand.vmem [shape: f32[64,32], index: 9, kind: input, shape index: {}]   ;;  %s4274_s10 = inlined_call_operand.vmem [shape: f32[1,32], index: 10, kind: input, shape index: {}]   ;;  %s4275_s11 = inlined_call_operand.vmem [shape: f32[32,1], index: 11, kind: input, shape index: {}]   ;;  %s4276_s12 = inlined_call_operand.<no memory space> [shape: f32[1,1], index: 12, kind: input, shape index: {}]   ;;  %s4277_s13 = inlined_call_operand.vmem [shape: f32[2,1], index: 13, kind: output, shape index: {}]  }
   0x1   :  { %v157_v0 = vld [vmem:[%s4264_s1 + $0x78] sm:$0xff]  ;;  %v2990_v2 = vld [vmem:[%s4264_s1 + $0x148] sm:$0xff]  ;;  %v156_v3 = vld [vmem:[%s4264_s1 + $0x70] sm:$0xff]  ;;  %vm2482_vm8 = vcmask 1024  }
   0x2   :  { %v2985_v1 = vld [vmem:[%s4264_s1 + $0xf8] sm:$0xff]  ;;  %281 = vmatpush.msra.mxu0 %v157_v0  ;;  %2524 = vmatpush.msra.mxu3 %v157_v0  ;;  %v2998_v4 = vld [vmem:[%s4264_s1 + $0xf0] sm:$0xff]  ;;  %v3003_v5 = vld [vmem:[%s4264_s1 + $0x140] sm:$0xff] }
   0x3   :  { %394 = vmatpush.msra.mxu1 %v2985_v1  ;;  %513 = vmatpush.msra.mxu2 %v2990_v2  ;;  %v155_v6 = vld [vmem:[%s4264_s1 + $0x68] sm:$0xff]  ;;  %v3018_v8 = vld [vmem:[%s4264_s1 + $0x138] sm:$0xff]  ;;  %v154_v9 = vld [vmem:[%s4264_s1 + $0x60] sm:$0xff] }
   0x4   :  { %282 = vmatpush.msra.mxu0 %v156_v3  ;;  %2525 = vmatpush.msra.mxu3 %v156_v3  ;;  %v3013_v7 = vld [vmem:[%s4264_s1 + $0xe8] sm:$0xff]  ;;  %v3028_v10 = vld [vmem:[%s4264_s1 + $0xe0] sm:$0xff]  ;;  %v3033_v11 = vld [vmem:[%s4264_s1 + $0x130] sm:$0xff] }
   0x5   :  { %395 = vmatpush.msra.mxu1 %v2998_v4  ;;  %514 = vmatpush.msra.mxu2 %v3003_v5  ;;  %v153_v12 = vld [vmem:[%s4264_s1 + $0x58] sm:$0xff]  ;;  %v3048_v14 = vld [vmem:[%s4264_s1 + $0x128] sm:$0xff]  ;;  %v152_v15 = vld [vmem:[%s4264_s1 + $0x50] sm:$0xff] }
   0x6   :  { %283 = vmatpush.msra.mxu0 %v155_v6  ;;  %2526 = vmatpush.msra.mxu3 %v155_v6  ;;  %v3043_v13 = vld [vmem:[%s4264_s1 + $0xd8] sm:$0xff]  ;;  %v3058_v16 = vld [vmem:[%s4264_s1 + $0xd0] sm:$0xff]  ;;  %v3063_v17 = vld [vmem:[%s4264_s1 + $0x120] sm:$0xff] }
   0x7   :  { %396 = vmatpush.msra.mxu1 %v3013_v7  ;;  %515 = vmatpush.msra.mxu2 %v3018_v8  ;;  %v151_v18 = vld [vmem:[%s4264_s1 + $0x48] sm:$0xff]  ;;  %v3078_v20 = vld [vmem:[%s4264_s1 + $0x118] sm:$0xff]  ;;  %v150_v21 = vld [vmem:[%s4264_s1 + $0x40] sm:$0xff] }
   0x8   :  { %284 = vmatpush.msra.mxu0 %v154_v9  ;;  %2527 = vmatpush.msra.mxu3 %v154_v9  ;;  %v3073_v19 = vld [vmem:[%s4264_s1 + $0xc8] sm:$0xff]  ;;  %v3088_v22 = vld [vmem:[%s4264_s1 + $0xc0] sm:$0xff]  ;;  %v3093_v23 = vld [vmem:[%s4264_s1 + $0x110] sm:$0xff] }
   0x9   :  { %397 = vmatpush.msra.mxu1 %v3028_v10  ;;  %516 = vmatpush.msra.mxu2 %v3033_v11  ;;  %v149_v24 = vld [vmem:[%s4264_s1 + $0x38] sm:$0xff]  ;;  %v3108_v26 = vld [vmem:[%s4264_s1 + $0x108] sm:$0xff]  ;;  %v148_v27 = vld [vmem:[%s4264_s1 + $0x30] sm:$0xff] }
   0xa   :  { %285 = vmatpush.msra.mxu0 %v153_v12  ;;  %2528 = vmatpush.msra.mxu3 %v153_v12  ;;  %v3103_v25 = vld [vmem:[%s4264_s1 + $0xb8] sm:$0xff]  ;;  %v3118_v28 = vld [vmem:[%s4264_s1 + $0xb0] sm:$0xff]  ;;  %v3123_v29 = vld [vmem:[%s4264_s1 + $0x100] sm:$0xff] }
   0xb   :  { %398 = vmatpush.msra.mxu1 %v3043_v13  ;;  %517 = vmatpush.msra.mxu2 %v3048_v14  ;;  %v48_v30 = vld [vmem:[%s4265_s0 + $0x10] sm:$0xff]  ;;  %v147_v31 = vld [vmem:[%s4264_s1 + $0x28] sm:$0xff]  ;;  %v146_v33 = vld [vmem:[%s4264_s1 + $0x20] sm:$0xff] }
   0xc   :  { %286 = vmatpush.msra.mxu0 %v152_v15  ;;  %2529 = vmatpush.msra.mxu3 %v152_v15  ;;  %v3136_v32 = vld [vmem:[%s4264_s1 + $0xa8] sm:$0xff]  ;;  %v3147_v34 = vld [vmem:[%s4264_s1 + $0xa0] sm:$0xff]  ;;  %v145_v35 = vld [vmem:[%s4264_s1 + $0x18] sm:$0xff] }
   0xd   :  { %399 = vmatpush.msra.mxu1 %v3058_v16  ;;  %518 = vmatpush.msra.mxu2 %v3063_v17  ;;  %v3156_v36 = vld [vmem:[%s4264_s1 + $0x98] sm:$0xff]  ;;  %v144_v37 = vld [vmem:[%s4264_s1 + $0x10] sm:$0xff]  ;;  %v51_v39 = vld [vmem:[%s4265_s0 + $0x28] sm:$0xff] }
   0xe   :  { %287 = vmatpush.msra.mxu0 %v151_v18  ;;  %2530 = vmatpush.msra.mxu3 %v151_v18  ;;  %v3165_v38 = vld [vmem:[%s4264_s1 + $0x90] sm:$0xff]  ;;  %v143_v40 = vld [vmem:[%s4264_s1 + $0x8] sm:$0xff]  ;;  %v142_v42 = vld [vmem:[%s4264_s1] sm:$0xff] }
   0xf   :  { %400 = vmatpush.msra.mxu1 %v3073_v19  ;;  %519 = vmatpush.msra.mxu2 %v3078_v20  ;;  %v3177_v41 = vld [vmem:[%s4264_s1 + $0x88] sm:$0xff]  ;;  %v158_v43 = vld [vmem:[%s4264_s1 + $0x80] sm:$0xff]  ;;  %v121_v45 = vld [vmem:[%s4265_s0 + $0x258] sm:$0xff] }
  0x10   :  { %288 = vmatpush.msra.mxu0 %v150_v21  ;;  %2531 = vmatpush.msra.mxu3 %v150_v21  ;;  %v46_v44 = vld [vmem:[%s4265_s0] sm:$0xff]  ;;  %v47_v46 = vld [vmem:[%s4265_s0 + $0x8] sm:$0xff]  ;;  %v49_v48 = vld [vmem:[%s4265_s0 + $0x18] sm:$0xff] }
  0x11   :  { %401 = vmatpush.msra.mxu1 %v3088_v22  ;;  %520 = vmatpush.msra.mxu2 %v3093_v23  ;;  %v54_v47 = vld [vmem:[%s4265_s0 + $0x40] sm:$0xff]  ;;  %v124_v49 = vld [vmem:[%s4265_s0 + $0x270] sm:$0xff]  ;;  %v57_v51 = vld [vmem:[%s4265_s0 + $0x58] sm:$0xff] }
  0x12   :  { %289 = vmatpush.msra.mxu0 %v149_v24  ;;  %2532 = vmatpush.msra.mxu3 %v149_v24  ;;  %v50_v50 = vld [vmem:[%s4265_s0 + $0x20] sm:$0xff]  ;;  %v52_v52 = vld [vmem:[%s4265_s0 + $0x30] sm:$0xff]  ;;  %v127_v53 = vld [vmem:[%s4265_s0 + $0x288] sm:$0xff] }
  0x13   :  { %402 = vmatpush.msra.mxu1 %v3103_v25  ;;  %521 = vmatpush.msra.mxu2 %v3108_v26  ;;  %v53_v54 = vld [vmem:[%s4265_s0 + $0x38] sm:$0xff]  ;;  %v60_v55 = vld [vmem:[%s4265_s0 + $0x70] sm:$0xff]  ;;  %v55_v57 = vld [vmem:[%s4265_s0 + $0x48] sm:$0xff] }
  0x14   :  { %290 = vmatpush.msra.mxu0 %v148_v27  ;;  %2533 = vmatpush.msra.mxu3 %v148_v27  ;;  %v1689_v56 = vld [vmem:[%s4268_s4 + $0xf8] sm:$0xff]  ;;  %v130_v58 = vld [vmem:[%s4265_s0 + $0x2a0] sm:$0xff]  ;;  %v56_v59 = vld [vmem:[%s4265_s0 + $0x50] sm:$0xff] }
  0x15   :  { %403 = vmatpush.msra.mxu1 %v3118_v28  ;;  %522 = vmatpush.msra.mxu2 %v3123_v29  ;;  %v63_v60 = vld [vmem:[%s4265_s0 + $0x88] sm:$0xff]  ;;  %v1688_v61 = vld [vmem:[%s4268_s4 + $0xf0] sm:$0xff]  ;;  %v58_v62 = vld [vmem:[%s4265_s0 + $0x60] sm:$0xff] }
  0x16   :  { %2488 = vmatmul.msk.f32.vlgmr.msra.gmra.mxu2 %vm184_vm0, %v48_v30  ;;  %291 = vmatpush.msra.mxu0 %v147_v31  ;;  %v133_v63 = vld [vmem:[%s4265_s0 + $0x2b8] sm:$0xff]  ;;  %v59_v0 = vld [vmem:[%s4265_s0 + $0x68] sm:$0xff]  ;;  %v62_v6 = vld [vmem:[%s4265_s0 + $0x80] sm:$0xff] }
  0x17   :  { %2534 = vmatpush.msra.mxu3 %v147_v31  ;;  %404 = vmatpush.msra.mxu1 %v3136_v32  ;;  %v61_v3 = vld [vmem:[%s4265_s0 + $0x78] sm:$0xff]  ;;  %v64_v9 = vld [vmem:[%s4265_s0 + $0x90] sm:$0xff]  ;;  %v67_v15 = vld [vmem:[%s4265_s0 + $0xa8] sm:$0xff] }
  0x18   :  { %292 = vmatpush.msra.mxu0 %v146_v33  ;;  %1835 = vmatpush.msrb.mxu2 %v1689_v56  ;;  %v72_v12 = vld [vmem:[%s4265_s0 + $0xd0] sm:$0xff]  ;;  %v75_v18 = vld [vmem:[%s4265_s0 + $0xe8] sm:$0xff]  ;;  %v125_v21 = vld [vmem:[%s4265_s0 + $0x278] sm:$0xff] }
  0x19   :  { %2535 = vmatpush.msra.mxu3 %v146_v33  ;;  %405 = vmatpush.msra.mxu1 %v3147_v34  ;;  %v1703_v24 = vld [vmem:[%s4268_s4 + $0x168] sm:$0xff]  ;;  %v73_v27 = vld [vmem:[%s4265_s0 + $0xd8] sm:$0xff]  ;;  %v1702_v31 = vld [vmem:[%s4268_s4 + $0x160] sm:$0xff] }
  0x1a   :  { %293 = vmatpush.msra.mxu0 %v145_v35  ;;  %1836 = vmatpush.msrb.mxu2 %v1688_v61  ;;  %v81_v30 = vld [vmem:[%s4265_s0 + $0x118] sm:$0xff]  ;;  %v131_v33 = vld [vmem:[%s4265_s0 + $0x2a8] sm:$0xff]  ;;  %v132_v61 = vld [vmem:[%s4265_s0 + $0x2b0] sm:$0xff] }
  0x1b   :  { %2536 = vmatpush.msra.mxu3 %v145_v35  ;;  %406 = vmatpush.msra.mxu1 %v3156_v36  ;;  %v84_v35 = vld [vmem:[%s4265_s0 + $0x130] sm:$0xff]  ;;  %v89_v56 = vld [vmem:[%s4265_s0 + $0x158] sm:$0xff] }
  0x1c   :  { %294 = vmatpush.msra.mxu0 %v144_v37 }
  0x1d   :  { %2537 = vmatpush.msra.mxu3 %v144_v37  ;;  %407 = vmatpush.msra.mxu1 %v3165_v38  ;;  %v1684_v37 = vld [vmem:[%s4268_s4 + $0xd0] sm:$0xff] }
  0x1e   :  { %2489 = vmatmul.msk.f32.gmra.mxu2 %vm184_vm0, %v51_v39  ;;  %295 = vmatpush.msra.mxu0 %v143_v40  ;;  %v134_v39 = vld [vmem:[%s4265_s0 + $0x2c0] sm:$0xff] }
  0x1f   :  { %2538 = vmatpush.msra.mxu3 %v143_v40  ;;  %408 = vmatpush.msra.mxu1 %v3177_v41  ;;  %v80_v40 = vld [vmem:[%s4265_s0 + $0x110] sm:$0xff] }
  0x20   :  { %296 = vmatpush.msra.mxu0 %v142_v42 }
  0x21   :  { %2539 = vmatpush.msra.mxu3 %v142_v42  ;;  %409 = vmatpush.msra.mxu1 %v158_v43  ;;  %v1701_v42 = vld [vmem:[%s4268_s4 + $0x158] sm:$0xff] }
  0x22   :  { %297 = vmatmul.f32.vlgmr.msra.gmra.mxu0 %v46_v44  ;;  %372 = vmatmul.f32.vlgmr.msra.gmra.mxu3 %v121_v45  ;;  %v82_v44 = vld [vmem:[%s4265_s0 + $0x120] sm:$0xff]  ;;  %v137_v45 = vld [vmem:[%s4265_s0 + $0x2d8] sm:$0xff] }
  0x23   :  { %410 = vmatmul.f32.vlgmr.msra.gmra.mxu1 %v47_v46  ;;  %2540 = vmatpush.msrb.mxu3 %v2985_v1  ;;  %v66_v1 = vld [vmem:[%s4265_s0 + $0xa0] sm:$0xff]  ;;  %v83_v46 = vld [vmem:[%s4265_s0 + $0x128] sm:$0xff] }
  0x25   :  { %2541 = vmatpush.msrb.mxu3 %v2998_v4  ;;  %v136_v4 = vld [vmem:[%s4265_s0 + $0x2d0] sm:$0xff] }
  0x26   :  { %2490 = vmatmul.msk.f32.gmra.mxu2 %vm184_vm0, %v54_v47  ;;  %v90_v47 = vld [vmem:[%s4265_s0 + $0x160] sm:$0xff] }
  0x27   :  { %2542 = vmatpush.msrb.mxu3 %v3013_v7  ;;  %v1721_v7 = vld [vmem:[%s4268_s4 + $0x1f8] sm:$0xff] }
  0x28   :  { %2061 = vmatpush.msrb.mxu1 %v1721_v7  ;;  %v95_v7 = vld [vmem:[%s4265_s0 + $0x188] sm:$0xff] }
  0x29   :  { %2543 = vmatpush.msrb.mxu3 %v3028_v10  ;;  %v139_v10 = vld [vmem:[%s4265_s0 + $0x2e8] sm:$0xff] }
  0x2a   :  { %300 = vmatmul.f32.gmra.mxu0 %v49_v48  ;;  %375 = vmatmul.f32.gmra.mxu3 %v124_v49  ;;  %v85_v48 = vld [vmem:[%s4265_s0 + $0x138] sm:$0xff]  ;;  %v140_v49 = vld [vmem:[%s4265_s0 + $0x2f0] sm:$0xff] }
  0x2b   :  { %413 = vmatmul.f32.gmra.mxu1 %v50_v50  ;;  %2544 = vmatpush.msrb.mxu3 %v3043_v13  ;;  %v1704_v13 = vld [vmem:[%s4268_s4 + $0x170] sm:$0xff]  ;;  %v86_v50 = vld [vmem:[%s4265_s0 + $0x140] sm:$0xff] }
  0x2d   :  { %2545 = vmatpush.msrb.mxu3 %v3058_v16  ;;  %v122_v16 = vld [vmem:[%s4265_s0 + $0x260] sm:$0xff] }
  0x2e   :  { %2491 = vmatmul.msk.f32.gmra.mxu2 %vm184_vm0, %v57_v51  ;;  %v93_v51 = vld [vmem:[%s4265_s0 + $0x178] sm:$0xff] }
  0x2f   :  { %2546 = vmatpush.msrb.mxu3 %v3073_v19  ;;  %v1686_v19 = vld [vmem:[%s4268_s4 + $0xe0] sm:$0xff] }
  0x31   :  { %2547 = vmatpush.msrb.mxu3 %v3088_v22  ;;  %v71_v22 = vld [vmem:[%s4265_s0 + $0xc8] sm:$0xff] }
  0x32   :  { %303 = vmatmul.f32.gmra.mxu0 %v52_v52  ;;  %378 = vmatmul.f32.gmra.mxu3 %v127_v53  ;;  %v1683_v52 = vld [vmem:[%s4268_s4 + $0xc8] sm:$0xff]  ;;  %v2906_v53 = vmov 0.0  }
  0x33   :  { %416 = vmatmul.f32.gmra.mxu1 %v53_v54  ;;  %2548 = vmatpush.msrb.mxu3 %v3103_v25  ;;  %v1719_v25 = vld [vmem:[%s4268_s4 + $0x1e8] sm:$0xff]  ;;  %725 = vst.msk [vmem:[#allocation2] sm:$0xff] %vm724_vm1, %v2906_v53  ;;  %v88_v54 = vld [vmem:[%s4265_s0 + $0x150] sm:$0xff] }
  0x34   :  { %726 = vst.msk [vmem:[#allocation2 + $0x88] sm:$0xff] %vm724_vm1, %v2906_v53 }
  0x35   :  { %2549 = vmatpush.msrb.mxu3 %v3118_v28  ;;  %v128_v28 = vld [vmem:[%s4265_s0 + $0x290] sm:$0xff]  ;;  %744 = vst.msk [vmem:[#allocation2 + $0x90] sm:$0xff] %vm724_vm1, %v2906_v53 }
  0x36   :  { %2492 = vmatmul.msk.f32.gmra.mxu2 %vm184_vm0, %v60_v55  ;;  %745 = vst.msk [vmem:[#allocation2 + $0x118] sm:$0xff] %vm724_vm1, %v2906_v53  ;;  %v129_v55 = vld [vmem:[%s4265_s0 + $0x298] sm:$0xff]  ;;  %v103_v53 = vld [vmem:[%s4265_s0 + $0x1c8] sm:$0xff] }
  0x37   :  { %2550 = vmatpush.msrb.mxu3 %v3136_v32  ;;  %v76_v32 = vld [vmem:[%s4265_s0 + $0xf0] sm:$0xff] }
  0x39   :  { %2551 = vmatpush.msrb.mxu3 %v3147_v34  ;;  %v77_v34 = vld [vmem:[%s4265_s0 + $0xf8] sm:$0xff] }
  0x3a   :  { %306 = vmatmul.f32.gmra.mxu0 %v55_v57  ;;  %381 = vmatmul.f32.gmra.mxu3 %v130_v58  ;;  %v96_v57 = vld [vmem:[%s4265_s0 + $0x190] sm:$0xff] }
  0x3b   :  { %419 = vmatmul.f32.gmra.mxu1 %v56_v59  ;;  %2552 = vmatpush.msrb.mxu3 %v3156_v36  ;;  %v1718_v36 = vld [vmem:[%s4268_s4 + $0x1e0] sm:$0xff]  ;;  %v1700_v58 = vld [vmem:[%s4268_s4 + $0x150] sm:$0xff] }
  0x3c   :  { %v1716_v59 = vld [vmem:[%s4268_s4 + $0x1d0] sm:$0xff] }
  0x3d   :  { %2553 = vmatpush.msrb.mxu3 %v3165_v38  ;;  %v79_v38 = vld [vmem:[%s4265_s0 + $0x108] sm:$0xff] }
  0x3e   :  { %2493 = vmatmul.msk.f32.gmra.mxu2 %vm184_vm0, %v63_v60  ;;  %v91_v60 = vld [vmem:[%s4265_s0 + $0x168] sm:$0xff] }
  0x3f   :  { %2554 = vmatpush.msrb.mxu3 %v3177_v41  ;;  %v87_v41 = vld [vmem:[%s4265_s0 + $0x148] sm:$0xff] }
  0x41   :  { %2555 = vmatpush.msrb.mxu3 %v158_v43  ;;  %v1717_v43 = vld [vmem:[%s4268_s4 + $0x1d8] sm:$0xff] }
  0x42   :  { %309 = vmatmul.f32.gmra.mxu0 %v58_v62  ;;  %384 = vmatmul.f32.gmra.mxu3 %v133_v63  ;;  %v92_v62 = vld [vmem:[%s4265_s0 + $0x170] sm:$0xff] }
  0x43   :  { %422 = vmatmul.f32.gmra.mxu1 %v59_v0  ;;  %2556 = vmatpush.msra.mxu3 %v2990_v2  ;;  %v69_v2 = vld [vmem:[%s4265_s0 + $0xb8] sm:$0xff]  ;;  %v99_v0 = vld [vmem:[%s4265_s0 + $0x1a8] sm:$0xff] }
  0x45   :  { %2557 = vmatpush.msra.mxu3 %v3003_v5  ;;  %v1705_v5 = vld [vmem:[%s4268_s4 + $0x178] sm:$0xff] }
  0x46   :  { %2494 = vmatmul.msk.f32.gmra.mxu2 %vm184_vm0, %v66_v1  ;;  %1948 = vmatpush.msrb.mxu0 %v1705_v5  ;;  %v1682_v1 = vld [vmem:[%s4268_s4 + $0xc0] sm:$0xff] }
  0x47   :  { %2558 = vmatpush.msra.mxu3 %v3018_v8  ;;  %v1687_v8 = vld [vmem:[%s4268_s4 + $0xe8] sm:$0xff] }
  0x48   :  { %1837 = vmatpush.msrb.mxu2 %v1687_v8  ;;  %1949 = vmatpush.msrb.mxu0 %v1704_v13  ;;  %v102_v13 = vld [vmem:[%s4265_s0 + $0x1c0] sm:$0xff] }
  0x49   :  { %2559 = vmatpush.msra.mxu3 %v3033_v11  ;;  %v65_v11 = vld [vmem:[%s4265_s0 + $0x98] sm:$0xff] }
  0x4a   :  { %312 = vmatmul.f32.gmra.mxu0 %v61_v3  ;;  %387 = vmatmul.f32.gmra.mxu3 %v136_v4  ;;  %v1699_v3 = vld [vmem:[%s4268_s4 + $0x148] sm:$0xff] }
  0x4b   :  { %425 = vmatmul.f32.gmra.mxu1 %v62_v6  ;;  %2560 = vmatpush.msra.mxu3 %v3048_v14  ;;  %v1720_v14 = vld [vmem:[%s4268_s4 + $0x1f0] sm:$0xff]  ;;  %v94_v6 = vld [vmem:[%s4265_s0 + $0x180] sm:$0xff] }
  0x4c   :  { %2062 = vmatpush.msrb.mxu1 %v1720_v14  ;;  %1838 = vmatpush.msrb.mxu2 %v1686_v19  ;;  %v1715_v14 = vld [vmem:[%s4268_s4 + $0x1c8] sm:$0xff] }
  0x4d   :  { %2561 = vmatpush.msra.mxu3 %v3063_v17  ;;  %v68_v17 = vld [vmem:[%s4265_s0 + $0xb0] sm:$0xff]  ;;  %1950 = vmatpush.msrb.mxu0 %v1703_v24 }
  0x4e   :  { %2495 = vmatmul.msk.f32.gmra.mxu2 %vm184_vm0, %v69_v2  ;;  %2063 = vmatpush.msrb.mxu1 %v1719_v25  ;;  %v135_v2 = vld [vmem:[%s4265_s0 + $0x2c8] sm:$0xff] }
  0x4f   :  { %2562 = vmatpush.msra.mxu3 %v3078_v20  ;;  %v70_v20 = vld [vmem:[%s4265_s0 + $0xc0] sm:$0xff]  ;;  %1951 = vmatpush.msrb.mxu0 %v1702_v31 }
  0x50   :  { %2064 = vmatpush.msrb.mxu1 %v1718_v36  ;;  %v141_v36 = vld [vmem:[%s4265_s0 + $0x2f8] sm:$0xff] }
  0x51   :  { %2563 = vmatpush.msra.mxu3 %v3093_v23  ;;  %v78_v23 = vld [vmem:[%s4265_s0 + $0x100] sm:$0xff]  ;;  %1952 = vmatpush.msrb.mxu0 %v1701_v42 }
  0x52   :  { %315 = vmatmul.f32.gmra.mxu0 %v64_v9  ;;  %390 = vmatmul.f32.gmra.mxu3 %v139_v10  ;;  %v3502_v9 = vld [vmem:[%s4266_s2] ss:$0 sm:$0xff] }
  0x53   :  { %428 = vmatmul.f32.gmra.mxu1 %v65_v11  ;;  %2564 = vmatpush.msra.mxu3 %v3108_v26  ;;  %v1685_v26 = vld [vmem:[%s4268_s4 + $0xd8] sm:$0xff]  ;;  %v3507_v11 = vld [vmem:[%s4267_s3] ss:$0 sm:$0xff] }
  0x54   :  { %1839 = vmatpush.msrb.mxu2 %v1685_v26  ;;  %2065 = vmatpush.msrb.mxu1 %v1717_v43 }
  0x55   :  { %2565 = vmatpush.msra.mxu3 %v3123_v29  ;;  %v74_v29 = vld [vmem:[%s4265_s0 + $0xe0] sm:$0xff]  ;;  %1953 = vmatpush.msrb.mxu0 %v1700_v58 }
  0x56   :  { %2496 = vmatmul.msk.f32.gmra.mxu2 %vm184_vm0, %v72_v12  ;;  %2066 = vmatpush.msrb.mxu1 %v1716_v59 }
  0x57   :  { %1840 = vmatpush.msrb.mxu2 %v1684_v37  ;;  %1954 = vmatpush.msrb.mxu0 %v1699_v3  ;;  %v1713_v3 = vld [vmem:[%s4268_s4 + $0x1b8] sm:$0xff] }
  0x58   :  { %2067 = vmatpush.msrb.mxu1 %v1715_v14 }
  0x59   :  { %1841 = vmatpush.msrb.mxu2 %v1683_v52 }
  0x5a   :  { %318 = vmatmul.f32.gmra.mxu0 %v67_v15  ;;  %485 = vmatmul.f32.vlgmr.msrb.gmra.mxu3 %v122_v16  ;;  %v1681_v15 = vld [vmem:[%s4268_s4 + $0xb8] sm:$0xff] }
  0x5b   :  { %431 = vmatmul.f32.gmra.mxu1 %v68_v17  ;;  %1842 = vmatpush.msrb.mxu2 %v1682_v1  ;;  %v111_v1 = vld [vmem:[%s4265_s0 + $0x208] sm:$0xff] }
  0x5d   :  { %1843 = vmatpush.msrb.mxu2 %v1681_v15 }
  0x5e   :  { %2497 = vmatmul.msk.f32.gmra.mxu2 %vm184_vm0, %v75_v18 }
  0x62   :  { %321 = vmatmul.f32.gmra.mxu0 %v70_v20  ;;  %488 = vmatmul.f32.gmra.mxu3 %v125_v21  ;;  %v97_v20 = vld [vmem:[%s4265_s0 + $0x198] sm:$0xff]  ;;  %v138_v21 = vld [vmem:[%s4265_s0 + $0x2e0] sm:$0xff] }
  0x63   :  { %434 = vmatmul.f32.gmra.mxu1 %v71_v22 }
  0x66   :  { %2498 = vmatmul.msk.f32.gmra.mxu2 %vm184_vm0, %v78_v23  ;;  %v98_v23 = vld [vmem:[%s4265_s0 + $0x1a0] sm:$0xff] }
  0x6a   :  { %324 = vmatmul.f32.gmra.mxu0 %v73_v27  ;;  %491 = vmatmul.f32.gmra.mxu3 %v128_v28  ;;  %v105_v28 = vld [vmem:[%s4265_s0 + $0x1d8] sm:$0xff] }
  0x6b   :  { %437 = vmatmul.f32.gmra.mxu1 %v74_v29  ;;  %v1698_v29 = vld [vmem:[%s4268_s4 + $0x140] sm:$0xff] }
  0x6c   :  { %1955 = vmatpush.msrb.mxu0 %v1698_v29 }
  0x6e   :  { %2499 = vmatmul.msk.f32.gmra.mxu2 %vm184_vm0, %v81_v30  ;;  %v1714_v30 = vld [vmem:[%s4268_s4 + $0x1c0] sm:$0xff] }
  0x6f   :  { %2068 = vmatpush.msrb.mxu1 %v1714_v30 }
  0x71   :  { %2069 = vmatpush.msrb.mxu1 %v1713_v3 }
  0x72   :  { %327 = vmatmul.f32.gmra.mxu0 %v76_v32  ;;  %494 = vmatmul.f32.gmra.mxu3 %v131_v33 }
  0x73   :  { %440 = vmatmul.f32.gmra.mxu1 %v77_v34 }
  0x76   :  { %2500 = vmatmul.msk.f32.gmra.mxu2 %vm184_vm0, %v84_v35  ;;  %v100_v35 = vld [vmem:[%s4265_s0 + $0x1b0] sm:$0xff] }
  0x7a   :  { %330 = vmatmul.f32.gmra.mxu0 %v79_v38  ;;  %497 = vmatmul.f32.gmra.mxu3 %v134_v39  ;;  %v101_v38 = vld [vmem:[%s4265_s0 + $0x1b8] sm:$0xff] }
  0x7b   :  { %443 = vmatmul.f32.gmra.mxu1 %v80_v40 }
  0x7e   :  { %2501 = vmatmul.msk.f32.gmra.mxu2 %vm184_vm0, %v87_v41 }
  0x82   :  { %333 = vmatmul.f32.gmra.mxu0 %v82_v44  ;;  %500 = vmatmul.f32.gmra.mxu3 %v137_v45 }
  0x83   :  { %446 = vmatmul.f32.gmra.mxu1 %v83_v46  ;;  %v108_v46 = vld [vmem:[%s4265_s0 + $0x1f0] sm:$0xff] }
  0x86   :  { %2502 = vmatmul.msk.f32.gmra.mxu2 %vm184_vm0, %v90_v47  ;;  %v1680_v47 = vld [vmem:[%s4268_s4 + $0xb0] sm:$0xff] }
  0x87   :  { %1844 = vmatpush.msrb.mxu2 %v1680_v47 }
  0x8a   :  { %336 = vmatmul.f32.gmra.mxu0 %v85_v48  ;;  %503 = vmatmul.f32.gmra.mxu3 %v140_v49  ;;  %v1697_v48 = vld [vmem:[%s4268_s4 + $0x138] sm:$0xff] }
  0x8b   :  { %449 = vmatmul.f32.gmra.mxu1 %v86_v50  ;;  %1956 = vmatpush.msrb.mxu0 %v1697_v48 }
  0x8e   :  { %2503 = vmatmul.msk.f32.gmra.mxu2 %vm184_vm0, %v93_v51 }
  0x92   :  { %339 = vmatmul.f32.gmra.mxu0 %v88_v54  ;;  %2515 = vmatmul.msk.f32.vlgmr.msra.gmra.mxu3 %vm184_vm0, %v129_v55  ;;  %v104_v55 = vld [vmem:[%s4265_s0 + $0x1d0] sm:$0xff] }
  0x93   :  { %452 = vmatmul.f32.gmra.mxu1 %v89_v56 }
  0x96   :  { %2504 = vmatmul.msk.f32.gmra.mxu2 %vm184_vm0, %v96_v57 }
  0x99   :  { %v524_v63 = vpop.f32.mrf.mxu2 }
  0x9a   :  { %342 = vmatmul.f32.gmra.mxu0 %v91_v60  ;;  %2516 = vmatmul.msk.f32.gmra.mxu3 %vm184_vm0, %v132_v61 }
  0x9b   :  { %455 = vmatmul.f32.gmra.mxu1 %v92_v62 }
  0x9e   :  { %2505 = vmatmul.msk.f32.gmra.mxu2 %vm184_vm0, %v99_v0 }
  0x9f   :  { %v298_v4 = vpop.f32.mrf.mxu0 }
  0xa0   :  { %v411_v5 = vpop.f32.mrf.mxu1 }
  0xa1   :  { %v412_v8 = vadd.f32 %v411_v5, %v298_v4  ;;  %v527_v10 = vpop.f32.mrf.mxu2 }
  0xa2   :  { %345 = vmatmul.f32.gmra.mxu0 %v94_v6  ;;  %2517 = vmatmul.msk.f32.gmra.mxu3 %vm184_vm0, %v135_v2 }
  0xa3   :  { %v525_v12 = vadd.f32 %v524_v63, %v412_v8  ;;  %458 = vmatmul.f32.gmra.mxu1 %v95_v7  ;;  %v106_v8 = vld [vmem:[%s4265_s0 + $0x1e0] sm:$0xff] }
  0xa5   :  { %v624_v16 = vmul.f32 %v3502_v9, %v525_v12  ;;  %v3520_v17 = vpop.f32.mrf.mxu3  ;;  %v107_v12 = vld [vmem:[%s4265_s0 + $0x1e8] sm:$0xff] }
  0xa6   :  { %2506 = vmatmul.msk.f32.gmra.mxu2 %vm184_vm0, %v102_v13 }
  0xa7   :  { %v660_v18 = vadd.f32 %v3507_v11, %v624_v16  ;;  %v301_v19 = vpop.f32.mrf.mxu0  ;;  %v114_v16 = vld [vmem:[%s4265_s0 + $0x220] sm:$0xff] }
  0xa8   :  { %v414_v22 = vpop.f32.mrf.mxu1 }
  0xa9   :  { %v692_v24 = vmax.f32 %v660_v18, 0.0  ;;  %v415_v25 = vadd.f32 %v414_v22, %v301_v19  ;;  %v530_v26 = vpop.f32.mrf.mxu2 }
  0xaa   :  { %348 = vmatmul.f32.gmra.mxu0 %v97_v20  ;;  %2518 = vmatmul.msk.f32.gmra.mxu3 %vm184_vm0, %v138_v21 }
  0xab   :  { %727 = vst.msk [vmem:[#allocation2 + $0x8] sm:$0xff] %vm724_vm1, %v692_v24  ;;  %v528_v27 = vadd.f32 %v527_v10, %v415_v25  ;;  %461 = vmatmul.f32.gmra.mxu1 %v98_v23  ;;  %v1679_v24 = vld [vmem:[%s4268_s4 + $0xa8] sm:$0xff]  ;;  %v1696_v25 = vld [vmem:[%s4268_s4 + $0x130] sm:$0xff] }
  0xac   :  { %1845 = vmatpush.msrb.mxu2 %v1679_v24  ;;  %1957 = vmatpush.msrb.mxu0 %v1696_v25  ;;  %v1677_v25 = vld [vmem:[%s4268_s4 + $0x98] sm:$0xff] }
  0xad   :  { %v625_v31 = vmul.f32 %v3502_v9, %v528_v27  ;;  %v3545_v32 = vpop.f32.mrf.mxu3  ;;  %v1712_v27 = vld [vmem:[%s4268_s4 + $0x1b0] sm:$0xff] }
  0xae   :  { %2507 = vmatmul.msk.f32.gmra.mxu2 %vm184_vm0, %v105_v28  ;;  %2070 = vmatpush.msrb.mxu1 %v1712_v27 }
  0xaf   :  { %v661_v33 = vadd.f32 %v3507_v11, %v625_v31  ;;  %v304_v34 = vpop.f32.mrf.mxu0 }
  0xb0   :  { %v417_v37 = vpop.f32.mrf.mxu1 }
  0xb1   :  { %v693_v39 = vmax.f32 %v661_v33, 0.0  ;;  %v418_v40 = vadd.f32 %v417_v37, %v304_v34  ;;  %v533_v41 = vpop.f32.mrf.mxu2  ;;  %v109_v33 = vld [vmem:[%s4265_s0 + $0x1f8] sm:$0xff] }
  0xb2   :  { %351 = vmatmul.f32.gmra.mxu0 %v100_v35  ;;  %2519 = vmatmul.msk.f32.gmra.mxu3 %vm184_vm0, %v141_v36  ;;  %v778_v42 = vld [vmem:[#allocation2 + $0x6] sm:$0xff] }
  0xb3   :  { %v810_v43 = vld [vmem:[#allocation2 + $0x8] sm:$0xff]  ;;  %728 = vst.msk [vmem:[#allocation2 + $0x10] sm:$0xff] %vm724_vm1, %v693_v39  ;;  %v531_v44 = vadd.f32 %v530_v26, %v418_v40  ;;  %464 = vmatmul.f32.gmra.mxu1 %v101_v38  ;;  %v110_v35 = vld [vmem:[%s4265_s0 + $0x200] sm:$0xff] }
  0xb4   :  { %v2569_v45 = vpack.i.bf16 %v810_v43, %v778_v42 }
  0xb5   :  { %v626_v49 = vmul.f32 %v3502_v9, %v531_v44  ;;  %v3571_v50 = vpop.f32.mrf.mxu3 }
  0xb6   :  { %2570 = vrot.lane.b32.xlu0 %v2569_v45, %s2907_s22  ;;  %2508 = vmatmul.msk.f32.gmra.mxu2 %vm184_vm0, %v108_v46  ;;  %v117_v45 = vld [vmem:[%s4265_s0 + $0x238] sm:$0xff] }
  0xb7   :  { %v662_v51 = vadd.f32 %v3507_v11, %v626_v49  ;;  %v307_v52 = vpop.f32.mrf.mxu0 }
  0xb8   :  { %v420_v54 = vpop.f32.mrf.mxu1 }
  0xb9   :  { %v694_v56 = vmax.f32 %v662_v51, 0.0  ;;  %v421_v57 = vadd.f32 %v420_v54, %v307_v52  ;;  %v536_v58 = vpop.f32.mrf.mxu2  ;;  %v112_v52 = vld [vmem:[%s4265_s0 + $0x210] sm:$0xff]  ;;  %v113_v54 = vld [vmem:[%s4265_s0 + $0x218] sm:$0xff] }
  0xba   :  { %354 = vmatmul.f32.gmra.mxu0 %v103_v53  ;;  %v842_v59 = vld [vmem:[#allocation2 + $0xa] sm:$0xff] }
  0xbb   :  { %v874_v60 = vld [vmem:[#allocation2 + $0xc] sm:$0xff]  ;;  %729 = vst.msk [vmem:[#allocation2 + $0x18] sm:$0xff] %vm724_vm1, %v694_v56  ;;  %v534_v62 = vadd.f32 %v533_v41, %v421_v57  ;;  %467 = vmatmul.f32.gmra.mxu1 %v104_v55 }
  0xbc   :  { %v779_v61 = vld [vmem:[#allocation2 + $0xe] sm:$0xff]  ;;  %v2579_v63 = vpack.i.bf16 %v874_v60, %v842_v59 }
  0xbd   :  { %v811_v0 = vld [vmem:[#allocation2 + $0x10] sm:$0xff]  ;;  %v627_v6 = vmul.f32 %v3502_v9, %v534_v62  ;;  %v3590_v2 = vpop.f32.mrf.mxu3 }
  0xbe   :  { %v2574_v4 = vpack.i.bf16 %v811_v0, %v779_v61  ;;  %2580 = vrot.lane.b32.xlu1 %v2579_v63, %s2907_s22  ;;  %2509 = vmatmul.msk.f32.gmra.mxu2 %vm184_vm0, %v111_v1  ;;  %v1678_v0 = vld [vmem:[%s4268_s4 + $0xa0] sm:$0xff]  ;;  %v1695_v1 = vld [vmem:[%s4268_s4 + $0x128] sm:$0xff] }
  0xbf   :  { %v663_v5 = vadd.f32 %v3507_v11, %v627_v6  ;;  %v310_v7 = vpop.f32.mrf.mxu0  ;;  %1846 = vmatpush.msrb.mxu2 %v1678_v0  ;;  %1958 = vmatpush.msrb.mxu0 %v1695_v1  ;;  %v1711_v6 = vld [vmem:[%s4268_s4 + $0x1a8] sm:$0xff] }
  0xc0   :  { %2575 = vrot.lane.b32.xlu0 %v2574_v4, %s2907_s22  ;;  %v423_v10 = vpop.f32.mrf.mxu1  ;;  %v120_v4 = vld [vmem:[%s4265_s0 + $0x250] sm:$0xff]  ;;  %2071 = vmatpush.msrb.mxu1 %v1711_v6 }
  0xc1   :  { %v695_v13 = vmax.f32 %v663_v5, 0.0  ;;  %v424_v14 = vadd.f32 %v423_v10, %v310_v7  ;;  %v539_v15 = vpop.f32.mrf.mxu2  ;;  %1847 = vmatpush.msrb.mxu2 %v1677_v25 }
  0xc2   :  { %357 = vmatmul.f32.gmra.mxu0 %v106_v8  ;;  %v843_v18 = vld [vmem:[#allocation2 + $0x12] sm:$0xff] }
  0xc3   :  { %v875_v19 = vld [vmem:[#allocation2 + $0x14] sm:$0xff]  ;;  %730 = vst.msk [vmem:[#allocation2 + $0x20] sm:$0xff] %vm724_vm1, %v695_v13  ;;  %v537_v21 = vadd.f32 %v536_v58, %v424_v14  ;;  %470 = vmatmul.f32.gmra.mxu1 %v107_v12  ;;  %v115_v12 = vld [vmem:[%s4265_s0 + $0x228] sm:$0xff] }
  0xc4   :  { %v780_v20 = vld [vmem:[#allocation2 + $0x16] sm:$0xff]  ;;  %v2589_v22 = vpack.i.bf16 %v875_v19, %v843_v18 }
  0xc5   :  { %v812_v23 = vld [vmem:[#allocation2 + $0x18] sm:$0xff]  ;;  %v628_v28 = vmul.f32 %v3502_v9, %v537_v21  ;;  %v3616_v29 = vpop.f32.mrf.mxu3  ;;  %v116_v14 = vld [vmem:[%s4265_s0 + $0x230] sm:$0xff] }
  0xc6   :  { %v2584_v26 = vpack.i.bf16 %v812_v23, %v780_v20  ;;  %2590 = vrot.lane.b32.xlu2 %v2589_v22, %s2907_s22  ;;  %2510 = vmatmul.msk.f32.gmra.mxu2 %vm184_vm0, %v114_v16 }
  0xc7   :  { %v664_v30 = vadd.f32 %v3507_v11, %v628_v28  ;;  %v313_v31 = vpop.f32.mrf.mxu0  ;;  %v123_v28 = vld [vmem:[%s4265_s0 + $0x268] sm:$0xff] }
  0xc8   :  { %2585 = vrot.lane.b32.xlu1 %v2584_v26, %s2907_s22  ;;  %v426_v34 = vpop.f32.mrf.mxu1  ;;  %v1694_v26 = vld [vmem:[%s4268_s4 + $0x120] sm:$0xff] }
  0xc9   :  { %v696_v36 = vmax.f32 %v664_v30, 0.0  ;;  %v427_v37 = vadd.f32 %v426_v34, %v313_v31  ;;  %v542_v38 = vpop.f32.mrf.mxu2  ;;  %1959 = vmatpush.msrb.mxu0 %v1694_v26  ;;  %v1710_v30 = vld [vmem:[%s4268_s4 + $0x1a0] sm:$0xff] }
  0xca   :  { %360 = vmatmul.f32.gmra.mxu0 %v109_v33  ;;  %v844_v39 = vld [vmem:[#allocation2 + $0x1a] sm:$0xff]  ;;  %2072 = vmatpush.msrb.mxu1 %v1710_v30 }
  0xcb   :  { %v876_v40 = vld [vmem:[#allocation2 + $0x1c] sm:$0xff]  ;;  %731 = vst.msk [vmem:[#allocation2 + $0x28] sm:$0xff] %vm724_vm1, %v696_v36  ;;  %v540_v42 = vadd.f32 %v539_v15, %v427_v37  ;;  %473 = vmatmul.f32.gmra.mxu1 %v110_v35 }
  0xcc   :  { %v781_v41 = vld [vmem:[#allocation2 + $0x1e] sm:$0xff]  ;;  %v2599_v43 = vpack.i.bf16 %v876_v40, %v844_v39 }
  0xcd   :  { %v813_v44 = vld [vmem:[#allocation2 + $0x20] sm:$0xff]  ;;  %v629_v47 = vmul.f32 %v3502_v9, %v540_v42  ;;  %v3633_v48 = vpop.f32.mrf.mxu3 }
  0xce   :  { %v2594_v46 = vpack.i.bf16 %v813_v44, %v781_v41  ;;  %2600 = vrot.lane.b32.xlu0 %v2599_v43, %s2907_s22  ;;  %2511 = vmatmul.msk.f32.gmra.mxu2 %vm184_vm0, %v117_v45  ;;  %v118_v36 = vld [vmem:[%s4265_s0 + $0x240] sm:$0xff] }
  0xcf   :  { %v665_v49 = vadd.f32 %v3507_v11, %v629_v47  ;;  %v316_v51 = vpop.f32.mrf.mxu0 }
  0xd0   :  { %2595 = vrot.lane.b32.xlu2 %v2594_v46, %s2907_s22  ;;  %v429_v53 = vpop.f32.mrf.mxu1 }
  0xd1   :  { %v697_v55 = vmax.f32 %v665_v49, 0.0  ;;  %v430_v56 = vadd.f32 %v429_v53, %v316_v51  ;;  %v545_v57 = vpop.f32.mrf.mxu2  ;;  %v126_v51 = vld [vmem:[%s4265_s0 + $0x280] sm:$0xff] }
  0xd2   :  { %363 = vmatmul.f32.gmra.mxu0 %v112_v52  ;;  %v845_v58 = vld [vmem:[#allocation2 + $0x22] sm:$0xff] }
  0xd3   :  { %v877_v59 = vld [vmem:[#allocation2 + $0x24] sm:$0xff]  ;;  %732 = vst.msk [vmem:[#allocation2 + $0x30] sm:$0xff] %vm724_vm1, %v697_v55  ;;  %v543_v61 = vadd.f32 %v542_v38, %v430_v56  ;;  %476 = vmatmul.f32.gmra.mxu1 %v113_v54 }
  0xd4   :  { %v782_v60 = vld [vmem:[#allocation2 + $0x26] sm:$0xff]  ;;  %v2609_v62 = vpack.i.bf16 %v877_v59, %v845_v58 }
  0xd5   :  { %v814_v63 = vld [vmem:[#allocation2 + $0x28] sm:$0xff]  ;;  %v630_v5 = vmul.f32 %v3502_v9, %v543_v61  ;;  %v3658_v7 = vpop.f32.mrf.mxu3 }
  0xd6   :  { %v2604_v3 = vpack.i.bf16 %v814_v63, %v782_v60  ;;  %2512 = vmatmul.msk.f32.gmra.mxu2 %vm184_vm0, %v120_v4  ;;  %v119_v38 = vld [vmem:[%s4265_s0 + $0x248] sm:$0xff]  ;;  %v1673_v4 = vld [vmem:[%s4268_s4 + $0x78] sm:$0xff] }
  0xd7   :  { %v666_v8 = vadd.f32 %v3507_v11, %v630_v5  ;;  %v319_v10 = vpop.f32.mrf.mxu0  ;;  %1722 = vmatpush.msrb.mxu3 %v1673_v4  ;;  %v1676_v5 = vld [vmem:[%s4268_s4 + $0x90] sm:$0xff] }
  0xd8   :  { %2610 = vrot.lane.b32.xlu2 %v2609_v62, %s2907_s22  ;;  %2605 = vrot.lane.b32.xlu1 %v2604_v3, %s2907_s22  ;;  %v432_v13 = vpop.f32.mrf.mxu1  ;;  %v1693_v3 = vld [vmem:[%s4268_s4 + $0x118] sm:$0xff] }
  0xd9   :  { %v698_v15 = vmax.f32 %v666_v8, 0.0  ;;  %v433_v16 = vadd.f32 %v432_v13, %v319_v10  ;;  %v548_v18 = vpop.f32.mrf.mxu2  ;;  %1960 = vmatpush.msrb.mxu0 %v1693_v3  ;;  %v1709_v8 = vld [vmem:[%s4268_s4 + $0x198] sm:$0xff]  ;;  %v1672_v10 = vld [vmem:[%s4268_s4 + $0x70] sm:$0xff]  ;;  %1848 = vmatpush.msrb.mxu2 %v1676_v5 }
  0xda   :  { %366 = vmatmul.f32.gmra.mxu0 %v115_v12  ;;  %v846_v19 = vld [vmem:[#allocation2 + $0x2a] sm:$0xff]  ;;  %2073 = vmatpush.msrb.mxu1 %v1709_v8 }
  0xdb   :  { %v878_v20 = vld [vmem:[#allocation2 + $0x2c] sm:$0xff]  ;;  %733 = vst.msk [vmem:[#allocation2 + $0x38] sm:$0xff] %vm724_vm1, %v698_v15  ;;  %v546_v22 = vadd.f32 %v545_v57, %v433_v16  ;;  %479 = vmatmul.f32.gmra.mxu1 %v116_v14  ;;  %1723 = vmatpush.msrb.mxu3 %v1672_v10 }
  0xdc   :  { %v783_v21 = vld [vmem:[#allocation2 + $0x2e] sm:$0xff]  ;;  %v2619_v23 = vpack.i.bf16 %v878_v20, %v846_v19 }
  0xdd   :  { %v815_v24 = vld [vmem:[#allocation2 + $0x30] sm:$0xff]  ;;  %v631_v31 = vmul.f32 %v3502_v9, %v546_v22  ;;  %v3684_v33 = vpop.f32.mrf.mxu3 }
  0xde   :  { %v2614_v27 = vpack.i.bf16 %v815_v24, %v783_v21  ;;  %2513 = vmatmul.msk.f32.gmra.mxu2 %vm184_vm0, %v123_v28  ;;  %v1670_v28 = vld [vmem:[%s4268_s4 + $0x60] sm:$0xff] }
  0xdf   :  { %v667_v34 = vadd.f32 %v3507_v11, %v631_v31  ;;  %v322_v35 = vpop.f32.mrf.mxu0  ;;  %v1669_v31 = vld [vmem:[%s4268_s4 + $0x58] sm:$0xff] }
  0xe0   :  { %2620 = vrot.lane.b32.xlu1 %v2619_v23, %s2907_s22  ;;  %2615 = vrot.lane.b32.xlu0 %v2614_v27, %s2907_s22  ;;  %v435_v37 = vpop.f32.mrf.mxu1 }
  0xe1   :  { %v699_v39 = vmax.f32 %v667_v34, 0.0  ;;  %v436_v40 = vadd.f32 %v435_v37, %v322_v35  ;;  %v551_v41 = vpop.f32.mrf.mxu2  ;;  %v1692_v34 = vld [vmem:[%s4268_s4 + $0x110] sm:$0xff] }
  0xe2   :  { %369 = vmatmul.f32.gmra.mxu0 %v118_v36  ;;  %v847_v42 = vld [vmem:[#allocation2 + $0x32] sm:$0xff] }
  0xe3   :  { %v879_v43 = vld [vmem:[#allocation2 + $0x34] sm:$0xff]  ;;  %734 = vst.msk [vmem:[#allocation2 + $0x40] sm:$0xff] %vm724_vm1, %v699_v39  ;;  %v549_v45 = vadd.f32 %v548_v18, %v436_v40  ;;  %482 = vmatmul.f32.gmra.mxu1 %v119_v38  ;;  %v1671_v18 = vld [vmem:[%s4268_s4 + $0x68] sm:$0xff]  ;;  %1961 = vmatpush.msrb.mxu0 %v1692_v34 }
  0xe4   :  { %v784_v44 = vld [vmem:[#allocation2 + $0x36] sm:$0xff]  ;;  %v2629_v46 = vpack.i.bf16 %v879_v43, %v847_v42  ;;  %1724 = vmatpush.msrb.mxu3 %v1671_v18  ;;  %v1707_v18 = vld [vmem:[%s4268_s4 + $0x188] sm:$0xff] }
  0xe5   :  { %v816_v47 = vld [vmem:[#allocation2 + $0x38] sm:$0xff]  ;;  %v632_v52 = vmul.f32 %v3502_v9, %v549_v45  ;;  %v3701_v53 = vpop.f32.mrf.mxu3  ;;  %v1668_v37 = vld [vmem:[%s4268_s4 + $0x50] sm:$0xff] }
  0xe6   :  { %v2624_v49 = vpack.i.bf16 %v816_v47, %v784_v44  ;;  %2514 = vmatmul.msk.f32.gmra.mxu2 %vm184_vm0, %v126_v51  ;;  %1725 = vmatpush.msrb.mxu3 %v1670_v28 }
  0xe7   :  { %v668_v54 = vadd.f32 %v3507_v11, %v632_v52  ;;  %v325_v55 = vpop.f32.mrf.mxu0 }
  0xe8   :  { %2630 = vrot.lane.b32.xlu0 %v2629_v46, %s2907_s22  ;;  %2625 = vrot.lane.b32.xlu2 %v2624_v49, %s2907_s22  ;;  %v438_v56 = vpop.f32.mrf.mxu1 }
  0xe9   :  { %v700_v57 = vmax.f32 %v668_v54, 0.0  ;;  %v439_v58 = vadd.f32 %v438_v56, %v325_v55  ;;  %v554_v59 = vpop.f32.mrf.mxu2  ;;  %1726 = vmatpush.msrb.mxu3 %v1669_v31  ;;  %v1675_v54 = vld [vmem:[%s4268_s4 + $0x88] sm:$0xff]  ;;  %v1708_v55 = vld [vmem:[%s4268_s4 + $0x190] sm:$0xff] }
  0xea   :  { %v848_v60 = vld [vmem:[#allocation2 + $0x3a] sm:$0xff]  ;;  %1849 = vmatpush.msrb.mxu2 %v1675_v54  ;;  %2074 = vmatpush.msrb.mxu1 %v1708_v55 }
  0xeb   :  { %v880_v61 = vld [vmem:[#allocation2 + $0x3c] sm:$0xff]  ;;  %735 = vst.msk [vmem:[#allocation2 + $0x48] sm:$0xff] %vm724_vm1, %v700_v57  ;;  %v552_v63 = vadd.f32 %v551_v41, %v439_v58  ;;  %v1667_v41 = vld [vmem:[%s4268_s4 + $0x48] sm:$0xff]  ;;  %1727 = vmatpush.msrb.mxu3 %v1668_v37 }
  0xec   :  { %v785_v62 = vld [vmem:[#allocation2 + $0x3e] sm:$0xff]  ;;  %v2639_v0 = vpack.i.bf16 %v880_v61, %v848_v60  ;;  %v1664_v61 = vld [vmem:[%s4268_s4 + $0x30] sm:$0xff]  ;;  %2075 = vmatpush.msrb.mxu1 %v1707_v18 }
  0xed   :  { %v817_v1 = vld [vmem:[#allocation2 + $0x40] sm:$0xff]  ;;  %v633_v12 = vmul.f32 %v3502_v9, %v552_v63  ;;  %v3724_v13 = vpop.f32.mrf.mxu3  ;;  %1728 = vmatpush.msrb.mxu3 %v1667_v41  ;;  %v1665_v58 = vld [vmem:[%s4268_s4 + $0x38] sm:$0xff] }
  0xee   :  { %v2634_v6 = vpack.i.bf16 %v817_v1, %v785_v62  ;;  %v1666_v57 = vld [vmem:[%s4268_s4 + $0x40] sm:$0xff]  ;;  %v1663_v1 = vld [vmem:[%s4268_s4 + $0x28] sm:$0xff] }
  0xef   :  { %v669_v14 = vadd.f32 %v3507_v11, %v633_v12  ;;  %v328_v15 = vpop.f32.mrf.mxu0  ;;  %1729 = vmatpush.msrb.mxu3 %v1666_v57  ;;  %v493_v57 = vadd.f32 %v3724_v13, %v3571_v50 }
  0xf0   :  { %2640 = vrot.lane.b32.xlu2 %v2639_v0, %s2907_s22  ;;  %2635 = vrot.lane.b32.xlu1 %v2634_v6, %s2907_s22  ;;  %v441_v16 = vpop.f32.mrf.mxu1 }
  0xf1   :  { %v701_v19 = vmax.f32 %v669_v14, 0.0  ;;  %v442_v20 = vadd.f32 %v441_v16, %v328_v15  ;;  %v557_v21 = vpop.f32.mrf.mxu2  ;;  %1730 = vmatpush.msrb.mxu3 %v1665_v58  ;;  %v1691_v16 = vld [vmem:[%s4268_s4 + $0x108] sm:$0xff] }
  0xf2   :  { %v849_v22 = vld [vmem:[#allocation2 + $0x42] sm:$0xff]  ;;  %1962 = vmatpush.msrb.mxu0 %v1691_v16 }
  0xf3   :  { %v881_v23 = vld [vmem:[#allocation2 + $0x44] sm:$0xff]  ;;  %736 = vst.msk [vmem:[#allocation2 + $0x50] sm:$0xff] %vm724_vm1, %v701_v19  ;;  %v555_v25 = vadd.f32 %v554_v59, %v442_v20  ;;  %1731 = vmatpush.msrb.mxu3 %v1664_v61 }
  0xf4   :  { %v786_v24 = vld [vmem:[#allocation2 + $0x46] sm:$0xff]  ;;  %v2649_v26 = vpack.i.bf16 %v881_v23, %v849_v22 }
  0xf5   :  { %v818_v27 = vld [vmem:[#allocation2 + $0x48] sm:$0xff]  ;;  %v634_v35 = vmul.f32 %v3502_v9, %v555_v25  ;;  %v3743_v36 = vpop.f32.mrf.mxu3  ;;  %1732 = vmatpush.msrb.mxu3 %v1663_v1  ;;  %v1662_v20 = vld [vmem:[%s4268_s4 + $0x20] sm:$0xff]  ;;  %v1660_v25 = vld [vmem:[%s4268_s4 + $0x10] sm:$0xff] }
  0xf6   :  { %v2644_v30 = vpack.i.bf16 %v818_v27, %v786_v24  ;;  %v1674_v24 = vld [vmem:[%s4268_s4 + $0x80] sm:$0xff]  ;;  %v496_v16 = vadd.f32 %v3743_v36, %v3590_v2 }
  0xf7   :  { %v670_v38 = vadd.f32 %v3507_v11, %v634_v35  ;;  %v331_v39 = vpop.f32.mrf.mxu0  ;;  %1733 = vmatpush.msrb.mxu3 %v1662_v20  ;;  %1850 = vmatpush.msrb.mxu2 %v1674_v24  ;;  %v1706_v1 = vld [vmem:[%s4268_s4 + $0x180] sm:$0xff] }
  0xf8   :  { %2650 = vrot.lane.b32.xlu1 %v2649_v26, %s2907_s22  ;;  %2645 = vrot.lane.b32.xlu0 %v2644_v30, %s2907_s22  ;;  %v444_v40 = vpop.f32.mrf.mxu1  ;;  %v1659_v30 = vld [vmem:[%s4268_s4 + $0x8] sm:$0xff] }
  0xf9   :  { %v702_v42 = vmax.f32 %v670_v38, 0.0  ;;  %v445_v43 = vadd.f32 %v444_v40, %v331_v39  ;;  %v560_v44 = vpop.f32.mrf.mxu2  ;;  %2076 = vmatpush.msrb.mxu1 %v1706_v1 }
  0xfa   :  { %v850_v45 = vld [vmem:[#allocation2 + $0x4a] sm:$0xff] }
  0xfb   :  { %v882_v46 = vld [vmem:[#allocation2 + $0x4c] sm:$0xff]  ;;  %737 = vst.msk [vmem:[#allocation2 + $0x58] sm:$0xff] %vm724_vm1, %v702_v42  ;;  %v558_v49 = vadd.f32 %v557_v21, %v445_v43  ;;  %v1661_v21 = vld [vmem:[%s4268_s4 + $0x18] sm:$0xff]  ;;  %v1658_v43 = vld [vmem:[%s4268_s4] sm:$0xff] }
  0xfc   :  { %v787_v47 = vld [vmem:[#allocation2 + $0x4e] sm:$0xff]  ;;  %v2659_v51 = vpack.i.bf16 %v882_v46, %v850_v45  ;;  %1734 = vmatpush.msrb.mxu3 %v1661_v21 }
  0xfd   :  { %v819_v52 = vld [vmem:[#allocation2 + $0x50] sm:$0xff]  ;;  %v635_v59 = vmul.f32 %v3502_v9, %v558_v49  ;;  %v3768_v60 = vpop.f32.mrf.mxu3 }
  0xfe   :  { %v2654_v56 = vpack.i.bf16 %v819_v52, %v787_v47  ;;  %1735 = vmatpush.msrb.mxu3 %v1660_v25  ;;  %v1690_v47 = vld [vmem:[%s4268_s4 + $0x100] sm:$0xff] }
  0xff   :  { %v671_v62 = vadd.f32 %v3507_v11, %v635_v59  ;;  %v334_v63 = vpop.f32.mrf.mxu0  ;;  %1963 = vmatpush.msrb.mxu0 %v1690_v47 }
 0x100   :  { %2660 = vrot.lane.b32.xlu0 %v2659_v51, %s2907_s22  ;;  %2655 = vrot.lane.b32.xlu2 %v2654_v56, %s2907_s22  ;;  %v447_v0 = vpop.f32.mrf.mxu1 }
 0x101   :  { %v703_v3 = vmax.f32 %v671_v62, 0.0  ;;  %v448_v4 = vadd.f32 %v447_v0, %v334_v63  ;;  %v563_v6 = vpop.f32.mrf.mxu2  ;;  %1736 = vmatpush.msrb.mxu3 %v1659_v30 }
 0x102   :  { %v851_v5 = vld [vmem:[#allocation2 + $0x52] sm:$0xff] }
 0x103   :  { %v883_v8 = vld [vmem:[#allocation2 + $0x54] sm:$0xff]  ;;  %738 = vst.msk [vmem:[#allocation2 + $0x60] sm:$0xff] %vm724_vm1, %v703_v3  ;;  %v561_v12 = vadd.f32 %v560_v44, %v448_v4  ;;  %1737 = vmatpush.msrb.mxu3 %v1658_v43 }
 0x104   :  { %v788_v10 = vld [vmem:[#allocation2 + $0x56] sm:$0xff]  ;;  %v2669_v14 = vpack.i.bf16 %v883_v8, %v851_v5 }
 0x105   :  { %v820_v15 = vld [vmem:[#allocation2 + $0x58] sm:$0xff]  ;;  %v636_v22 = vmul.f32 %v3502_v9, %v561_v12  ;;  %v3793_v23 = vpop.f32.mrf.mxu3 }
 0x106   :  { %v2664_v19 = vpack.i.bf16 %v820_v15, %v788_v10 }
 0x107   :  { %v672_v26 = vadd.f32 %v3507_v11, %v636_v22  ;;  %v337_v27 = vpop.f32.mrf.mxu0 }
 0x108   :  { %2670 = vrot.lane.b32.xlu2 %v2669_v14, %s2907_s22  ;;  %2665 = vrot.lane.b32.xlu1 %v2664_v19, %s2907_s22  ;;  %v450_v28 = vpop.f32.mrf.mxu1 }
 0x109   :  { %v704_v31 = vmax.f32 %v672_v26, 0.0  ;;  %v451_v34 = vadd.f32 %v450_v28, %v337_v27  ;;  %v566_v35 = vpop.f32.mrf.mxu2 }
 0x10a   :  { %v852_v37 = vld [vmem:[#allocation2 + $0x5a] sm:$0xff] }
 0x10b   :  { %v884_v38 = vld [vmem:[#allocation2 + $0x5c] sm:$0xff]  ;;  %739 = vst.msk [vmem:[#allocation2 + $0x68] sm:$0xff] %vm724_vm1, %v704_v31  ;;  %v564_v40 = vadd.f32 %v563_v6, %v451_v34 }
 0x10c   :  { %v789_v39 = vld [vmem:[#allocation2 + $0x5e] sm:$0xff]  ;;  %v2679_v41 = vpack.i.bf16 %v884_v38, %v852_v37 }
 0x10d   :  { %v821_v42 = vld [vmem:[#allocation2 + $0x60] sm:$0xff]  ;;  %v637_v45 = vmul.f32 %v3502_v9, %v564_v40  ;;  %v3812_v46 = vpop.f32.mrf.mxu3  ;;  %v499_v40 = vadd.f32 %v3768_v60, %v3616_v29 }
 0x10e   :  { %v2674_v44 = vpack.i.bf16 %v821_v42, %v789_v39 }
 0x10f   :  { %v673_v49 = vadd.f32 %v3507_v11, %v637_v45  ;;  %v340_v51 = vpop.f32.mrf.mxu0 }
 0x110   :  { %2680 = vrot.lane.b32.xlu1 %v2679_v41, %s2907_s22  ;;  %2675 = vrot.lane.b32.xlu0 %v2674_v44, %s2907_s22  ;;  %v453_v52 = vpop.f32.mrf.mxu1 }
 0x111   :  { %v705_v54 = vmax.f32 %v673_v49, 0.0  ;;  %v454_v55 = vadd.f32 %v453_v52, %v340_v51  ;;  %v569_v56 = vpop.f32.mrf.mxu2 }
 0x112   :  { %v853_v58 = vld [vmem:[#allocation2 + $0x62] sm:$0xff] }
 0x113   :  { %v885_v59 = vld [vmem:[#allocation2 + $0x64] sm:$0xff]  ;;  %740 = vst.msk [vmem:[#allocation2 + $0x70] sm:$0xff] %vm724_vm1, %v705_v54  ;;  %v567_v62 = vadd.f32 %v566_v35, %v454_v55 }
 0x114   :  { %v790_v61 = vld [vmem:[#allocation2 + $0x66] sm:$0xff]  ;;  %v2689_v63 = vpack.i.bf16 %v885_v59, %v853_v58 }
 0x115   :  { %v822_v0 = vld [vmem:[#allocation2 + $0x68] sm:$0xff]  ;;  %v638_v4 = vmul.f32 %v3502_v9, %v567_v62  ;;  %v605_v6 = vpop.f32.mrf.mxu3 }
 0x116   :  { %v2684_v3 = vpack.i.bf16 %v822_v0, %v790_v61  ;;  %v606_v50 = vadd.f32 %v605_v6, %v493_v57  ;;  %v502_v6 = vadd.f32 %v3793_v23, %v3633_v48 }
 0x117   :  { %v674_v13 = vadd.f32 %v3507_v11, %v638_v4  ;;  %v343_v5 = vpop.f32.mrf.mxu0  ;;  %v794_v4 = vld [vmem:[#allocation2 + $0x7] sm:$0xff] }
 0x118   :  { %2690 = vrot.lane.b32.xlu0 %v2689_v63, %s2907_s22  ;;  %2685 = vrot.lane.b32.xlu2 %v2684_v3, %s2907_s22  ;;  %v651_v8 = vmul.f32 %v3502_v9, %v606_v50  ;;  %v456_v10 = vpop.f32.mrf.mxu1  ;;  %v762_v3 = vld [vmem:[#allocation2 + $0x5] sm:$0xff] }
 0x119   :  { %v706_v12 = vmax.f32 %v674_v13, 0.0  ;;  %v457_v14 = vadd.f32 %v456_v10, %v343_v5  ;;  %v572_v15 = vpop.f32.mrf.mxu2 }
 0x11a   :  { %v687_v18 = vadd.f32 %v3507_v11, %v651_v8  ;;  %v854_v19 = vld [vmem:[#allocation2 + $0x6a] sm:$0xff] }
 0x11b   :  { %v886_v20 = vld [vmem:[#allocation2 + $0x6c] sm:$0xff]  ;;  %741 = vst.msk [vmem:[#allocation2 + $0x78] sm:$0xff] %vm724_vm1, %v706_v12  ;;  %v570_v22 = vadd.f32 %v569_v56, %v457_v14 }
 0x11c   :  { %v791_v21 = vld [vmem:[#allocation2 + $0x6e] sm:$0xff]  ;;  %v2699_v24 = vpack.i.bf16 %v886_v20, %v854_v19  ;;  %v719_v26 = vmax.f32 %v687_v18, 0.0 }
 0x11d   :  { %v823_v25 = vld [vmem:[#allocation2 + $0x70] sm:$0xff]  ;;  %v639_v28 = vmul.f32 %v3502_v9, %v570_v22  ;;  %v608_v30 = vpop.f32.mrf.mxu3 }
 0x11e   :  { %v2694_v27 = vpack.i.bf16 %v823_v25, %v791_v21  ;;  %757 = vst.msk [vmem:[#allocation2 + $0xf0] sm:$0xff] %vm724_vm1, %v719_v26  ;;  %v609_v2 = vadd.f32 %v608_v30, %v496_v16 }
 0x11f   :  { %v675_v36 = vadd.f32 %v3507_v11, %v639_v28  ;;  %v346_v31 = vpop.f32.mrf.mxu0 }
 0x120   :  { %2700 = vrot.lane.b32.xlu2 %v2699_v24, %s2907_s22  ;;  %2695 = vrot.lane.b32.xlu1 %v2694_v27, %s2907_s22  ;;  %v652_v34 = vmul.f32 %v3502_v9, %v609_v2  ;;  %v459_v35 = vpop.f32.mrf.mxu1  ;;  %v3858_v20 = vpop.permute.xlu2 %2590  ;;  %v763_v2 = vld [vmem:[#allocation2 + $0xd] sm:$0xff] }
 0x121   :  { %v707_v37 = vmax.f32 %v675_v36, 0.0  ;;  %v460_v38 = vadd.f32 %v459_v35, %v346_v31  ;;  %v575_v39 = vpop.f32.mrf.mxu2 }
 0x122   :  { %v688_v41 = vadd.f32 %v3507_v11, %v652_v34  ;;  %v855_v42 = vld [vmem:[#allocation2 + $0x72] sm:$0xff] }
 0x123   :  { %v887_v43 = vld [vmem:[#allocation2 + $0x74] sm:$0xff]  ;;  %742 = vst.msk [vmem:[#allocation2 + $0x80] sm:$0xff] %vm724_vm1, %v707_v37  ;;  %v573_v45 = vadd.f32 %v572_v15, %v460_v38 }
 0x124   :  { %v792_v44 = vld [vmem:[#allocation2 + $0x76] sm:$0xff]  ;;  %v2709_v47 = vpack.i.bf16 %v887_v43, %v855_v42  ;;  %v720_v51 = vmax.f32 %v688_v41, 0.0  ;;  %v505_v41 = vadd.f32 %v3812_v46, %v3658_v7 }
 0x125   :  { %v824_v49 = vld [vmem:[#allocation2 + $0x78] sm:$0xff]  ;;  %v640_v54 = vmul.f32 %v3502_v9, %v573_v45  ;;  %v611_v55 = vpop.f32.mrf.mxu3  ;;  %v795_v38 = vld [vmem:[#allocation2 + $0xf] sm:$0xff] }
 0x126   :  { %v2704_v52 = vpack.i.bf16 %v824_v49, %v792_v44  ;;  %758 = vst.msk [vmem:[#allocation2 + $0xf8] sm:$0xff] %vm724_vm1, %v720_v51  ;;  %v612_v29 = vadd.f32 %v611_v55, %v499_v40  ;;  %v858_v40 = vld [vmem:[#allocation2 + $0xb] sm:$0xff] }
 0x127   :  { %v676_v60 = vadd.f32 %v3507_v11, %v640_v54  ;;  %v349_v57 = vpop.f32.mrf.mxu0 }
 0x128   :  { %2710 = vrot.lane.b32.xlu1 %v2709_v47, %s2907_s22  ;;  %2705 = vrot.lane.b32.xlu0 %v2704_v52, %s2907_s22  ;;  %v2571_v56 = vpop.permute.xlu0 %2570  ;;  %v653_v58 = vmul.f32 %v3502_v9, %v612_v29  ;;  %v462_v62 = vpop.f32.mrf.mxu1 }
 0x129   :  { %v2573_v59 = vunpack.i.h.bf16 %v2571_v56  ;;  %v2572_v61 = vunpack.i.l.bf16 %v2571_v56  ;;  %v708_v63 = vmax.f32 %v676_v60, 0.0  ;;  %v463_v0 = vadd.f32 %v462_v62, %v349_v57  ;;  %v578_v1 = vpop.f32.mrf.mxu2  ;;  %v3880_v56 = vld [vmem:[%s4266_s2] ss:$0 sm:$0xff] }
 0x12a   :  { %v689_v50 = vadd.f32 %v3507_v11, %v653_v58  ;;  %v856_v8 = vld [vmem:[#allocation2 + $0x7a] sm:$0xff]  ;;  %v889_v44 = vld [vmem:[#allocation2 + $0x84] sm:$0xff]  ;;  %v2592_v60 = vunpack.i.l.bf16 %v3858_v20  ;;  %v2596_v62 = vpop.permute.xlu2 %2595 }
 0x12b   :  { %v1146_v13 = vsel %vm724_vm1, %v762_v3, %v2572_v61  ;;  %v1162_v5 = vsel %vm724_vm1, %v794_v4, %v2573_v59  ;;  %v888_v10 = vld [vmem:[#allocation2 + $0x7c] sm:$0xff]  ;;  %746 = vst.msk [vmem:[#allocation2 + $0x98] sm:$0xff] %vm724_vm1, %v708_v63  ;;  %v576_v14 = vadd.f32 %v575_v39, %v463_v0  ;;  %v826_v39 = vld [vmem:[#allocation2 + $0x9] sm:$0xff]  ;;  %v2593_v59 = vunpack.i.h.bf16 %v3858_v20 }
 0x12c   :  { %v793_v12 = vld [vmem:[#allocation2 + $0x7e] sm:$0xff]  ;;  %1738 = vmatmul.f32.vlgmr.msrb.gmra.mxu3 %v1146_v13  ;;  %1851 = vmatmul.f32.vlgmr.msrb.gmra.mxu2 %v1162_v5  ;;  %v2719_v15 = vpack.i.bf16 %v888_v10, %v856_v8  ;;  %v721_v18 = vmax.f32 %v689_v50, 0.0  ;;  %v764_v4 = vld [vmem:[#allocation2 + $0x15] sm:$0xff] }
 0x12d   :  { %v825_v16 = vld [vmem:[#allocation2 + $0x80] sm:$0xff]  ;;  %v641_v48 = vmul.f32 %v3502_v9, %v576_v14  ;;  %v614_v23 = vpop.f32.mrf.mxu3  ;;  %v796_v8 = vld [vmem:[#allocation2 + $0x17] sm:$0xff] }
 0x12e   :  { %v2714_v19 = vpack.i.bf16 %v825_v16, %v793_v12  ;;  %759 = vst.msk [vmem:[#allocation2 + $0x100] sm:$0xff] %vm724_vm1, %v721_v18  ;;  %v615_v21 = vadd.f32 %v614_v23, %v502_v6  ;;  %v857_v54 = vld [vmem:[#allocation2 + $0x82] sm:$0xff]  ;;  %v3889_v63 = vld [vmem:[%s4267_s3] ss:$0 sm:$0xff]  ;;  %v827_v10 = vld [vmem:[#allocation2 + $0x11] sm:$0xff] }
 0x12f   :  { %v677_v22 = vadd.f32 %v3507_v11, %v641_v48  ;;  %v352_v25 = vpop.f32.mrf.mxu0  ;;  %v859_v12 = vld [vmem:[#allocation2 + $0x13] sm:$0xff]  ;;  %v1179_v18 = vsel %vm724_vm1, %v827_v10, %v2592_v60  ;;  %v766_v10 = vld [vmem:[#allocation2 + $0x25] sm:$0xff] }
 0x130   :  { %2720 = vrot.lane.b32.xlu0 %v2719_v15, %s2907_s22  ;;  %2715 = vrot.lane.b32.xlu2 %v2714_v19, %s2907_s22  ;;  %v2581_v24 = vpop.permute.xlu1 %2580  ;;  %v654_v26 = vmul.f32 %v3502_v9, %v615_v21  ;;  %v465_v35 = vpop.f32.mrf.mxu1 }
 0x131   :  { %v2583_v27 = vunpack.i.h.bf16 %v2581_v24  ;;  %v2582_v28 = vunpack.i.l.bf16 %v2581_v24  ;;  %v709_v36 = vmax.f32 %v677_v22, 0.0  ;;  %v3865_v37 = vpop.f32.mrf.mxu2  ;;  %v466_v43 = vadd.f32 %v465_v35, %v352_v25 }
 0x132   :  { %v2576_v30 = vpop.permute.xlu0 %2575  ;;  %v690_v42 = vadd.f32 %v3507_v11, %v654_v26  ;;  %v1258_v45 = vld [vmem:[#allocation2 + $0x98] sm:$0xff]  ;;  %v1195_v22 = vsel %vm724_vm1, %v859_v12, %v2593_v59  ;;  %v798_v12 = vld [vmem:[#allocation2 + $0x27] sm:$0xff] }
 0x133   :  { %v2578_v31 = vunpack.i.h.bf16 %v2576_v30  ;;  %v2577_v34 = vunpack.i.l.bf16 %v2576_v30  ;;  %v1178_v9 = vsel %vm724_vm1, %v826_v39, %v2582_v28  ;;  %v1226_v47 = vld [vmem:[#allocation2 + $0x96] sm:$0xff]  ;;  %747 = vst.msk [vmem:[#allocation2 + $0xa0] sm:$0xff] %vm724_vm1, %v709_v36  ;;  %v1194_v52 = vsel %vm724_vm1, %v858_v40, %v2583_v27 }
 0x134   :  { %1964 = vmatmul.f32.vlgmr.msrb.gmra.mxu0 %v1178_v9  ;;  %v722_v55 = vmax.f32 %v690_v42, 0.0  ;;  %v579_v7 = vadd.f32 %v578_v1, %v466_v43  ;;  %v2729_v11 = vpack.i.bf16 %v889_v44, %v1258_v45  ;;  %v2724_v46 = vpack.i.bf16 %v1226_v47, %v857_v54  ;;  %2077 = vmatmul.f32.vlgmr.msrb.gmra.mxu1 %v1194_v52  ;;  %v860_v42 = vld [vmem:[#allocation2 + $0x1b] sm:$0xff] }
 0x135   :  { %v1147_v49 = vsel %vm724_vm1, %v763_v2, %v2577_v34  ;;  %v1163_v51 = vsel %vm724_vm1, %v795_v38, %v2578_v31  ;;  %v617_v29 = vpop.f32.mrf.mxu3  ;;  %v2598_v2 = vunpack.i.h.bf16 %v2596_v62  ;;  %v2597_v36 = vunpack.i.l.bf16 %v2596_v62  ;;  %v765_v44 = vld [vmem:[#allocation2 + $0x1d] sm:$0xff] }
 0x136   :  { %1741 = vmatmul.f32.gmra.mxu3 %v1147_v49  ;;  %1854 = vmatmul.f32.gmra.mxu2 %v1163_v51  ;;  %760 = vst.msk [vmem:[#allocation2 + $0x108] sm:$0xff] %vm724_vm1, %v722_v55  ;;  %v642_v57 = vmul.f32 %v3880_v56, %v579_v7  ;;  %v618_v58 = vadd.f32 %v617_v29, %v505_v41  ;;  %v828_v41 = vld [vmem:[#allocation2 + $0x19] sm:$0xff]  ;;  %v2611_v51 = vpop.permute.xlu2 %2610 }
 0x137   :  { %2725 = vrot.lane.b32.xlu1 %v2724_v46, %s2907_s22  ;;  %v355_v61 = vpop.f32.mrf.mxu0  ;;  %v797_v45 = vld [vmem:[#allocation2 + $0x1f] sm:$0xff]  ;;  %v1149_v52 = vsel %vm724_vm1, %v765_v44, %v2597_v36  ;;  %v2613_v62 = vunpack.i.h.bf16 %v2611_v51  ;;  %v862_v44 = vld [vmem:[#allocation2 + $0x2b] sm:$0xff] }
 0x138   :  { %2730 = vrot.lane.b32.xlu2 %v2729_v11, %s2907_s22  ;;  %v678_v0 = vadd.f32 %v3889_v63, %v642_v57  ;;  %v655_v1 = vmul.f32 %v3880_v56, %v618_v58  ;;  %v468_v13 = vpop.f32.mrf.mxu1  ;;  %v1165_v54 = vsel %vm724_vm1, %v797_v45, %v2598_v2  ;;  %v2612_v58 = vunpack.i.l.bf16 %v2611_v51 }
 0x139   :  { %v584_v5 = vpop.f32.mrf.mxu2  ;;  %v469_v16 = vadd.f32 %v468_v13, %v355_v61  ;;  %v829_v13 = vld [vmem:[#allocation2 + $0x21] sm:$0xff] }
 0x13a   :  { %v2586_v3 = vpop.permute.xlu1 %2585  ;;  %v710_v14 = vmax.f32 %v678_v0, 0.0  ;;  %v691_v15 = vadd.f32 %v3889_v63, %v655_v1  ;;  %v1290_v19 = vld [vmem:[#allocation2 + $0x9a] sm:$0xff] }
 0x13b   :  { %v2588_v6 = vunpack.i.h.bf16 %v2586_v3  ;;  %v2587_v50 = vunpack.i.l.bf16 %v2586_v3  ;;  %v1322_v48 = vld [vmem:[#allocation2 + $0x9c] sm:$0xff]  ;;  %v582_v27 = vadd.f32 %v3865_v37, %v469_v16 }
 0x13c   :  { %v1227_v23 = vld [vmem:[#allocation2 + $0x9e] sm:$0xff]  ;;  %1967 = vmatmul.f32.gmra.mxu0 %v1179_v18  ;;  %v2739_v24 = vpack.i.bf16 %v1322_v48, %v1290_v19  ;;  %748 = vst.msk [vmem:[#allocation2 + $0xa8] sm:$0xff] %vm724_vm1, %v710_v14  ;;  %v723_v26 = vmax.f32 %v691_v15, 0.0  ;;  %2080 = vmatmul.f32.gmra.mxu1 %v1195_v22  ;;  %v1181_v14 = vsel %vm724_vm1, %v829_v13, %v2612_v58 }
 0x13d   :  { %v1148_v20 = vsel %vm724_vm1, %v764_v4, %v2587_v50  ;;  %v1164_v21 = vsel %vm724_vm1, %v796_v8, %v2588_v6  ;;  %v1259_v25 = vld [vmem:[#allocation2 + $0xa0] sm:$0xff]  ;;  %v643_v30 = vmul.f32 %v3880_v56, %v582_v27 }
 0x13e   :  { %1744 = vmatmul.f32.gmra.mxu3 %v1148_v20  ;;  %1857 = vmatmul.f32.gmra.mxu2 %v1164_v21  ;;  %v2734_v28 = vpack.i.bf16 %v1259_v25, %v1227_v23  ;;  %761 = vst.msk [vmem:[#allocation2 + $0x110] sm:$0xff] %vm724_vm1, %v723_v26  ;;  %v861_v15 = vld [vmem:[#allocation2 + $0x23] sm:$0xff] }
 0x13f   :  { %2740 = vrot.lane.b32.xlu1 %v2739_v24, %s2907_s22  ;;  %v358_v34 = vpop.f32.mrf.mxu0  ;;  %v679_v35 = vadd.f32 %v3889_v63, %v643_v30  ;;  %v1197_v21 = vsel %vm724_vm1, %v861_v15, %v2613_v62 }
 0x140   :  { %2735 = vrot.lane.b32.xlu0 %v2734_v28, %s2907_s22  ;;  %v2601_v31 = vpop.permute.xlu0 %2600  ;;  %v471_v39 = vpop.f32.mrf.mxu1 }
 0x141   :  { %v2603_v38 = vunpack.i.h.bf16 %v2601_v31  ;;  %v2602_v37 = vunpack.i.l.bf16 %v2601_v31  ;;  %v587_v40 = vpop.f32.mrf.mxu2  ;;  %v711_v43 = vmax.f32 %v679_v35, 0.0  ;;  %v472_v9 = vadd.f32 %v471_v39, %v358_v34  ;;  %v767_v39 = vld [vmem:[#allocation2 + $0x2d] sm:$0xff] }
 0x143   :  { %v1180_v47 = vsel %vm724_vm1, %v828_v41, %v2602_v37  ;;  %v1196_v49 = vsel %vm724_vm1, %v860_v42, %v2603_v38  ;;  %v1291_v55 = vld [vmem:[#allocation2 + $0xa2] sm:$0xff]  ;;  %749 = vst.msk [vmem:[#allocation2 + $0xb0] sm:$0xff] %vm724_vm1, %v711_v43  ;;  %v585_v46 = vadd.f32 %v584_v5, %v472_v9  ;;  %v799_v43 = vld [vmem:[#allocation2 + $0x2f] sm:$0xff] }
 0x144   :  { %1970 = vmatmul.f32.gmra.mxu0 %v1180_v47  ;;  %v1323_v7 = vld [vmem:[#allocation2 + $0xa4] sm:$0xff]  ;;  %2083 = vmatmul.f32.gmra.mxu1 %v1196_v49 }
 0x145   :  { %v1228_v11 = vld [vmem:[#allocation2 + $0xa6] sm:$0xff]  ;;  %v2749_v29 = vpack.i.bf16 %v1323_v7, %v1291_v55  ;;  %v644_v59 = vmul.f32 %v3880_v56, %v585_v46 }
 0x146   :  { %1747 = vmatmul.f32.gmra.mxu3 %v1149_v52  ;;  %1860 = vmatmul.f32.gmra.mxu2 %v1165_v54  ;;  %v1260_v60 = vld [vmem:[#allocation2 + $0xa8] sm:$0xff] }
 0x147   :  { %v2744_v57 = vpack.i.bf16 %v1260_v60, %v1228_v11  ;;  %v361_v61 = vpop.f32.mrf.mxu0  ;;  %v680_v0 = vadd.f32 %v3889_v63, %v644_v59  ;;  %v830_v9 = vld [vmem:[#allocation2 + $0x29] sm:$0xff] }
 0x148   :  { %2750 = vrot.lane.b32.xlu0 %v2749_v29, %s2907_s22  ;;  %v474_v6 = vpop.f32.mrf.mxu1 }
 0x149   :  { %2745 = vrot.lane.b32.xlu2 %v2744_v57, %s2907_s22  ;;  %v590_v50 = vpop.f32.mrf.mxu2  ;;  %v712_v5 = vmax.f32 %v680_v0, 0.0  ;;  %v475_v8 = vadd.f32 %v474_v6, %v361_v61 }
 0x14a   :  { %v2606_v1 = vpop.permute.xlu1 %2605  ;;  %v1292_v19 = vld [vmem:[#allocation2 + $0xaa] sm:$0xff] }
 0x14b   :  { %v2608_v3 = vunpack.i.h.bf16 %v2606_v1  ;;  %v2607_v4 = vunpack.i.l.bf16 %v2606_v1  ;;  %v1324_v48 = vld [vmem:[#allocation2 + $0xac] sm:$0xff]  ;;  %750 = vst.msk [vmem:[#allocation2 + $0xb8] sm:$0xff] %vm724_vm1, %v712_v5  ;;  %v588_v20 = vadd.f32 %v587_v40, %v475_v8  ;;  %v2626_v40 = vpop.permute.xlu2 %2625  ;;  %v800_v5 = vld [vmem:[#allocation2 + $0x37] sm:$0xff] }
 0x14c   :  { %1973 = vmatmul.f32.gmra.mxu0 %v1181_v14  ;;  %v1229_v23 = vld [vmem:[#allocation2 + $0xae] sm:$0xff]  ;;  %v2759_v22 = vpack.i.bf16 %v1324_v48, %v1292_v19  ;;  %2086 = vmatmul.f32.gmra.mxu1 %v1197_v21  ;;  %v2628_v57 = vunpack.i.h.bf16 %v2626_v40  ;;  %v2627_v58 = vunpack.i.l.bf16 %v2626_v40 }
 0x14d   :  { %v1150_v16 = vsel %vm724_vm1, %v766_v10, %v2607_v4  ;;  %v1166_v18 = vsel %vm724_vm1, %v798_v12, %v2608_v3  ;;  %v1261_v24 = vld [vmem:[#allocation2 + $0xb0] sm:$0xff]  ;;  %v645_v26 = vmul.f32 %v3880_v56, %v588_v20 }
 0x14e   :  { %1750 = vmatmul.f32.gmra.mxu3 %v1150_v16  ;;  %1863 = vmatmul.f32.gmra.mxu2 %v1166_v18  ;;  %v2754_v25 = vpack.i.bf16 %v1261_v24, %v1229_v23  ;;  %v768_v4 = vld [vmem:[#allocation2 + $0x35] sm:$0xff]  ;;  %v1168_v14 = vsel %vm724_vm1, %v800_v5, %v2628_v57  ;;  %v833_v5 = vld [vmem:[#allocation2 + $0x41] sm:$0xff] }
 0x14f   :  { %v364_v27 = vpop.f32.mrf.mxu0  ;;  %v681_v28 = vadd.f32 %v3889_v63, %v645_v26  ;;  %v831_v8 = vld [vmem:[#allocation2 + $0x31] sm:$0xff]  ;;  %v1152_v12 = vsel %vm724_vm1, %v768_v4, %v2627_v58 }
 0x150   :  { %2755 = vrot.lane.b32.xlu1 %v2754_v25, %s2907_s22  ;;  %v477_v38 = vpop.f32.mrf.mxu1  ;;  %v863_v10 = vld [vmem:[#allocation2 + $0x33] sm:$0xff] }
 0x151   :  { %2760 = vrot.lane.b32.xlu2 %v2759_v22, %s2907_s22  ;;  %v593_v37 = vpop.f32.mrf.mxu2  ;;  %v713_v41 = vmax.f32 %v681_v28, 0.0  ;;  %v478_v42 = vadd.f32 %v477_v38, %v364_v27  ;;  %v769_v38 = vld [vmem:[#allocation2 + $0x3d] sm:$0xff] }
 0x152   :  { %v2621_v30 = vpop.permute.xlu1 %2620  ;;  %v2616_v2 = vpop.permute.xlu0 %2615  ;;  %v1293_v52 = vld [vmem:[#allocation2 + $0xb2] sm:$0xff] }
 0x153   :  { %v2623_v36 = vunpack.i.h.bf16 %v2621_v30  ;;  %v2622_v31 = vunpack.i.l.bf16 %v2621_v30  ;;  %v2618_v34 = vunpack.i.h.bf16 %v2616_v2  ;;  %v2617_v35 = vunpack.i.l.bf16 %v2616_v2  ;;  %v1325_v54 = vld [vmem:[#allocation2 + $0xb4] sm:$0xff]  ;;  %751 = vst.msk [vmem:[#allocation2 + $0xc0] sm:$0xff] %vm724_vm1, %v713_v41  ;;  %v2641_v23 = vpop.permute.xlu2 %2640  ;;  %v801_v41 = vld [vmem:[#allocation2 + $0x3f] sm:$0xff] }
 0x154   :  { %v1230_v55 = vld [vmem:[#allocation2 + $0xb6] sm:$0xff]  ;;  %v591_v7 = vadd.f32 %v590_v50, %v478_v42  ;;  %v2769_v11 = vpack.i.bf16 %v1325_v54, %v1293_v52  ;;  %v2642_v26 = vunpack.i.l.bf16 %v2641_v23  ;;  %v2643_v28 = vunpack.i.h.bf16 %v2641_v23 }
 0x155   :  { %v1151_v45 = vsel %vm724_vm1, %v767_v39, %v2617_v35  ;;  %v1167_v47 = vsel %vm724_vm1, %v799_v43, %v2618_v34  ;;  %v1182_v49 = vsel %vm724_vm1, %v830_v9, %v2622_v31  ;;  %v1198_v51 = vsel %vm724_vm1, %v862_v44, %v2623_v36  ;;  %v1262_v46 = vld [vmem:[#allocation2 + $0xb8] sm:$0xff] }
 0x156   :  { %1753 = vmatmul.f32.gmra.mxu3 %v1151_v45  ;;  %1866 = vmatmul.f32.gmra.mxu2 %v1167_v47  ;;  %v2764_v29 = vpack.i.bf16 %v1262_v46, %v1230_v55  ;;  %v646_v60 = vmul.f32 %v3880_v56, %v591_v7  ;;  %v487_v36 = vadd.f32 %v3684_v33, %v3520_v17  ;;  %v832_v42 = vld [vmem:[#allocation2 + $0x39] sm:$0xff] }
 0x157   :  { %1976 = vmatmul.f32.gmra.mxu0 %v1182_v49  ;;  %2089 = vmatmul.f32.gmra.mxu1 %v1198_v51  ;;  %v367_v59 = vpop.f32.mrf.mxu0  ;;  %v864_v43 = vld [vmem:[#allocation2 + $0x3b] sm:$0xff]  ;;  %v1184_v47 = vsel %vm724_vm1, %v832_v42, %v2642_v26 }
 0x158   :  { %2770 = vrot.lane.b32.xlu1 %v2769_v11, %s2907_s22  ;;  %2765 = vrot.lane.b32.xlu0 %v2764_v29, %s2907_s22  ;;  %v682_v61 = vadd.f32 %v3889_v63, %v646_v60  ;;  %v480_v3 = vpop.f32.mrf.mxu1  ;;  %v1200_v52 = vsel %vm724_vm1, %v864_v43, %v2643_v28  ;;  %v490_v60 = vadd.f32 %v3701_v53, %v3545_v32 }
 0x159   :  { %v481_v50 = vadd.f32 %v480_v3, %v367_v59  ;;  %v596_v13 = vpop.f32.mrf.mxu2  ;;  %v770_v3 = vld [vmem:[#allocation2 + $0x45] sm:$0xff] }
 0x15a   :  { %v2631_v62 = vpop.permute.xlu0 %2630  ;;  %v714_v6 = vmax.f32 %v682_v61, 0.0  ;;  %v1294_v18 = vld [vmem:[#allocation2 + $0xba] sm:$0xff] }
 0x15b   :  { %v2633_v0 = vunpack.i.h.bf16 %v2631_v62  ;;  %v2632_v1 = vunpack.i.l.bf16 %v2631_v62  ;;  %v1326_v19 = vld [vmem:[#allocation2 + $0xbc] sm:$0xff]  ;;  %v594_v20 = vadd.f32 %v593_v37, %v481_v50 }
 0x15c   :  { %v1231_v48 = vld [vmem:[#allocation2 + $0xbe] sm:$0xff]  ;;  %752 = vst.msk [vmem:[#allocation2 + $0xc8] sm:$0xff] %vm724_vm1, %v714_v6  ;;  %v2779_v21 = vpack.i.bf16 %v1326_v19, %v1294_v18 }
 0x15d   :  { %v1183_v15 = vsel %vm724_vm1, %v831_v8, %v2632_v1  ;;  %v1199_v16 = vsel %vm724_vm1, %v863_v10, %v2633_v0  ;;  %v1263_v22 = vld [vmem:[#allocation2 + $0xc0] sm:$0xff]  ;;  %v647_v25 = vmul.f32 %v3880_v56, %v594_v20  ;;  %v2656_v10 = vpop.permute.xlu2 %2655 }
 0x15e   :  { %1756 = vmatmul.f32.gmra.mxu3 %v1152_v12  ;;  %1869 = vmatmul.f32.gmra.mxu2 %v1168_v14  ;;  %v2774_v24 = vpack.i.bf16 %v1263_v22, %v1231_v48  ;;  %v865_v8 = vld [vmem:[#allocation2 + $0x43] sm:$0xff]  ;;  %v2658_v22 = vunpack.i.h.bf16 %v2656_v10 }
 0x15f   :  { %1979 = vmatmul.f32.gmra.mxu0 %v1183_v15  ;;  %2092 = vmatmul.f32.gmra.mxu1 %v1199_v16  ;;  %v370_v27 = vpop.f32.mrf.mxu0  ;;  %v683_v30 = vadd.f32 %v3889_v63, %v647_v25  ;;  %v2657_v25 = vunpack.i.l.bf16 %v2656_v10 }
 0x160   :  { %2780 = vrot.lane.b32.xlu0 %v2779_v21, %s2907_s22  ;;  %2775 = vrot.lane.b32.xlu2 %v2774_v24, %s2907_s22  ;;  %v483_v35 = vpop.f32.mrf.mxu1 }
 0x161   :  { %v715_v37 = vmax.f32 %v683_v30, 0.0  ;;  %v484_v39 = vadd.f32 %v483_v35, %v370_v27  ;;  %v599_v40 = vpop.f32.mrf.mxu2 }
 0x162   :  { %v2636_v2 = vpop.permute.xlu1 %2635  ;;  %v600_v9 = vadd.f32 %v599_v40, %v487_v36  ;;  %v803_v36 = vld [vmem:[#allocation2 + $0x4f] sm:$0xff] }
 0x163   :  { %v2638_v31 = vunpack.i.h.bf16 %v2636_v2  ;;  %v2637_v34 = vunpack.i.l.bf16 %v2636_v2  ;;  %v1295_v49 = vld [vmem:[#allocation2 + $0xc2] sm:$0xff]  ;;  %753 = vst.msk [vmem:[#allocation2 + $0xd0] sm:$0xff] %vm724_vm1, %v715_v37  ;;  %v597_v33 = vadd.f32 %v596_v13, %v484_v39  ;;  %v771_v2 = vld [vmem:[#allocation2 + $0x4d] sm:$0xff]  ;;  %v1171_v35 = vsel %vm724_vm1, %v803_v36, %v2658_v22 }
 0x164   :  { %v1327_v51 = vld [vmem:[#allocation2 + $0xc4] sm:$0xff]  ;;  %v649_v7 = vmul.f32 %v3880_v56, %v600_v9 }
 0x165   :  { %v1153_v44 = vsel %vm724_vm1, %v769_v38, %v2637_v34  ;;  %v1169_v45 = vsel %vm724_vm1, %v801_v41, %v2638_v31  ;;  %v1232_v17 = vld [vmem:[#allocation2 + $0xc6] sm:$0xff]  ;;  %v2789_v54 = vpack.i.bf16 %v1327_v51, %v1295_v49  ;;  %v648_v46 = vmul.f32 %v3880_v56, %v597_v33 }
 0x166   :  { %1759 = vmatmul.f32.gmra.mxu3 %v1153_v44  ;;  %1872 = vmatmul.f32.gmra.mxu2 %v1169_v45  ;;  %v1264_v55 = vld [vmem:[#allocation2 + $0xc8] sm:$0xff]  ;;  %v685_v29 = vadd.f32 %v3889_v63, %v649_v7  ;;  %v1155_v41 = vsel %vm724_vm1, %v771_v2, %v2657_v25  ;;  %v2671_v45 = vpop.permute.xlu2 %2670  ;;  %v835_v7 = vld [vmem:[#allocation2 + $0x51] sm:$0xff] }
 0x167   :  { %1982 = vmatmul.f32.gmra.mxu0 %v1184_v47  ;;  %2095 = vmatmul.f32.gmra.mxu1 %v1200_v52  ;;  %v2784_v11 = vpack.i.bf16 %v1264_v55, %v1232_v17  ;;  %v684_v57 = vadd.f32 %v3889_v63, %v648_v46  ;;  %v802_v13 = vld [vmem:[#allocation2 + $0x47] sm:$0xff]  ;;  %v2672_v49 = vunpack.i.l.bf16 %v2671_v45  ;;  %v2673_v17 = vunpack.i.h.bf16 %v2671_v45  ;;  %v804_v55 = vld [vmem:[#allocation2 + $0x57] sm:$0xff] }
 0x168   :  { %2790 = vrot.lane.b32.xlu2 %v2789_v54, %s2907_s22  ;;  %v717_v61 = vmax.f32 %v685_v29, 0.0  ;;  %v834_v31 = vld [vmem:[#allocation2 + $0x49] sm:$0xff]  ;;  %v772_v54 = vld [vmem:[#allocation2 + $0x55] sm:$0xff] }
 0x169   :  { %2785 = vrot.lane.b32.xlu1 %v2784_v11, %s2907_s22  ;;  %v716_v4 = vmax.f32 %v684_v57, 0.0  ;;  %v602_v50 = vpop.f32.mrf.mxu2  ;;  %v1301_v45 = vld [vmem:[#allocation2 + $0xf2] sm:$0xff] }
 0x16a   :  { %v2651_v58 = vpop.permute.xlu1 %2650  ;;  %v2646_v59 = vpop.permute.xlu0 %2645  ;;  %755 = vst.msk [vmem:[#allocation2 + $0xe0] sm:$0xff] %vm724_vm1, %v717_v61  ;;  %v603_v12 = vadd.f32 %v602_v50, %v490_v60  ;;  %v1296_v15 = vld [vmem:[#allocation2 + $0xca] sm:$0xff] }
 0x16b   :  { %v2653_v62 = vunpack.i.h.bf16 %v2651_v58  ;;  %v2652_v0 = vunpack.i.l.bf16 %v2651_v58  ;;  %v2648_v1 = vunpack.i.h.bf16 %v2646_v59  ;;  %v2647_v6 = vunpack.i.l.bf16 %v2646_v59  ;;  %v1328_v16 = vld [vmem:[#allocation2 + $0xcc] sm:$0xff]  ;;  %754 = vst.msk [vmem:[#allocation2 + $0xd8] sm:$0xff] %vm724_vm1, %v716_v4 }
 0x16c   :  { %v1233_v18 = vld [vmem:[#allocation2 + $0xce] sm:$0xff]  ;;  %v2799_v48 = vpack.i.bf16 %v1328_v16, %v1296_v15  ;;  %v650_v20 = vmul.f32 %v3880_v56, %v603_v12  ;;  %v868_v15 = vld [vmem:[#allocation2 + $0x5b] sm:$0xff] }
 0x16d   :  { %v1170_v32 = vsel %vm724_vm1, %v802_v13, %v2648_v1  ;;  %v1185_v53 = vsel %vm724_vm1, %v833_v5, %v2652_v0  ;;  %v1201_v14 = vsel %vm724_vm1, %v865_v8, %v2653_v62  ;;  %v1154_v19 = vsel %vm724_vm1, %v770_v3, %v2647_v6  ;;  %v1265_v23 = vld [vmem:[#allocation2 + $0xd0] sm:$0xff]  ;;  %v773_v5 = vld [vmem:[#allocation2 + $0x5d] sm:$0xff] }
 0x16e   :  { %1875 = vmatmul.f32.gmra.mxu2 %v1170_v32  ;;  %1762 = vmatmul.f32.gmra.mxu3 %v1154_v19  ;;  %v2794_v21 = vpack.i.bf16 %v1265_v23, %v1233_v18  ;;  %v686_v24 = vadd.f32 %v3889_v63, %v650_v20  ;;  %v866_v56 = vld [vmem:[#allocation2 + $0x4b] sm:$0xff]  ;;  %v1187_v0 = vsel %vm724_vm1, %v835_v7, %v2672_v49  ;;  %v867_v1 = vld [vmem:[#allocation2 + $0x53] sm:$0xff]  ;;  %v805_v8 = vld [vmem:[#allocation2 + $0x5f] sm:$0xff] }
 0x16f   :  { %1985 = vmatmul.f32.gmra.mxu0 %v1185_v53  ;;  %2098 = vmatmul.f32.gmra.mxu1 %v1201_v14  ;;  %v1203_v4 = vsel %vm724_vm1, %v867_v1, %v2673_v17  ;;  %v836_v14 = vld [vmem:[#allocation2 + $0x59] sm:$0xff]  ;;  %v838_v1 = vld [vmem:[#allocation2 + $0x69] sm:$0xff] }
 0x170   :  { %2795 = vrot.lane.b32.xlu0 %v2794_v21, %s2907_s22  ;;  %v718_v27 = vmax.f32 %v686_v24, 0.0  ;;  %v1238_v16 = vld [vmem:[#allocation2 + $0xf6] sm:$0xff] }
 0x171   :  { %2800 = vrot.lane.b32.xlu1 %v2799_v48, %s2907_s22  ;;  %v1267_v34 = vld [vmem:[#allocation2 + $0xe0] sm:$0xff]  ;;  %v1270_v48 = vld [vmem:[#allocation2 + $0xf8] sm:$0xff] }
 0x172   :  { %v2661_v26 = vpop.permute.xlu0 %2660  ;;  %756 = vst.msk [vmem:[#allocation2 + $0xe8] sm:$0xff] %vm724_vm1, %v718_v27  ;;  %v1297_v37 = vld [vmem:[#allocation2 + $0xd2] sm:$0xff]  ;;  %v1235_v40 = vld [vmem:[#allocation2 + $0xde] sm:$0xff]  ;;  %v2686_v23 = vpop.permute.xlu2 %2685  ;;  %v2844_v27 = vpack.i.bf16 %v1270_v48, %v1238_v16 }
 0x173   :  { %v2663_v28 = vunpack.i.h.bf16 %v2661_v26  ;;  %v2662_v30 = vunpack.i.l.bf16 %v2661_v26  ;;  %v1329_v39 = vld [vmem:[#allocation2 + $0xd4] sm:$0xff]  ;;  %v2814_v43 = vpack.i.bf16 %v1267_v34, %v1235_v40  ;;  %v1330_v62 = vld [vmem:[#allocation2 + $0xdc] sm:$0xff]  ;;  %v2688_v2 = vunpack.i.h.bf16 %v2686_v23 }
 0x174   :  { %v2809_v42 = vpack.i.bf16 %v1329_v39, %v1297_v37  ;;  %v1234_v9 = vld [vmem:[#allocation2 + $0xd6] sm:$0xff]  ;;  %v2687_v36 = vunpack.i.l.bf16 %v2686_v23  ;;  %v1239_v37 = vld [vmem:[#allocation2 + $0xfe] sm:$0xff] }
 0x175   :  { %v1186_v63 = vsel %vm724_vm1, %v834_v31, %v2662_v30  ;;  %v1202_v38 = vsel %vm724_vm1, %v866_v56, %v2663_v28  ;;  %v1266_v44 = vld [vmem:[#allocation2 + $0xd8] sm:$0xff]  ;;  %v1269_v28 = vld [vmem:[#allocation2 + $0xf0] sm:$0xff]  ;;  %v806_v56 = vld [vmem:[#allocation2 + $0x67] sm:$0xff] }
 0x176   :  { %1878 = vmatmul.f32.gmra.mxu2 %v1171_v35  ;;  %1765 = vmatmul.f32.gmra.mxu3 %v1155_v41  ;;  %v2804_v47 = vpack.i.bf16 %v1266_v44, %v1234_v9  ;;  %v1298_v61 = vld [vmem:[#allocation2 + $0xda] sm:$0xff]  ;;  %v839_v48 = vld [vmem:[#allocation2 + $0x71] sm:$0xff] }
 0x177   :  { %1988 = vmatmul.f32.gmra.mxu0 %v1186_v63  ;;  %2101 = vmatmul.f32.gmra.mxu1 %v1202_v38  ;;  %v2819_v6 = vpack.i.bf16 %v1330_v62, %v1298_v61  ;;  %v837_v63 = vld [vmem:[#allocation2 + $0x61] sm:$0xff]  ;;  %v1273_v61 = vld [vmem:[#allocation2 + $0x110] sm:$0xff] }
 0x178   :  { %2810 = vrot.lane.b32.xlu0 %v2809_v42, %s2907_s22  ;;  %2805 = vrot.lane.b32.xlu2 %v2804_v47, %s2907_s22  ;;  %v869_v38 = vld [vmem:[#allocation2 + $0x63] sm:$0xff]  ;;  %v1302_v40 = vld [vmem:[#allocation2 + $0xfa] sm:$0xff] }
 0x179   :  { %2815 = vrot.lane.b32.xlu1 %v2814_v43, %s2907_s22  ;;  %v1236_v11 = vld [vmem:[#allocation2 + $0xe6] sm:$0xff]  ;;  %v1237_v25 = vld [vmem:[#allocation2 + $0xee] sm:$0xff]  ;;  %v1334_v41 = vld [vmem:[#allocation2 + $0xfc] sm:$0xff]  ;;  %v1174_v43 = vsel %vm724_vm1, %v806_v56, %v2688_v2 }
 0x17a   :  { %v2666_v51 = vpop.permute.xlu1 %2665  ;;  %v1268_v46 = vld [vmem:[#allocation2 + $0xe8] sm:$0xff]  ;;  %v2834_v30 = vpack.i.bf16 %v1269_v28, %v1237_v25  ;;  %v1271_v39 = vld [vmem:[#allocation2 + $0x100] sm:$0xff]  ;;  %v1333_v47 = vld [vmem:[#allocation2 + $0xf4] sm:$0xff] }
 0x17b   :  { %v2668_v33 = vunpack.i.h.bf16 %v2666_v51  ;;  %v2667_v52 = vunpack.i.l.bf16 %v2666_v51  ;;  %v1299_v29 = vld [vmem:[#allocation2 + $0xe2] sm:$0xff]  ;;  %v2824_v58 = vpack.i.bf16 %v1268_v46, %v1236_v11  ;;  %v1300_v18 = vld [vmem:[#allocation2 + $0xea] sm:$0xff]  ;;  %v2701_v51 = vpop.permute.xlu2 %2700  ;;  %v2854_v17 = vpack.i.bf16 %v1271_v39, %v1239_v37  ;;  %v840_v37 = vld [vmem:[#allocation2 + $0x79] sm:$0xff] }
 0x17c   :  { %v1331_v59 = vld [vmem:[#allocation2 + $0xe4] sm:$0xff]  ;;  %v1332_v19 = vld [vmem:[#allocation2 + $0xec] sm:$0xff]  ;;  %v2703_v7 = vunpack.i.h.bf16 %v2701_v51  ;;  %v872_v39 = vld [vmem:[#allocation2 + $0x7b] sm:$0xff] }
 0x17d   :  { %v1156_v60 = vsel %vm724_vm1, %v772_v54, %v2667_v52  ;;  %v1172_v57 = vsel %vm724_vm1, %v804_v55, %v2668_v33  ;;  %v2829_v3 = vpack.i.bf16 %v1331_v59, %v1299_v29  ;;  %v2839_v26 = vpack.i.bf16 %v1332_v19, %v1300_v18  ;;  %v774_v42 = vld [vmem:[#allocation2 + $0x65] sm:$0xff]  ;;  %v775_v29 = vld [vmem:[#allocation2 + $0x6d] sm:$0xff]  ;;  %v776_v18 = vld [vmem:[#allocation2 + $0x75] sm:$0xff] }
 0x17e   :  { %1881 = vmatmul.f32.gmra.mxu2 %v1172_v57  ;;  %1768 = vmatmul.f32.gmra.mxu3 %v1156_v60  ;;  %v1158_v49 = vsel %vm724_vm1, %v774_v42, %v2687_v36  ;;  %v2859_v33 = vpack.i.bf16 %v1334_v41, %v1302_v40  ;;  %v2849_v52 = vpack.i.bf16 %v1333_v47, %v1301_v45  ;;  %v2702_v54 = vunpack.i.l.bf16 %v2701_v51  ;;  %v807_v60 = vld [vmem:[#allocation2 + $0x6f] sm:$0xff]  ;;  %v1303_v57 = vld [vmem:[#allocation2 + $0x102] sm:$0xff]  ;;  %v808_v19 = vld [vmem:[#allocation2 + $0x77] sm:$0xff] }
 0x17f   :  { %1991 = vmatmul.f32.gmra.mxu0 %v1187_v0  ;;  %2104 = vmatmul.f32.gmra.mxu1 %v1203_v4  ;;  %v1241_v59 = vld [vmem:[#allocation2 + $0x10e] sm:$0xff]  ;;  %v777_v40 = vld [vmem:[#allocation2 + $0x7d] sm:$0xff] }
 0x180   :  { %2825 = vrot.lane.b32.xlu0 %v2824_v58, %s2907_s22  ;;  %2820 = vrot.lane.b32.xlu2 %v2819_v6, %s2907_s22  ;;  %v1335_v58 = vld [vmem:[#allocation2 + $0x104] sm:$0xff]  ;;  %v1190_v6 = vsel %vm724_vm1, %v838_v1, %v2702_v54 }
 0x181   :  { %2830 = vrot.lane.b32.xlu1 %v2829_v3, %s2907_s22  ;;  %v1240_v3 = vld [vmem:[#allocation2 + $0x106] sm:$0xff] }
 0x182   :  { %v2681_v50 = vpop.permute.xlu1 %2680  ;;  %v2676_v13 = vpop.permute.xlu0 %2675  ;;  %v1272_v4 = vld [vmem:[#allocation2 + $0x108] sm:$0xff] }
 0x183   :  { %v2683_v10 = vunpack.i.h.bf16 %v2681_v50  ;;  %v2682_v12 = vunpack.i.l.bf16 %v2681_v50  ;;  %v2678_v32 = vunpack.i.h.bf16 %v2676_v13  ;;  %v2677_v53 = vunpack.i.l.bf16 %v2676_v13  ;;  %v870_v50 = vld [vmem:[#allocation2 + $0x6b] sm:$0xff]  ;;  %v841_v54 = vld [vmem:[#allocation2 + $0x81] sm:$0xff] }
 0x184   :  { %v1206_v13 = vsel %vm724_vm1, %v870_v50, %v2703_v7  ;;  %v1304_v28 = vld [vmem:[#allocation2 + $0x10a] sm:$0xff]  ;;  %v1211_v50 = vld [vmem:[#allocation2 + $0x9d] sm:$0xff] }
 0x185   :  { %v1157_v20 = vsel %vm724_vm1, %v773_v5, %v2677_v53  ;;  %v1173_v21 = vsel %vm724_vm1, %v805_v8, %v2678_v32  ;;  %v1188_v22 = vsel %vm724_vm1, %v836_v14, %v2682_v12  ;;  %v1204_v24 = vsel %vm724_vm1, %v868_v15, %v2683_v10 }
 0x186   :  { %1884 = vmatmul.f32.gmra.mxu2 %v1173_v21  ;;  %1771 = vmatmul.f32.gmra.mxu3 %v1157_v20  ;;  %v2869_v5 = vpack.i.bf16 %v1335_v58, %v1303_v57  ;;  %v2874_v8 = vpack.i.bf16 %v1273_v61, %v1241_v59  ;;  %v2864_v10 = vpack.i.bf16 %v1272_v4, %v1240_v3  ;;  %v871_v20 = vld [vmem:[#allocation2 + $0x73] sm:$0xff] }
 0x187   :  { %1994 = vmatmul.f32.gmra.mxu0 %v1188_v22  ;;  %2107 = vmatmul.f32.gmra.mxu1 %v1204_v24  ;;  %v1305_v21 = vld [vmem:[#allocation2 + $0x112] sm:$0xff] }
 0x188   :  { %2840 = vrot.lane.b32.xlu0 %v2839_v26, %s2907_s22  ;;  %2835 = vrot.lane.b32.xlu2 %v2834_v30, %s2907_s22  ;;  %v1337_v22 = vld [vmem:[#allocation2 + $0x114] sm:$0xff]  ;;  %v1336_v30 = vld [vmem:[#allocation2 + $0x10c] sm:$0xff] }
 0x189   :  { %2845 = vrot.lane.b32.xlu1 %v2844_v27, %s2907_s22  ;;  %v2884_v2 = vpack.i.bf16 %v1337_v22, %v1305_v21  ;;  %v2879_v36 = vpack.i.bf16 %v1336_v30, %v1304_v28  ;;  %v2367_v58 = vld [vmem:[%s4271_s7 + $0x18] sm:$0xff] }
 0x18a   :  { %v2691_v31 = vpop.permute.xlu0 %2690  ;;  %v2716_v23 = vpop.permute.xlu2 %2715  ;;  %2387 = vmatpush.msra.mxu3 %v2367_v58 }
 0x18b   :  { %v2693_v34 = vunpack.i.h.bf16 %v2691_v31  ;;  %v2692_v35 = vunpack.i.l.bf16 %v2691_v31  ;;  %v2718_v31 = vunpack.i.h.bf16 %v2716_v23  ;;  %v2717_v56 = vunpack.i.l.bf16 %v2716_v23 }
 0x18d   :  { %v1189_v9 = vsel %vm724_vm1, %v837_v63, %v2692_v35  ;;  %v1205_v44 = vsel %vm724_vm1, %v869_v38, %v2693_v34  ;;  %v809_v38 = vld [vmem:[#allocation2 + $0x7f] sm:$0xff] }
 0x18e   :  { %1887 = vmatmul.f32.gmra.mxu2 %v1174_v43  ;;  %1774 = vmatmul.f32.gmra.mxu3 %v1158_v49  ;;  %v1177_v41 = vsel %vm724_vm1, %v809_v38, %v2718_v31  ;;  %v1244_v31 = vld [vmem:[#allocation2 + $0xa7] sm:$0xff] }
 0x18f   :  { %1997 = vmatmul.f32.gmra.mxu0 %v1189_v9  ;;  %2110 = vmatmul.f32.gmra.mxu1 %v1205_v44  ;;  %v1161_v44 = vsel %vm724_vm1, %v777_v40, %v2717_v56  ;;  %v1275_v56 = vld [vmem:[#allocation2 + $0xa1] sm:$0xff] }
 0x190   :  { %2855 = vrot.lane.b32.xlu0 %v2854_v17, %s2907_s22  ;;  %2850 = vrot.lane.b32.xlu2 %v2849_v52, %s2907_s22  ;;  %v1242_v52 = vld [vmem:[#allocation2 + $0x97] sm:$0xff] }
 0x191   :  { %2860 = vrot.lane.b32.xlu1 %v2859_v33, %s2907_s22  ;;  %v1210_v33 = vld [vmem:[#allocation2 + $0x95] sm:$0xff] }
 0x192   :  { %v2696_v55 = vpop.permute.xlu1 %2695  ;;  %v2731_v9 = vpop.permute.xlu2 %2730 }
 0x193   :  { %v2698_v11 = vunpack.i.h.bf16 %v2696_v55  ;;  %v2697_v46 = vunpack.i.l.bf16 %v2696_v55  ;;  %v2732_v45 = vunpack.i.l.bf16 %v2731_v9  ;;  %v2733_v49 = vunpack.i.h.bf16 %v2731_v9 }
 0x195   :  { %v1159_v62 = vsel %vm724_vm1, %v775_v29, %v2697_v46  ;;  %v1175_v0 = vsel %vm724_vm1, %v807_v60, %v2698_v11  ;;  %v1610_v7 = vsel %vm724_vm1, %v1242_v52, %v2732_v45  ;;  %v873_v46 = vld [vmem:[#allocation2 + $0x83] sm:$0xff] }
 0x196   :  { %1890 = vmatmul.f32.gmra.mxu2 %v1175_v0  ;;  %1777 = vmatmul.f32.gmra.mxu3 %v1159_v62  ;;  %v1209_v29 = vsel %vm724_vm1, %v873_v46, %v2733_v49  ;;  %v1276_v46 = vld [vmem:[#allocation2 + $0xa9] sm:$0xff] }
 0x197   :  { %2000 = vmatmul.f32.gmra.mxu0 %v1190_v6  ;;  %2113 = vmatmul.f32.gmra.mxu1 %v1206_v13 }
 0x198   :  { %2870 = vrot.lane.b32.xlu0 %v2869_v5, %s2907_s22  ;;  %2865 = vrot.lane.b32.xlu2 %v2864_v10, %s2907_s22  ;;  %v1243_v10 = vld [vmem:[#allocation2 + $0x9f] sm:$0xff] }
 0x199   :  { %2875 = vrot.lane.b32.xlu1 %v2874_v8, %s2907_s22 }
 0x19a   :  { %v2711_v12 = vpop.permute.xlu1 %2710  ;;  %v2706_v32 = vpop.permute.xlu0 %2705 }
 0x19b   :  { %v2713_v53 = vunpack.i.h.bf16 %v2711_v12  ;;  %v2712_v14 = vunpack.i.l.bf16 %v2711_v12  ;;  %v2708_v15 = vunpack.i.h.bf16 %v2706_v32  ;;  %v2707_v16 = vunpack.i.l.bf16 %v2706_v32  ;;  %v1274_v12 = vld [vmem:[#allocation2 + $0x99] sm:$0xff] }
 0x19c   :  { %v1306_v32 = vld [vmem:[#allocation2 + $0x9b] sm:$0xff] }
 0x19d   :  { %v1160_v24 = vsel %vm724_vm1, %v776_v18, %v2707_v16  ;;  %v1176_v25 = vsel %vm724_vm1, %v808_v19, %v2708_v15  ;;  %v1191_v26 = vsel %vm724_vm1, %v839_v48, %v2712_v14  ;;  %v1207_v27 = vsel %vm724_vm1, %v871_v20, %v2713_v53  ;;  %v4026_v19 = vld [vmem:[%s4269_s5] ss:$0 sm:$0xff] }
 0x19e   :  { %1893 = vmatmul.f32.gmra.mxu2 %v1176_v25  ;;  %1780 = vmatmul.f32.gmra.mxu3 %v1160_v24  ;;  %v4032_v24 = vld [vmem:[%s4270_s6] ss:$0 sm:$0xff] }
 0x19f   :  { %2003 = vmatmul.f32.gmra.mxu0 %v1191_v26  ;;  %2116 = vmatmul.f32.gmra.mxu1 %v1207_v27 }
 0x1a0   :  { %2885 = vrot.lane.b32.xlu0 %v2884_v2, %s2907_s22  ;;  %2880 = vrot.lane.b32.xlu2 %v2879_v36, %s2907_s22 }
 0x1a2   :  { %v2721_v34 = vpop.permute.xlu0 %2720 }
 0x1a3   :  { %v2723_v35 = vunpack.i.h.bf16 %v2721_v34  ;;  %v2722_v63 = vunpack.i.l.bf16 %v2721_v34  ;;  %v2746_v13 = vpop.permute.xlu2 %2745  ;;  %v1307_v34 = vld [vmem:[#allocation2 + $0xa3] sm:$0xff] }
 0x1a4   :  { %v2748_v48 = vunpack.i.h.bf16 %v2746_v13  ;;  %v2747_v21 = vunpack.i.l.bf16 %v2746_v13 }
 0x1a5   :  { %v1192_v42 = vsel %vm724_vm1, %v840_v37, %v2722_v63  ;;  %v1208_v43 = vsel %vm724_vm1, %v872_v39, %v2723_v35  ;;  %v1212_v35 = vld [vmem:[#allocation2 + $0xa5] sm:$0xff] }
 0x1a6   :  { %1896 = vmatmul.f32.gmra.mxu2 %v1177_v41  ;;  %1783 = vmatmul.f32.gmra.mxu3 %v1161_v44  ;;  %v1612_v63 = vsel %vm724_vm1, %v1244_v31, %v2748_v48 }
 0x1a7   :  { %2006 = vmatmul.f32.gmra.mxu0 %v1192_v42  ;;  %2119 = vmatmul.f32.gmra.mxu1 %v1208_v43  ;;  %v1596_v42 = vsel %vm724_vm1, %v1212_v35, %v2747_v21 }
 0x1a9   :  { %v2726_v47 = vpop.permute.xlu1 %2725 }
 0x1aa   :  { %v2728_v51 = vunpack.i.h.bf16 %v2726_v47  ;;  %v2727_v17 = vunpack.i.l.bf16 %v2726_v47 }
 0x1ab   :  { %v2761_v39 = vpop.permute.xlu2 %2760 }
 0x1ac   :  { %v1594_v55 = vsel %vm724_vm1, %v1210_v33, %v2728_v51  ;;  %v1193_v11 = vsel %vm724_vm1, %v841_v54, %v2727_v17  ;;  %v2762_v9 = vunpack.i.l.bf16 %v2761_v39  ;;  %v2763_v17 = vunpack.i.h.bf16 %v2761_v39 }
 0x1ae   :  { %1899 = vmatmul.f32.gmra.mxu2 %v1610_v7  ;;  %1786 = vmatmul.f32.gmra.mxu3 %v1594_v55  ;;  %v1628_v58 = vsel %vm724_vm1, %v1276_v46, %v2762_v9 }
 0x1af   :  { %2009 = vmatmul.f32.gmra.mxu0 %v1193_v11  ;;  %2122 = vmatmul.f32.gmra.mxu1 %v1209_v29  ;;  %v1739_v60 = vpop.f32.mrf.mxu3  ;;  %v1852_v57 = vpop.f32.mrf.mxu2 }
 0x1b0   :  { %v1853_v59 = vadd.f32 %v1852_v57, %v1739_v60  ;;  %v1213_v60 = vld [vmem:[#allocation2 + $0xad] sm:$0xff] }
 0x1b1   :  { %v2741_v61 = vpop.permute.xlu1 %2740  ;;  %v1965_v6 = vpop.f32.mrf.mxu0  ;;  %v1245_v57 = vld [vmem:[#allocation2 + $0xaf] sm:$0xff] }
 0x1b2   :  { %v2736_v62 = vpop.permute.xlu0 %2735  ;;  %v2743_v0 = vunpack.i.h.bf16 %v2741_v61  ;;  %v2742_v1 = vunpack.i.l.bf16 %v2741_v61  ;;  %v1966_v5 = vadd.f32 %v1965_v6, %v1853_v59  ;;  %v2078_v8 = vpop.f32.mrf.mxu1 }
 0x1b3   :  { %v2738_v3 = vunpack.i.h.bf16 %v2736_v62  ;;  %v2737_v4 = vunpack.i.l.bf16 %v2736_v62 }
 0x1b4   :  { %v1626_v15 = vsel %vm724_vm1, %v1274_v12, %v2742_v1  ;;  %v1642_v16 = vsel %vm724_vm1, %v1306_v32, %v2743_v0  ;;  %v2079_v18 = vadd.f32 %v2078_v8, %v1966_v5  ;;  %v1308_v1 = vld [vmem:[#allocation2 + $0xab] sm:$0xff] }
 0x1b5   :  { %v1595_v53 = vsel %vm724_vm1, %v1211_v50, %v2737_v4  ;;  %v1611_v14 = vsel %vm724_vm1, %v1243_v10, %v2738_v3  ;;  %v1644_v6 = vsel %vm724_vm1, %v1308_v1, %v2763_v17  ;;  %v1247_v17 = vld [vmem:[#allocation2 + $0xbf] sm:$0xff] }
 0x1b6   :  { %1902 = vmatmul.f32.gmra.mxu2 %v1611_v14  ;;  %1789 = vmatmul.f32.gmra.mxu3 %v1595_v53  ;;  %v2178_v22 = vmul.f32 %v4026_v19, %v2079_v18 }
 0x1b7   :  { %2012 = vmatmul.f32.gmra.mxu0 %v1626_v15  ;;  %2125 = vmatmul.f32.gmra.mxu1 %v1642_v16 }
 0x1b8   :  { %v2214_v40 = vadd.f32 %v4032_v24, %v2178_v22  ;;  %v1246_v22 = vld [vmem:[#allocation2 + $0xb7] sm:$0xff] }
 0x1b9   :  { %v1742_v23 = vpop.f32.mrf.mxu3  ;;  %v1855_v20 = vpop.f32.mrf.mxu2 }
 0x1ba   :  { %v1856_v25 = vadd.f32 %v1855_v20, %v1742_v23  ;;  %v2751_v26 = vpop.permute.xlu0 %2750  ;;  %v1968_v30 = vpop.f32.mrf.mxu0  ;;  %v2246_v47 = vmax.f32 %v2214_v40, 0.0  ;;  %v1214_v23 = vld [vmem:[#allocation2 + $0xb5] sm:$0xff] }
 0x1bb   :  { %v2753_v27 = vunpack.i.h.bf16 %v2751_v26  ;;  %v2752_v28 = vunpack.i.l.bf16 %v2751_v26  ;;  %v2081_v36 = vpop.f32.mrf.mxu1  ;;  %v1309_v26 = vld [vmem:[#allocation2 + $0xb3] sm:$0xff] }
 0x1bc   :  { %v1969_v2 = vadd.f32 %v1968_v30, %v1856_v25  ;;  %v2279_v59 = vsel %vm2278_vm2, %v2246_v47, 0.0  ;;  %v1277_v25 = vld [vmem:[#allocation2 + $0xb1] sm:$0xff] }
 0x1bd   :  { %v1627_v38 = vsel %vm724_vm1, %v1275_v56, %v2752_v28  ;;  %v1643_v37 = vsel %vm724_vm1, %v1307_v34, %v2753_v27  ;;  %v2776_v27 = vpop.permute.xlu2 %2775 }
 0x1be   :  { %v2082_v41 = vadd.f32 %v2081_v36, %v1969_v2  ;;  %1905 = vmatmul.f32.gmra.mxu2 %v1612_v63  ;;  %1792 = vmatmul.f32.gmra.mxu3 %v1596_v42  ;;  %v2777_v39 = vunpack.i.l.bf16 %v2776_v27 }
 0x1bf   :  { %2015 = vmatmul.f32.gmra.mxu0 %v1627_v38  ;;  %2128 = vmatmul.f32.gmra.mxu1 %v1643_v37  ;;  %v2778_v37 = vunpack.i.h.bf16 %v2776_v27 }
 0x1c0   :  { %v2179_v43 = vmul.f32 %v4026_v19, %v2082_v41 }
 0x1c1   :  { %v1745_v44 = vpop.f32.mrf.mxu3  ;;  %v1858_v45 = vpop.f32.mrf.mxu2 }
 0x1c2   :  { %v2215_v49 = vadd.f32 %v4032_v24, %v2179_v43  ;;  %v1859_v51 = vadd.f32 %v1858_v45, %v1745_v44  ;;  %v2756_v33 = vpop.permute.xlu1 %2755  ;;  %v1971_v7 = vpop.f32.mrf.mxu0  ;;  %v1215_v45 = vld [vmem:[#allocation2 + $0xbd] sm:$0xff] }
 0x1c3   :  { %v2758_v54 = vunpack.i.h.bf16 %v2756_v33  ;;  %v2757_v55 = vunpack.i.l.bf16 %v2756_v33  ;;  %v2084_v11 = vpop.f32.mrf.mxu1  ;;  %v1278_v33 = vld [vmem:[#allocation2 + $0xb9] sm:$0xff] }
 0x1c4   :  { %v2247_v52 = vmax.f32 %v2215_v49, 0.0  ;;  %v1972_v29 = vadd.f32 %v1971_v7, %v1859_v51 }
 0x1c5   :  { %v1597_v62 = vsel %vm724_vm1, %v1213_v60, %v2757_v55  ;;  %v1613_v0 = vsel %vm724_vm1, %v1245_v57, %v2758_v54  ;;  %v1599_v54 = vsel %vm724_vm1, %v1215_v45, %v2777_v39  ;;  %v1615_v55 = vsel %vm724_vm1, %v1247_v17, %v2778_v37  ;;  %v2791_v60 = vpop.permute.xlu2 %2790 }
 0x1c6   :  { %v2280_v61 = vsel %vm2278_vm2, %v2247_v52, 0.0  ;;  %v2085_v4 = vadd.f32 %v2084_v11, %v1972_v29  ;;  %1795 = vmatmul.f32.gmra.mxu3 %v1597_v62  ;;  %1908 = vmatmul.f32.gmra.mxu2 %v1613_v0  ;;  %v1310_v52 = vld [vmem:[#allocation2 + $0xbb] sm:$0xff]  ;;  %v2793_v0 = vunpack.i.h.bf16 %v2791_v60  ;;  %v2792_v1 = vunpack.i.l.bf16 %v2791_v60 }
 0x1c7   :  { %v2281_v3 = vadd.f32 %v2280_v61, %v2279_v59  ;;  %2018 = vmatmul.f32.gmra.mxu0 %v1628_v58  ;;  %2131 = vmatmul.f32.gmra.mxu1 %v1644_v6 }
 0x1c8   :  { %v2180_v50 = vmul.f32 %v4026_v19, %v2085_v4 }
 0x1c9   :  { %v1748_v13 = vpop.f32.mrf.mxu3  ;;  %v1861_v5 = vpop.f32.mrf.mxu2 }
 0x1ca   :  { %v1862_v8 = vadd.f32 %v1861_v5, %v1748_v13  ;;  %v2216_v10 = vadd.f32 %v4032_v24, %v2180_v50  ;;  %v2771_v12 = vpop.permute.xlu1 %2770  ;;  %v2766_v32 = vpop.permute.xlu0 %2765 }
 0x1cb   :  { %v2773_v53 = vunpack.i.h.bf16 %v2771_v12  ;;  %v2772_v14 = vunpack.i.l.bf16 %v2771_v12  ;;  %v2768_v15 = vunpack.i.h.bf16 %v2766_v32  ;;  %v2767_v16 = vunpack.i.l.bf16 %v2766_v32  ;;  %v1974_v18 = vpop.f32.mrf.mxu0  ;;  %v2087_v48 = vpop.f32.mrf.mxu1  ;;  %v1216_v12 = vld [vmem:[#allocation2 + $0xc5] sm:$0xff] }
 0x1cc   :  { %v2248_v20 = vmax.f32 %v2216_v10, 0.0  ;;  %v1975_v21 = vadd.f32 %v1974_v18, %v1862_v8  ;;  %v1248_v32 = vld [vmem:[#allocation2 + $0xc7] sm:$0xff] }
 0x1cd   :  { %v1598_v28 = vsel %vm724_vm1, %v1214_v23, %v2767_v16  ;;  %v1614_v30 = vsel %vm724_vm1, %v1246_v22, %v2768_v15  ;;  %v1629_v2 = vsel %vm724_vm1, %v1277_v25, %v2772_v14  ;;  %v1645_v36 = vsel %vm724_vm1, %v1309_v26, %v2773_v53  ;;  %v1279_v15 = vld [vmem:[#allocation2 + $0xc1] sm:$0xff] }
 0x1ce   :  { %v2282_v31 = vsel %vm2278_vm2, %v2248_v20, 0.0  ;;  %v2088_v56 = vadd.f32 %v2087_v48, %v1975_v21  ;;  %1798 = vmatmul.f32.gmra.mxu3 %v1598_v28  ;;  %1911 = vmatmul.f32.gmra.mxu2 %v1614_v30  ;;  %v1311_v16 = vld [vmem:[#allocation2 + $0xc3] sm:$0xff]  ;;  %v1631_v23 = vsel %vm724_vm1, %v1279_v15, %v2792_v1  ;;  %v1250_v1 = vld [vmem:[#allocation2 + $0xd7] sm:$0xff] }
 0x1cf   :  { %v2283_v34 = vadd.f32 %v2282_v31, %v2281_v3  ;;  %2021 = vmatmul.f32.gmra.mxu0 %v1629_v2  ;;  %2134 = vmatmul.f32.gmra.mxu1 %v1645_v36  ;;  %v1647_v20 = vsel %vm724_vm1, %v1311_v16, %v2793_v0 }
 0x1d0   :  { %v2181_v35 = vmul.f32 %v4026_v19, %v2088_v56 }
 0x1d1   :  { %v1751_v63 = vpop.f32.mrf.mxu3  ;;  %v1864_v38 = vpop.f32.mrf.mxu2 }
 0x1d2   :  { %v1865_v40 = vadd.f32 %v1864_v38, %v1751_v63  ;;  %v2217_v41 = vadd.f32 %v4032_v24, %v2181_v35  ;;  %v2781_v42 = vpop.permute.xlu0 %2780  ;;  %v1217_v63 = vld [vmem:[#allocation2 + $0xcd] sm:$0xff] }
 0x1d3   :  { %v2783_v43 = vunpack.i.h.bf16 %v2781_v42  ;;  %v2782_v9 = vunpack.i.l.bf16 %v2781_v42  ;;  %v1312_v42 = vld [vmem:[#allocation2 + $0xcb] sm:$0xff] }
 0x1d4   :  { %v1977_v44 = vpop.f32.mrf.mxu0  ;;  %v2249_v47 = vmax.f32 %v2217_v41, 0.0  ;;  %v2090_v51 = vpop.f32.mrf.mxu1  ;;  %v1280_v41 = vld [vmem:[#allocation2 + $0xc9] sm:$0xff] }
 0x1d5   :  { %v1978_v49 = vadd.f32 %v1977_v44, %v1865_v40  ;;  %v1630_v7 = vsel %vm724_vm1, %v1278_v33, %v2782_v9  ;;  %v1646_v11 = vsel %vm724_vm1, %v1310_v52, %v2783_v43  ;;  %v1249_v40 = vld [vmem:[#allocation2 + $0xcf] sm:$0xff]  ;;  %v2806_v43 = vpop.permute.xlu2 %2805 }
 0x1d6   :  { %v2284_v46 = vsel %vm2278_vm2, %v2249_v47, 0.0  ;;  %1801 = vmatmul.f32.gmra.mxu3 %v1599_v54  ;;  %1914 = vmatmul.f32.gmra.mxu2 %v1615_v55  ;;  %v2808_v55 = vunpack.i.h.bf16 %v2806_v43 }
 0x1d7   :  { %v2091_v29 = vadd.f32 %v2090_v51, %v1978_v49  ;;  %v2285_v57 = vadd.f32 %v2284_v46, %v2283_v34  ;;  %2024 = vmatmul.f32.gmra.mxu0 %v1630_v7  ;;  %2137 = vmatmul.f32.gmra.mxu1 %v1646_v11  ;;  %v2807_v7 = vunpack.i.l.bf16 %v2806_v43 }
 0x1d9   :  { %v2182_v58 = vmul.f32 %v4026_v19, %v2091_v29  ;;  %v1754_v59 = vpop.f32.mrf.mxu3  ;;  %v1867_v61 = vpop.f32.mrf.mxu2 }
 0x1da   :  { %v1868_v62 = vadd.f32 %v1867_v61, %v1754_v59  ;;  %v1218_v59 = vld [vmem:[#allocation2 + $0xd5] sm:$0xff] }
 0x1db   :  { %v2218_v3 = vadd.f32 %v4032_v24, %v2182_v58  ;;  %v2786_v4 = vpop.permute.xlu1 %2785 }
 0x1dc   :  { %v2788_v6 = vunpack.i.h.bf16 %v2786_v4  ;;  %v2787_v50 = vunpack.i.l.bf16 %v2786_v4  ;;  %v1980_v13 = vpop.f32.mrf.mxu0  ;;  %v2093_v10 = vpop.f32.mrf.mxu1  ;;  %v1313_v4 = vld [vmem:[#allocation2 + $0xd3] sm:$0xff] }
 0x1dd   :  { %v2250_v5 = vmax.f32 %v2218_v3, 0.0  ;;  %v1981_v8 = vadd.f32 %v1980_v13, %v1868_v62  ;;  %v1281_v3 = vld [vmem:[#allocation2 + $0xd1] sm:$0xff]  ;;  %v1618_v13 = vsel %vm724_vm1, %v1250_v1, %v2808_v55 }
 0x1de   :  { %v1600_v53 = vsel %vm724_vm1, %v1216_v12, %v2787_v50  ;;  %v1616_v14 = vsel %vm724_vm1, %v1248_v32, %v2788_v6  ;;  %v1602_v50 = vsel %vm724_vm1, %v1218_v59, %v2807_v7  ;;  %v2821_v32 = vpop.permute.xlu2 %2820  ;;  %v1315_v59 = vld [vmem:[#allocation2 + $0xe3] sm:$0xff] }
 0x1df   :  { %v2286_v18 = vsel %vm2278_vm2, %v2250_v5, 0.0  ;;  %v2094_v48 = vadd.f32 %v2093_v10, %v1981_v8  ;;  %1804 = vmatmul.f32.gmra.mxu3 %v1600_v53  ;;  %1917 = vmatmul.f32.gmra.mxu2 %v1616_v14  ;;  %v2366_v14 = vld [vmem:[%s4271_s7 + $0x10] sm:$0xff] }
 0x1e0   :  { %v2287_v21 = vadd.f32 %v2286_v18, %v2285_v57  ;;  %2027 = vmatmul.f32.gmra.mxu0 %v1631_v23  ;;  %2140 = vmatmul.f32.gmra.mxu1 %v1647_v20  ;;  %v2823_v20 = vunpack.i.h.bf16 %v2821_v32 }
 0x1e1   :  { %v2183_v22 = vmul.f32 %v4026_v19, %v2094_v48  ;;  %v1757_v25 = vpop.f32.mrf.mxu3  ;;  %v1870_v26 = vpop.f32.mrf.mxu2  ;;  %2388 = vmatpush.msra.mxu3 %v2366_v14 }
 0x1e2   :  { %v1871_v27 = vadd.f32 %v1870_v26, %v1757_v25  ;;  %v2796_v2 = vpop.permute.xlu0 %2795 }
 0x1e3   :  { %v2219_v28 = vadd.f32 %v4032_v24, %v2183_v22  ;;  %v2801_v30 = vpop.permute.xlu1 %2800  ;;  %v2798_v56 = vunpack.i.h.bf16 %v2796_v2  ;;  %v2797_v34 = vunpack.i.l.bf16 %v2796_v2  ;;  %v1219_v2 = vld [vmem:[#allocation2 + $0xdd] sm:$0xff] }
 0x1e4   :  { %v2803_v36 = vunpack.i.h.bf16 %v2801_v30  ;;  %v2802_v31 = vunpack.i.l.bf16 %v2801_v30  ;;  %v1983_v35 = vpop.f32.mrf.mxu0  ;;  %v2096_v39 = vpop.f32.mrf.mxu1 }
 0x1e5   :  { %v2251_v38 = vmax.f32 %v2219_v28, 0.0  ;;  %v1984_v37 = vadd.f32 %v1983_v35, %v1871_v27  ;;  %v1601_v9 = vsel %vm724_vm1, %v1217_v63, %v2797_v34  ;;  %v1617_v44 = vsel %vm724_vm1, %v1249_v40, %v2798_v56  ;;  %v1282_v35 = vld [vmem:[#allocation2 + $0xd9] sm:$0xff] }
 0x1e6   :  { %v1632_v45 = vsel %vm724_vm1, %v1280_v41, %v2802_v31  ;;  %v1648_v47 = vsel %vm724_vm1, %v1312_v42, %v2803_v36  ;;  %v1251_v36 = vld [vmem:[#allocation2 + $0xdf] sm:$0xff] }
 0x1e7   :  { %v2288_v49 = vsel %vm2278_vm2, %v2251_v38, 0.0  ;;  %v2097_v51 = vadd.f32 %v2096_v39, %v1984_v37  ;;  %1807 = vmatmul.f32.gmra.mxu3 %v1601_v9  ;;  %1920 = vmatmul.f32.gmra.mxu2 %v1617_v44  ;;  %v1314_v63 = vld [vmem:[#allocation2 + $0xdb] sm:$0xff] }
 0x1e8   :  { %v2289_v17 = vadd.f32 %v2288_v49, %v2287_v21  ;;  %2030 = vmatmul.f32.gmra.mxu0 %v1632_v45  ;;  %2143 = vmatmul.f32.gmra.mxu1 %v1648_v47  ;;  %v2822_v21 = vunpack.i.l.bf16 %v2821_v32  ;;  %v1650_v40 = vsel %vm724_vm1, %v1314_v63, %v2823_v20 }
 0x1e9   :  { %v2184_v33 = vmul.f32 %v4026_v19, %v2097_v51  ;;  %v1760_v52 = vpop.f32.mrf.mxu3  ;;  %v1873_v54 = vpop.f32.mrf.mxu2 }
 0x1ea   :  { %v1874_v11 = vadd.f32 %v1873_v54, %v1760_v52  ;;  %v2811_v29 = vpop.permute.xlu0 %2810  ;;  %v1634_v39 = vsel %vm724_vm1, %v1282_v35, %v2822_v21 }
 0x1eb   :  { %v2220_v46 = vadd.f32 %v4032_v24, %v2184_v33  ;;  %v2813_v60 = vunpack.i.h.bf16 %v2811_v29  ;;  %v2812_v57 = vunpack.i.l.bf16 %v2811_v29  ;;  %v2816_v6 = vpop.permute.xlu1 %2815  ;;  %v2836_v29 = vpop.permute.xlu2 %2835 }
 0x1ec   :  { %v1986_v58 = vpop.f32.mrf.mxu0  ;;  %v2099_v0 = vpop.f32.mrf.mxu1  ;;  %v2818_v18 = vunpack.i.h.bf16 %v2816_v6  ;;  %v2817_v48 = vunpack.i.l.bf16 %v2816_v6 }
 0x1ed   :  { %v2252_v61 = vmax.f32 %v2220_v46, 0.0  ;;  %v1987_v62 = vadd.f32 %v1986_v58, %v1874_v11  ;;  %v1633_v5 = vsel %vm724_vm1, %v1281_v3, %v2812_v57  ;;  %v1649_v8 = vsel %vm724_vm1, %v1313_v4, %v2813_v60  ;;  %v1220_v11 = vld [vmem:[#allocation2 + $0xe5] sm:$0xff] }
 0x1ee   :  { %v1603_v56 = vsel %vm724_vm1, %v1219_v2, %v2817_v48  ;;  %v1619_v34 = vsel %vm724_vm1, %v1251_v36, %v2818_v18  ;;  %v1252_v46 = vld [vmem:[#allocation2 + $0xe7] sm:$0xff] }
 0x1ef   :  { %v2290_v10 = vsel %vm2278_vm2, %v2252_v61, 0.0  ;;  %v2100_v12 = vadd.f32 %v2099_v0, %v1987_v62  ;;  %1810 = vmatmul.f32.gmra.mxu3 %v1602_v50  ;;  %1923 = vmatmul.f32.gmra.mxu2 %v1618_v13  ;;  %v1283_v58 = vld [vmem:[#allocation2 + $0xe1] sm:$0xff]  ;;  %v2838_v13 = vunpack.i.h.bf16 %v2836_v29  ;;  %v1221_v48 = vld [vmem:[#allocation2 + $0xed] sm:$0xff] }
 0x1f0   :  { %v2291_v53 = vadd.f32 %v2290_v10, %v2289_v17  ;;  %2033 = vmatmul.f32.gmra.mxu0 %v1633_v5  ;;  %2146 = vmatmul.f32.gmra.mxu1 %v1649_v8  ;;  %v2837_v5 = vunpack.i.l.bf16 %v2836_v29 }
 0x1f1   :  { %v2185_v15 = vmul.f32 %v4026_v19, %v2100_v12  ;;  %v1876_v16 = vpop.f32.mrf.mxu2  ;;  %v1763_v23 = vpop.f32.mrf.mxu3 }
 0x1f2   :  { %v1877_v25 = vadd.f32 %v1876_v16, %v1763_v23  ;;  %v2826_v31 = vpop.permute.xlu0 %2825  ;;  %v1253_v23 = vld [vmem:[#allocation2 + $0xef] sm:$0xff]  ;;  %v1605_v21 = vsel %vm724_vm1, %v1221_v48, %v2837_v5  ;;  %v1223_v5 = vld [vmem:[#allocation2 + $0xfd] sm:$0xff] }
 0x1f3   :  { %v2221_v22 = vadd.f32 %v4032_v24, %v2185_v15  ;;  %v2831_v42 = vpop.permute.xlu1 %2830  ;;  %v2828_v44 = vunpack.i.h.bf16 %v2826_v31  ;;  %v2827_v45 = vunpack.i.l.bf16 %v2826_v31  ;;  %v2851_v36 = vpop.permute.xlu2 %2850 }
 0x1f4   :  { %v1989_v26 = vpop.f32.mrf.mxu0  ;;  %v2102_v30 = vpop.f32.mrf.mxu1  ;;  %v2833_v49 = vunpack.i.h.bf16 %v2831_v42  ;;  %v2832_v51 = vunpack.i.l.bf16 %v2831_v42 }
 0x1f5   :  { %v2253_v27 = vmax.f32 %v2221_v22, 0.0  ;;  %v1990_v28 = vadd.f32 %v1989_v26, %v1877_v25  ;;  %v1604_v60 = vsel %vm724_vm1, %v1220_v11, %v2827_v45  ;;  %v1620_v57 = vsel %vm724_vm1, %v1252_v46, %v2828_v44  ;;  %v1284_v25 = vld [vmem:[#allocation2 + $0xe9] sm:$0xff]  ;;  %v1222_v45 = vld [vmem:[#allocation2 + $0xf5] sm:$0xff] }
 0x1f6   :  { %v1635_v0 = vsel %vm724_vm1, %v1283_v58, %v2832_v51  ;;  %v1651_v1 = vsel %vm724_vm1, %v1315_v59, %v2833_v49  ;;  %v1621_v22 = vsel %vm724_vm1, %v1253_v23, %v2838_v13  ;;  %v1316_v26 = vld [vmem:[#allocation2 + $0xeb] sm:$0xff] }
 0x1f7   :  { %v2292_v38 = vsel %vm2278_vm2, %v2253_v27, 0.0  ;;  %v2103_v37 = vadd.f32 %v2102_v30, %v1990_v28  ;;  %1813 = vmatmul.f32.gmra.mxu3 %v1603_v56  ;;  %1926 = vmatmul.f32.gmra.mxu2 %v1619_v34 }
 0x1f8   :  { %v2293_v41 = vadd.f32 %v2292_v38, %v2291_v53  ;;  %2036 = vmatmul.f32.gmra.mxu0 %v1634_v39  ;;  %2149 = vmatmul.f32.gmra.mxu1 %v1650_v40  ;;  %v2852_v39 = vunpack.i.l.bf16 %v2851_v36 }
 0x1f9   :  { %v2186_v43 = vmul.f32 %v4026_v19, %v2103_v37  ;;  %v1879_v9 = vpop.f32.mrf.mxu2  ;;  %v1766_v47 = vpop.f32.mrf.mxu3  ;;  %v2853_v37 = vunpack.i.h.bf16 %v2851_v36 }
 0x1fa   :  { %v1880_v33 = vadd.f32 %v1879_v9, %v1766_v47  ;;  %v2841_v4 = vpop.permute.xlu0 %2840  ;;  %v1254_v47 = vld [vmem:[#allocation2 + $0xf7] sm:$0xff] }
 0x1fb   :  { %v2222_v17 = vadd.f32 %v4032_v24, %v2186_v43  ;;  %v2843_v10 = vunpack.i.h.bf16 %v2841_v4  ;;  %v2842_v12 = vunpack.i.l.bf16 %v2841_v4  ;;  %v2846_v20 = vpop.permute.xlu1 %2845 }
 0x1fc   :  { %v1992_v52 = vpop.f32.mrf.mxu0  ;;  %v2105_v7 = vpop.f32.mrf.mxu1  ;;  %v2848_v35 = vunpack.i.h.bf16 %v2846_v20  ;;  %v2847_v63 = vunpack.i.l.bf16 %v2846_v20 }
 0x1fd   :  { %v2254_v54 = vmax.f32 %v2222_v17, 0.0  ;;  %v1993_v55 = vadd.f32 %v1992_v52, %v1880_v33  ;;  %v1636_v30 = vsel %vm724_vm1, %v1284_v25, %v2842_v12  ;;  %v1652_v2 = vsel %vm724_vm1, %v1316_v26, %v2843_v10  ;;  %v1285_v33 = vld [vmem:[#allocation2 + $0xf1] sm:$0xff]  ;;  %v2866_v10 = vpop.permute.xlu2 %2865 }
 0x1fe   :  { %v1606_v51 = vsel %vm724_vm1, %v1222_v45, %v2847_v63  ;;  %v1622_v17 = vsel %vm724_vm1, %v1254_v47, %v2848_v35  ;;  %v1317_v52 = vld [vmem:[#allocation2 + $0xf3] sm:$0xff]  ;;  %v2868_v25 = vunpack.i.h.bf16 %v2866_v10  ;;  %v2867_v26 = vunpack.i.l.bf16 %v2866_v10  ;;  %v1224_v63 = vld [vmem:[#allocation2 + $0x105] sm:$0xff] }
 0x1ff   :  { %v2294_v61 = vsel %vm2278_vm2, %v2254_v54, 0.0  ;;  %v2106_v62 = vadd.f32 %v2105_v7, %v1993_v55  ;;  %1816 = vmatmul.f32.gmra.mxu3 %v1604_v60  ;;  %1929 = vmatmul.f32.gmra.mxu2 %v1620_v57  ;;  %v1637_v7 = vsel %vm724_vm1, %v1285_v33, %v2852_v39  ;;  %v1653_v11 = vsel %vm724_vm1, %v1317_v52, %v2853_v37 }
 0x200   :  { %v2295_v3 = vadd.f32 %v2294_v61, %v2293_v41  ;;  %2039 = vmatmul.f32.gmra.mxu0 %v1635_v0  ;;  %2152 = vmatmul.f32.gmra.mxu1 %v1651_v1  ;;  %v1608_v37 = vsel %vm724_vm1, %v1224_v63, %v2867_v26 }
 0x201   :  { %v2187_v6 = vmul.f32 %v4026_v19, %v2106_v62  ;;  %v1882_v50 = vpop.f32.mrf.mxu2  ;;  %v1769_v8 = vpop.f32.mrf.mxu3 }
 0x202   :  { %v1883_v53 = vadd.f32 %v1882_v50, %v1769_v8  ;;  %v2856_v49 = vpop.permute.xlu0 %2855  ;;  %v1255_v8 = vld [vmem:[#allocation2 + $0xff] sm:$0xff] }
 0x203   :  { %v2223_v32 = vadd.f32 %v4032_v24, %v2187_v6  ;;  %v2861_v46 = vpop.permute.xlu1 %2860  ;;  %v2858_v58 = vunpack.i.h.bf16 %v2856_v49  ;;  %v2857_v59 = vunpack.i.l.bf16 %v2856_v49 }
 0x204   :  { %v1995_v14 = vpop.f32.mrf.mxu0  ;;  %v2108_v18 = vpop.f32.mrf.mxu1  ;;  %v2863_v62 = vunpack.i.h.bf16 %v2861_v46  ;;  %v2862_v0 = vunpack.i.l.bf16 %v2861_v46 }
 0x205   :  { %v2255_v15 = vmax.f32 %v2223_v32, 0.0  ;;  %v1996_v16 = vadd.f32 %v1995_v14, %v1883_v53  ;;  %v1607_v12 = vsel %vm724_vm1, %v1223_v5, %v2857_v59  ;;  %v1623_v32 = vsel %vm724_vm1, %v1255_v8, %v2858_v58  ;;  %v1286_v53 = vld [vmem:[#allocation2 + $0xf9] sm:$0xff]  ;;  %v2881_v47 = vpop.permute.xlu2 %2880  ;;  %v1225_v59 = vld [vmem:[#allocation2 + $0x10d] sm:$0xff] }
 0x206   :  { %v1318_v14 = vld [vmem:[#allocation2 + $0xfb] sm:$0xff] }
 0x207   :  { %v2296_v27 = vsel %vm2278_vm2, %v2255_v15, 0.0  ;;  %v2109_v28 = vadd.f32 %v2108_v18, %v1996_v16  ;;  %1819 = vmatmul.f32.gmra.mxu3 %v1605_v21  ;;  %1932 = vmatmul.f32.gmra.mxu2 %v1621_v22  ;;  %v1638_v18 = vsel %vm724_vm1, %v1286_v53, %v2862_v0  ;;  %v1654_v48 = vsel %vm724_vm1, %v1318_v14, %v2863_v62 }
 0x208   :  { %v2297_v31 = vadd.f32 %v2296_v27, %v2295_v3  ;;  %2042 = vmatmul.f32.gmra.mxu0 %v1636_v30  ;;  %2155 = vmatmul.f32.gmra.mxu1 %v1652_v2 }
 0x209   :  { %v2188_v56 = vmul.f32 %v4026_v19, %v2109_v28  ;;  %v1885_v34 = vpop.f32.mrf.mxu2  ;;  %v1772_v38 = vpop.f32.mrf.mxu3 }
 0x20a   :  { %v1886_v41 = vadd.f32 %v1885_v34, %v1772_v38  ;;  %v2871_v23 = vpop.permute.xlu0 %2870  ;;  %v1256_v38 = vld [vmem:[#allocation2 + $0x107] sm:$0xff] }
 0x20b   :  { %v2224_v40 = vadd.f32 %v4032_v24, %v2188_v56  ;;  %v2873_v28 = vunpack.i.h.bf16 %v2871_v23  ;;  %v2872_v30 = vunpack.i.l.bf16 %v2871_v23  ;;  %v1624_v39 = vsel %vm724_vm1, %v1256_v38, %v2868_v25 }
 0x20c   :  { %v1998_v42 = vpop.f32.mrf.mxu0  ;;  %v2111_v44 = vpop.f32.mrf.mxu1 }
 0x20d   :  { %v2256_v43 = vmax.f32 %v2224_v40, 0.0  ;;  %v1999_v9 = vadd.f32 %v1998_v42, %v1886_v41  ;;  %v1287_v40 = vld [vmem:[#allocation2 + $0x101] sm:$0xff]  ;;  %v2876_v42 = vpop.permute.xlu1 %2875 }
 0x20e   :  { %v1319_v41 = vld [vmem:[#allocation2 + $0x103] sm:$0xff]  ;;  %v2878_v33 = vunpack.i.h.bf16 %v2876_v42  ;;  %v2877_v52 = vunpack.i.l.bf16 %v2876_v42 }
 0x20f   :  { %v2298_v54 = vsel %vm2278_vm2, %v2256_v43, 0.0  ;;  %v2112_v55 = vadd.f32 %v2111_v44, %v1999_v9  ;;  %1822 = vmatmul.f32.gmra.mxu3 %v1606_v51  ;;  %1935 = vmatmul.f32.gmra.mxu2 %v1622_v17  ;;  %v1639_v44 = vsel %vm724_vm1, %v1287_v40, %v2872_v30  ;;  %v1655_v45 = vsel %vm724_vm1, %v1319_v41, %v2873_v28 }
 0x210   :  { %v2299_v29 = vadd.f32 %v2298_v54, %v2297_v31  ;;  %2045 = vmatmul.f32.gmra.mxu0 %v1637_v7  ;;  %2158 = vmatmul.f32.gmra.mxu1 %v1653_v11  ;;  %v2882_v7 = vunpack.i.l.bf16 %v2881_v47  ;;  %v1609_v62 = vsel %vm724_vm1, %v1225_v59, %v2877_v52 }
 0x211   :  { %v2189_v60 = vmul.f32 %v4026_v19, %v2112_v55  ;;  %v1888_v57 = vpop.f32.mrf.mxu2  ;;  %v1775_v61 = vpop.f32.mrf.mxu3  ;;  %v2883_v55 = vunpack.i.h.bf16 %v2881_v47 }
 0x212   :  { %v1889_v3 = vadd.f32 %v1888_v57, %v1775_v61  ;;  %v1257_v61 = vld [vmem:[#allocation2 + $0x10f] sm:$0xff]  ;;  %v2886_v5 = vpop.permute.xlu0 %2885 }
 0x213   :  { %v2225_v1 = vadd.f32 %v4032_v24, %v2189_v60  ;;  %v1625_v0 = vsel %vm724_vm1, %v1257_v61, %v2878_v33  ;;  %v2888_v53 = vunpack.i.h.bf16 %v2886_v5  ;;  %v2887_v14 = vunpack.i.l.bf16 %v2886_v5 }
 0x214   :  { %v2001_v4 = vpop.f32.mrf.mxu0  ;;  %v2114_v13 = vpop.f32.mrf.mxu1 }
 0x215   :  { %v2257_v6 = vmax.f32 %v2225_v1, 0.0  ;;  %v2002_v50 = vadd.f32 %v2001_v4, %v1889_v3  ;;  %v1288_v1 = vld [vmem:[#allocation2 + $0x109] sm:$0xff] }
 0x216   :  { %v1320_v3 = vld [vmem:[#allocation2 + $0x10b] sm:$0xff] }
 0x217   :  { %v2300_v15 = vsel %vm2278_vm2, %v2257_v6, 0.0  ;;  %v2115_v16 = vadd.f32 %v2114_v13, %v2002_v50  ;;  %1825 = vmatmul.f32.gmra.mxu3 %v1607_v12  ;;  %1938 = vmatmul.f32.gmra.mxu2 %v1623_v32  ;;  %v1640_v50 = vsel %vm724_vm1, %v1288_v1, %v2882_v7  ;;  %v1656_v13 = vsel %vm724_vm1, %v1320_v3, %v2883_v55 }
 0x218   :  { %v2301_v20 = vadd.f32 %v2300_v15, %v2299_v29  ;;  %2048 = vmatmul.f32.gmra.mxu0 %v1638_v18  ;;  %2161 = vmatmul.f32.gmra.mxu1 %v1654_v48 }
 0x219   :  { %v2190_v21 = vmul.f32 %v4026_v19, %v2115_v16  ;;  %v1891_v22 = vpop.f32.mrf.mxu2  ;;  %v1778_v27 = vpop.f32.mrf.mxu3 }
 0x21a   :  { %v1892_v36 = vadd.f32 %v1891_v22, %v1778_v27  ;;  %v1321_v22 = vld [vmem:[#allocation2 + $0x113] sm:$0xff] }
 0x21b   :  { %v2226_v2 = vadd.f32 %v4032_v24, %v2190_v21  ;;  %v1289_v21 = vld [vmem:[#allocation2 + $0x111] sm:$0xff]  ;;  %v1657_v28 = vsel %vm724_vm1, %v1321_v22, %v2888_v53 }
 0x21c   :  { %v2004_v31 = vpop.f32.mrf.mxu0  ;;  %v2117_v35 = vpop.f32.mrf.mxu1  ;;  %v1641_v27 = vsel %vm724_vm1, %v1289_v21, %v2887_v14 }
 0x21d   :  { %v2258_v56 = vmax.f32 %v2226_v2, 0.0  ;;  %v2005_v34 = vadd.f32 %v2004_v31, %v1892_v36  ;;  %v2365_v31 = vld [vmem:[%s4271_s7 + $0x8] sm:$0xff] }
 0x21e   :  { %2389 = vmatpush.msra.mxu3 %v2365_v31 }
 0x21f   :  { %v2302_v43 = vsel %vm2278_vm2, %v2258_v56, 0.0  ;;  %v2118_v9 = vadd.f32 %v2117_v35, %v2005_v34  ;;  %1828 = vmatmul.f32.gmra.mxu3 %v1608_v37  ;;  %1941 = vmatmul.f32.gmra.mxu2 %v1624_v39 }
 0x220   :  { %v2303_v49 = vadd.f32 %v2302_v43, %v2301_v20  ;;  %2051 = vmatmul.f32.gmra.mxu0 %v1639_v44  ;;  %2164 = vmatmul.f32.gmra.mxu1 %v1655_v45 }
 0x221   :  { %v2191_v51 = vmul.f32 %v4026_v19, %v2118_v9  ;;  %v1894_v17 = vpop.f32.mrf.mxu2  ;;  %v1781_v54 = vpop.f32.mrf.mxu3 }
 0x222   :  { %v1895_v46 = vadd.f32 %v1894_v17, %v1781_v54 }
 0x223   :  { %v2227_v11 = vadd.f32 %v4032_v24, %v2191_v51 }
 0x224   :  { %v2007_v29 = vpop.f32.mrf.mxu0  ;;  %v2120_v58 = vpop.f32.mrf.mxu1 }
 0x225   :  { %v2259_v60 = vmax.f32 %v2227_v11, 0.0  ;;  %v2008_v57 = vadd.f32 %v2007_v29, %v1895_v46 }
 0x227   :  { %v2304_v4 = vsel %vm2278_vm2, %v2259_v60, 0.0  ;;  %v2121_v6 = vadd.f32 %v2120_v58, %v2008_v57  ;;  %1831 = vmatmul.f32.gmra.mxu3 %v1609_v62  ;;  %1944 = vmatmul.f32.gmra.mxu2 %v1625_v0 }
 0x228   :  { %v2305_v8 = vadd.f32 %v2304_v4, %v2303_v49  ;;  %2054 = vmatmul.f32.gmra.mxu0 %v1640_v50  ;;  %2167 = vmatmul.f32.gmra.mxu1 %v1656_v13 }
 0x229   :  { %v2192_v10 = vmul.f32 %v4026_v19, %v2121_v6  ;;  %v1897_v12 = vpop.f32.mrf.mxu2  ;;  %v1784_v32 = vpop.f32.mrf.mxu3 }
 0x22a   :  { %v1898_v16 = vadd.f32 %v1897_v12, %v1784_v32 }
 0x22b   :  { %v2228_v15 = vadd.f32 %v4032_v24, %v2192_v10 }
 0x22c   :  { %v2010_v18 = vpop.f32.mrf.mxu0  ;;  %v2123_v20 = vpop.f32.mrf.mxu1 }
 0x22d   :  { %v2260_v48 = vmax.f32 %v2228_v15, 0.0  ;;  %v2011_v23 = vadd.f32 %v2010_v18, %v1898_v16 }
 0x22f   :  { %v2306_v25 = vsel %vm2278_vm2, %v2260_v48, 0.0  ;;  %v2124_v26 = vadd.f32 %v2123_v20, %v2011_v23 }
 0x230   :  { %v2307_v30 = vadd.f32 %v2306_v25, %v2305_v8  ;;  %2057 = vmatmul.f32.gmra.mxu0 %v1641_v27  ;;  %2170 = vmatmul.f32.gmra.mxu1 %v1657_v28 }
 0x231   :  { %v2193_v2 = vmul.f32 %v4026_v19, %v2124_v26  ;;  %v1900_v36 = vpop.f32.mrf.mxu2  ;;  %v1787_v56 = vpop.f32.mrf.mxu3 }
 0x232   :  { %v1901_v35 = vadd.f32 %v1900_v36, %v1787_v56 }
 0x233   :  { %v2229_v34 = vadd.f32 %v4032_v24, %v2193_v2 }
 0x234   :  { %v2013_v63 = vpop.f32.mrf.mxu0  ;;  %v2126_v39 = vpop.f32.mrf.mxu1 }
 0x235   :  { %v2261_v38 = vmax.f32 %v2229_v34, 0.0  ;;  %v2014_v37 = vadd.f32 %v2013_v63, %v1901_v35 }
 0x237   :  { %v2308_v40 = vsel %vm2278_vm2, %v2261_v38, 0.0  ;;  %v2127_v41 = vadd.f32 %v2126_v39, %v2014_v37 }
 0x238   :  { %v4145_v42 = vadd.f32 %v2308_v40, %v2307_v30 }
 0x239   :  { %v1903_v43 = vpop.f32.mrf.mxu2  ;;  %v1790_v9 = vpop.f32.mrf.mxu3  ;;  %v2194_v44 = vmul.f32 %v4026_v19, %v2127_v41 }
 0x23a   :  { %v1904_v45 = vadd.f32 %v1903_v43, %v1790_v9 }
 0x23b   :  { %v2230_v17 = vadd.f32 %v4032_v24, %v2194_v44 }
 0x23c   :  { %v2016_v47 = vpop.f32.mrf.mxu0  ;;  %v2129_v51 = vpop.f32.mrf.mxu1 }
 0x23d   :  { %v2017_v49 = vadd.f32 %v2016_v47, %v1904_v45  ;;  %v2262_v7 = vmax.f32 %v2230_v17, 0.0 }
 0x23f   :  { %v2130_v33 = vadd.f32 %v2129_v51, %v2017_v49  ;;  %v2324_v59 = vsel %vm2278_vm2, %v2262_v7, 0.0 }
 0x241   :  { %v2195_v52 = vmul.f32 %v4026_v19, %v2130_v33  ;;  %v1906_v54 = vpop.f32.mrf.mxu2  ;;  %v1793_v55 = vpop.f32.mrf.mxu3 }
 0x242   :  { %v1907_v46 = vadd.f32 %v1906_v54, %v1793_v55 }
 0x243   :  { %v2231_v11 = vadd.f32 %v4032_v24, %v2195_v52 }
 0x244   :  { %v2019_v60 = vpop.f32.mrf.mxu0  ;;  %v2132_v57 = vpop.f32.mrf.mxu1 }
 0x245   :  { %v2263_v29 = vmax.f32 %v2231_v11, 0.0  ;;  %v2020_v58 = vadd.f32 %v2019_v60, %v1907_v46 }
 0x247   :  { %v2325_v61 = vsel %vm2278_vm2, %v2263_v29, 0.0  ;;  %v2133_v0 = vadd.f32 %v2132_v57, %v2020_v58 }
 0x248   :  { %v2326_v62 = vadd.f32 %v2325_v61, %v2324_v59 }
 0x249   :  { %v2196_v1 = vmul.f32 %v4026_v19, %v2133_v0  ;;  %v1796_v3 = vpop.f32.mrf.mxu3  ;;  %v1909_v4 = vpop.f32.mrf.mxu2 }
 0x24a   :  { %v1910_v6 = vadd.f32 %v1909_v4, %v1796_v3 }
 0x24b   :  { %v2232_v50 = vadd.f32 %v4032_v24, %v2196_v1 }
 0x24c   :  { %v2022_v13 = vpop.f32.mrf.mxu0  ;;  %v2135_v5 = vpop.f32.mrf.mxu1 }
 0x24d   :  { %v2264_v8 = vmax.f32 %v2232_v50, 0.0  ;;  %v2023_v10 = vadd.f32 %v2022_v13, %v1910_v6 }
 0x24f   :  { %v2327_v12 = vsel %vm2278_vm2, %v2264_v8, 0.0  ;;  %v2136_v32 = vadd.f32 %v2135_v5, %v2023_v10 }
 0x250   :  { %v2328_v53 = vadd.f32 %v2327_v12, %v2326_v62 }
 0x251   :  { %v2197_v14 = vmul.f32 %v4026_v19, %v2136_v32  ;;  %v1799_v15 = vpop.f32.mrf.mxu3  ;;  %v1912_v16 = vpop.f32.mrf.mxu2 }
 0x252   :  { %v1913_v18 = vadd.f32 %v1912_v16, %v1799_v15 }
 0x253   :  { %v2233_v48 = vadd.f32 %v4032_v24, %v2197_v14  ;;  %v4170_v14 = vld [vmem:[%s4269_s5] ss:$0 sm:$0xff] }
 0x254   :  { %v2025_v23 = vpop.f32.mrf.mxu0  ;;  %v2138_v20 = vpop.f32.mrf.mxu1 }
 0x255   :  { %v2265_v21 = vmax.f32 %v2233_v48, 0.0  ;;  %v2026_v22 = vadd.f32 %v2025_v23, %v1913_v18 }
 0x257   :  { %v2329_v25 = vsel %vm2278_vm2, %v2265_v21, 0.0  ;;  %v2139_v26 = vadd.f32 %v2138_v20, %v2026_v22 }
 0x258   :  { %v2330_v27 = vadd.f32 %v2329_v25, %v2328_v53  ;;  %v4178_v25 = vld [vmem:[%s4270_s6] ss:$0 sm:$0xff] }
 0x259   :  { %v2198_v28 = vmul.f32 %v4026_v19, %v2139_v26  ;;  %v1802_v30 = vpop.f32.mrf.mxu3  ;;  %v1915_v2 = vpop.f32.mrf.mxu2  ;;  %v2364_v19 = vld [vmem:[%s4271_s7] sm:$0xff] }
 0x25a   :  { %2390 = vmatpush.msra.mxu3 %v2364_v19  ;;  %v1916_v46 = vadd.f32 %v1915_v2, %v1802_v30 }
 0x25b   :  { %v2234_v36 = vadd.f32 %v4032_v24, %v2198_v28 }
 0x25d   :  { %v2028_v31 = vpop.f32.mrf.mxu0  ;;  %v2141_v56 = vpop.f32.mrf.mxu1  ;;  %v2266_v34 = vmax.f32 %v2234_v36, 0.0 }
 0x25e   :  { %v2029_v62 = vadd.f32 %v2028_v31, %v1916_v46 }
 0x25f   :  { %v2331_v35 = vsel %vm2278_vm2, %v2266_v34, 0.0 }
 0x260   :  { %v4162_v63 = vadd.f32 %v2331_v35, %v2330_v27  ;;  %v2142_v4 = vadd.f32 %v2141_v56, %v2029_v62 }
 0x262   :  { %v1805_v38 = vpop.f32.mrf.mxu3  ;;  %v1918_v37 = vpop.f32.mrf.mxu2  ;;  %v2199_v15 = vmul.f32 %v4170_v14, %v2142_v4 }
 0x263   :  { %v1919_v57 = vadd.f32 %v1918_v37, %v1805_v38 }
 0x264   :  { %v2235_v26 = vadd.f32 %v4178_v25, %v2199_v15  ;;  %v2403_v15 = vld [vmem:[%s4273_s9 + $0x38] sm:$0xff] }
 0x265   :  { %v2031_v39 = vpop.f32.mrf.mxu0  ;;  %v2144_v40 = vpop.f32.mrf.mxu1  ;;  %2419 = vmatpush.msrb.mxu3 %v2403_v15  ;;  %v18_v15 = vstv %s4276_s12 }
 0x266   :  { %v2032_v0 = vadd.f32 %v2031_v39, %v1919_v57  ;;  %19 = vst [vmem:[#allocation3] sm:$0x1] %v18_v15 }
 0x268   :  { %v2145_v5 = vadd.f32 %v2144_v40, %v2032_v0  ;;  %v2267_v40 = vmax.f32 %v2235_v26, 0.0  ;;  %v2401_v26 = vld [vmem:[%s4273_s9 + $0x28] sm:$0xff] }
 0x26a   :  { %v1808_v41 = vpop.f32.mrf.mxu3  ;;  %v1921_v43 = vpop.f32.mrf.mxu2  ;;  %v2200_v48 = vmul.f32 %v4170_v14, %v2145_v5 }
 0x26b   :  { %v1922_v58 = vadd.f32 %v1921_v43, %v1808_v41 }
 0x26c   :  { %v2236_v31 = vadd.f32 %v4178_v25, %v2200_v48 }
 0x26d   :  { %v2034_v9 = vpop.f32.mrf.mxu0  ;;  %v2147_v44 = vpop.f32.mrf.mxu1 }
 0x26e   :  { %v2035_v3 = vadd.f32 %v2034_v9, %v1922_v58 }
 0x270   :  { %v2148_v12 = vadd.f32 %v2147_v44, %v2035_v3  ;;  %v2268_v44 = vmax.f32 %v2236_v31, 0.0  ;;  %v2400_v31 = vld [vmem:[%s4273_s9 + $0x20] sm:$0xff] }
 0x272   :  { %v1811_v24 = vpop.f32.mrf.mxu3  ;;  %v1924_v45 = vpop.f32.mrf.mxu2  ;;  %v2201_v22 = vmul.f32 %v4170_v14, %v2148_v12 }
 0x273   :  { %v1925_v1 = vadd.f32 %v1924_v45, %v1811_v24 }
 0x274   :  { %v2237_v38 = vadd.f32 %v4178_v25, %v2201_v22 }
 0x275   :  { %v2037_v47 = vpop.f32.mrf.mxu0  ;;  %v2150_v49 = vpop.f32.mrf.mxu1 }
 0x276   :  { %v2038_v8 = vadd.f32 %v2037_v47, %v1925_v1  ;;  %v2269_v47 = vmax.f32 %v2237_v38, 0.0 }
 0x278   :  { %v2151_v23 = vadd.f32 %v2150_v49, %v2038_v8  ;;  %v2333_v49 = vsel %vm2278_vm2, %v2267_v40, 0.0  ;;  %v2337_v57 = vsel %vm2278_vm2, %v2269_v47, 0.0  ;;  %v2399_v40 = vld [vmem:[%s4273_s9 + $0x18] sm:$0xff] }
 0x27a   :  { %v1814_v51 = vpop.f32.mrf.mxu3  ;;  %v1927_v17 = vpop.f32.mrf.mxu2  ;;  %v2202_v56 = vmul.f32 %v4170_v14, %v2151_v23  ;;  %v2908_v23 = vmov 128.0  }
 0x27b   :  { %v1928_v6 = vadd.f32 %v1927_v17, %v1814_v51  ;;  %2896 = vrcp.f32 %v2908_v23 }
 0x27c   :  { %v2238_v19 = vadd.f32 %v4178_v25, %v2202_v56  ;;  %v2310_v56 = vrot.slane %v4145_v42, 4 }
 0x27d   :  { %v2040_v33 = vpop.f32.mrf.mxu0  ;;  %v2153_v52 = vpop.f32.mrf.mxu1 }
 0x27e   :  { %v2041_v16 = vadd.f32 %v2040_v33, %v1928_v6 }
 0x280   :  { %v2154_v27 = vadd.f32 %v2153_v52, %v2041_v16  ;;  %v2402_v16 = vld [vmem:[%s4273_s9 + $0x30] sm:$0xff] }
 0x281   :  { %2420 = vmatpush.msrb.mxu3 %v2402_v16  ;;  %v2894_v16 = vld [vmem:[%s4274_s10] ss:$0 sm:$0xff] }
 0x282   :  { %v1817_v54 = vpop.f32.mrf.mxu3  ;;  %v1930_v55 = vpop.f32.mrf.mxu2  ;;  %v2203_v41 = vmul.f32 %v4170_v14, %v2154_v27 }
 0x283   :  { %v1931_v10 = vadd.f32 %v1930_v55, %v1817_v54  ;;  %2421 = vmatpush.msrb.mxu3 %v2401_v26 }
 0x284   :  { %v2239_v51 = vadd.f32 %v4178_v25, %v2203_v41  ;;  %v2897_v41 = vpop.eup %2896 }
 0x285   :  { %v2043_v7 = vpop.f32.mrf.mxu0  ;;  %v2156_v11 = vpop.f32.mrf.mxu1  ;;  %2422 = vmatpush.msrb.mxu3 %v2400_v31  ;;  %vm2321_vm3 = vweird.f32 %v2897_v41 }
 0x286   :  { %v2044_v20 = vadd.f32 %v2043_v7, %v1931_v10  ;;  %v2335_v7 = vsel %vm2278_vm2, %v2268_v44, 0.0 }
 0x287   :  { %2423 = vmatpush.msrb.mxu3 %v2399_v40 }
 0x288   :  { %v2157_v34 = vadd.f32 %v2156_v11, %v2044_v20  ;;  %v2270_v11 = vmax.f32 %v2238_v19, 0.0  ;;  %v2311_v19 = vadd.f32 %v2310_v56, %v4145_v42 }
 0x28a   :  { %v1820_v29 = vpop.f32.mrf.mxu3  ;;  %v1933_v60 = vpop.f32.mrf.mxu2  ;;  %v2204_v24 = vmul.f32 %v4170_v14, %v2157_v34  ;;  %v2339_v4 = vsel %vm2278_vm2, %v2270_v11, 0.0 }
 0x28b   :  { %v1934_v18 = vadd.f32 %v1933_v60, %v1820_v29  ;;  %v2334_v60 = vadd.f32 %v2333_v49, %v4162_v63  ;;  %v2317_v49 = vmul.f32 128.0, %v2897_v41 }
 0x28c   :  { %v2240_v46 = vadd.f32 %v4178_v25, %v2204_v24 }
 0x28d   :  { %v2046_v59 = vpop.f32.mrf.mxu0  ;;  %v2159_v61 = vpop.f32.mrf.mxu1  ;;  %v2336_v3 = vadd.f32 %v2335_v7, %v2334_v60 }
 0x28e   :  { %v2047_v28 = vadd.f32 %v2046_v59, %v1934_v18  ;;  %v2272_v6 = vmax.f32 %v2240_v46, 0.0 }
 0x28f   :  { %v2338_v5 = vadd.f32 %v2337_v57, %v2336_v3 }
 0x290   :  { %v2160_v43 = vadd.f32 %v2159_v61, %v2047_v28  ;;  %v2271_v61 = vmax.f32 %v2239_v51, 0.0  ;;  %v2343_v20 = vsel %vm2278_vm2, %v2272_v6, 0.0  ;;  %v2397_v6 = vld [vmem:[%s4273_s9 + $0x8] sm:$0xff] }
 0x291   :  { %v2340_v18 = vadd.f32 %v2339_v4, %v2338_v5  ;;  %v2398_v4 = vld [vmem:[%s4273_s9 + $0x10] sm:$0xff] }
 0x292   :  { %v1823_v50 = vpop.f32.mrf.mxu3  ;;  %v1936_v13 = vpop.f32.mrf.mxu2  ;;  %v2205_v17 = vmul.f32 %v4170_v14, %v2160_v43  ;;  %v2341_v63 = vsel %vm2278_vm2, %v2271_v61, 0.0  ;;  %2424 = vmatpush.msrb.mxu3 %v2398_v4  ;;  %v2434_v5 = vld [vmem:[%s4275_s11 + $0x10] sm:$0xff] }
 0x293   :  { %v1937_v21 = vadd.f32 %v1936_v13, %v1823_v50  ;;  %v2342_v27 = vadd.f32 %v2341_v63, %v2340_v18  ;;  %v2893_v63 = vld [vmem:[%s4272_s8] ss:$0 sm:$0xff] }
 0x294   :  { %v2241_v62 = vadd.f32 %v4178_v25, %v2205_v17  ;;  %2425 = vmatpush.msrb.mxu3 %v2397_v6 }
 0x295   :  { %v2049_v32 = vpop.f32.mrf.mxu0  ;;  %v2162_v53 = vpop.f32.mrf.mxu1  ;;  %v2344_v34 = vadd.f32 %v2343_v20, %v2342_v27  ;;  %v2895_v20 = vld [vmem:[#allocation3] ss:$0 sm:$0xff] }
 0x296   :  { %v2050_v35 = vadd.f32 %v2049_v32, %v1937_v21  ;;  %v2273_v8 = vmax.f32 %v2241_v62, 0.0 }
 0x298   :  { %v2163_v45 = vadd.f32 %v2162_v53, %v2050_v35 }
 0x29a   :  { %v1826_v30 = vpop.f32.mrf.mxu3  ;;  %v1939_v2 = vpop.f32.mrf.mxu2  ;;  %v2206_v29 = vmul.f32 %v4170_v14, %v2163_v45 }
 0x29b   :  { %v1940_v36 = vadd.f32 %v1939_v2, %v1826_v30  ;;  %v2345_v30 = vsel %vm2278_vm2, %v2273_v8, 0.0 }
 0x29c   :  { %v2242_v50 = vadd.f32 %v4178_v25, %v2206_v29  ;;  %v2346_v43 = vadd.f32 %v2345_v30, %v2344_v34 }
 0x29d   :  { %v2052_v37 = vpop.f32.mrf.mxu0  ;;  %v2165_v39 = vpop.f32.mrf.mxu1 }
 0x29e   :  { %v2053_v9 = vadd.f32 %v2052_v37, %v1940_v36  ;;  %v2274_v21 = vmax.f32 %v2242_v50, 0.0  ;;  %v2396_v50 = vld [vmem:[%s4273_s9] sm:$0xff] }
 0x29f   :  { %2426 = vmatpush.msrb.mxu3 %v2396_v50 }
 0x2a0   :  { %v2166_v33 = vadd.f32 %v2165_v39, %v2053_v9  ;;  %v2347_v38 = vsel %vm2278_vm2, %v2274_v21, 0.0 }
 0x2a1   :  { %v2348_v24 = vadd.f32 %v2347_v38, %v2346_v43 }
 0x2a2   :  { %v1829_v52 = vpop.f32.mrf.mxu3  ;;  %v1942_v54 = vpop.f32.mrf.mxu2  ;;  %v2207_v0 = vmul.f32 %v4170_v14, %v2166_v33  ;;  %v2312_v33 = vrot.slane %v2311_v19, 2 }
 0x2a3   :  { %v1943_v55 = vadd.f32 %v1942_v54, %v1829_v52 }
 0x2a4   :  { %v2243_v10 = vadd.f32 %v4178_v25, %v2207_v0  ;;  %v2313_v11 = vadd.f32 %v2312_v33, %v2311_v19 }
 0x2a5   :  { %v2055_v58 = vpop.f32.mrf.mxu0  ;;  %v2168_v59 = vpop.f32.mrf.mxu1 }
 0x2a6   :  { %v2056_v1 = vadd.f32 %v2055_v58, %v1943_v55  ;;  %v2275_v2 = vmax.f32 %v2243_v10, 0.0  ;;  %v2318_v55 = vsub.f32 1.0, %v2317_v49  ;;  %v2314_v42 = vrot.slane %v2313_v11, 1 }
 0x2a8   :  { %v2169_v13 = vadd.f32 %v2168_v59, %v2056_v1  ;;  %v2349_v9 = vsel %vm2278_vm2, %v2275_v2, 0.0  ;;  %v2315_v59 = vadd.f32 %v2314_v42, %v2313_v11 }
 0x2a9   :  { %v2350_v51 = vadd.f32 %v2349_v9, %v2348_v24 }
 0x2aa   :  { %v2208_v12 = vmul.f32 %v4170_v14, %v2169_v13  ;;  %v1832_v32 = vpop.f32.mrf.mxu3  ;;  %v1945_v53 = vpop.f32.mrf.mxu2  ;;  %v2435_v13 = vld [vmem:[%s4275_s11 + $0x18] sm:$0xff] }
 0x2ab   :  { %v1946_v48 = vadd.f32 %v1945_v53, %v1832_v32  ;;  %v2433_v32 = vld [vmem:[%s4275_s11 + $0x8] sm:$0xff]  ;;  %v2432_v53 = vld [vmem:[%s4275_s11] sm:$0xff] }
 0x2ac   :  { %v2244_v22 = vadd.f32 %v4178_v25, %v2208_v12 }
 0x2ad   :  { %v2058_v28 = vpop.f32.mrf.mxu0  ;;  %v2171_v35 = vpop.f32.mrf.mxu1 }
 0x2ae   :  { %v2059_v36 = vadd.f32 %v2058_v28, %v1946_v48  ;;  %v2276_v37 = vmax.f32 %v2244_v22, 0.0 }
 0x2b0   :  { %v2172_v39 = vadd.f32 %v2171_v35, %v2059_v36  ;;  %v2351_v45 = vsel %vm2278_vm2, %v2276_v37, 0.0 }
 0x2b1   :  { %v2352_v52 = vadd.f32 %v2351_v45, %v2350_v51 }
 0x2b2   :  { %v2209_v44 = vmul.f32 %v4170_v14, %v2172_v39  ;;  %v2319_v14 = vmul.f32 %v2897_v41, %v2318_v55 }
 0x2b4   :  { %v2245_v47 = vadd.f32 %v4178_v25, %v2209_v44  ;;  %v2320_v57 = vadd.f32 %v2897_v41, %v2319_v14 }
 0x2b6   :  { %v2277_v17 = vmax.f32 %v2245_v47, 0.0  ;;  %v2322_v61 = vsel %vm2321_vm3, %v2897_v41, %v2320_v57 }
 0x2b7   :  { %v2323_v0 = vmul.f32 %v2322_v61, %v2315_v59 }
 0x2b8   :  { %v2353_v54 = vsel %vm2278_vm2, %v2277_v17, 0.0 }
 0x2b9   :  { %v2354_v7 = vadd.f32 %v2353_v54, %v2352_v52 }
 0x2bb   :  { %v2355_v46 = vrot.slane %v2354_v7, 4 }
 0x2bd   :  { %v2356_v29 = vadd.f32 %v2355_v46, %v2354_v7 }
 0x2bf   :  { %v2357_v60 = vrot.slane %v2356_v29, 2 }
 0x2c1   :  { %v2358_v58 = vadd.f32 %v2357_v60, %v2356_v29 }
 0x2c3   :  { %v2359_v25 = vrot.slane %v2358_v58, 1 }
 0x2c5   :  { %v2360_v62 = vadd.f32 %v2359_v25, %v2358_v58 }
 0x2c7   :  { %v2361_v1 = vmul.f32 %v2360_v62, %v2322_v61 }
 0x2c9   :  { %v2363_v3 = vsel %vm2362_vm4, %v2323_v0, %v2361_v1 }
 0x2ca   :  { %2520 = vmatmul.msk.f32.vlgmr.msra.gmra.mxu3 %vm2278_vm2, %v2363_v3 }
 0x2cb   :  { %2455 = vmatpush.msra.mxu3 %v2435_v13 }
 0x2cd   :  { %2456 = vmatpush.msra.mxu3 %v2434_v5 }
 0x2cf   :  { %2457 = vmatpush.msra.mxu3 %v2433_v32 }
 0x2d1   :  { %2458 = vmatpush.msra.mxu3 %v2432_v53 }
 0x34d   :  { %v2392_v8 = vpop.f32.mrf.mxu3 }
 0x34e   :  { %v2393_v10 = vadd.f32 %v2893_v63, %v2392_v8 }
 0x350   :  { %v2395_v12 = vmax.f32 %v2393_v10, 0.0 }
 0x352   :  { %2521 = vmatmul.msk.f32.vlgmr.msrb.gmra.mxu3 %vm724_vm1, %v2395_v12 }
 0x3d5   :  { %v2428_v18 = vpop.f32.mrf.mxu3 }
 0x3d6   :  { %v2429_v48 = vadd.f32 %v2894_v16, %v2428_v18 }
 0x3d8   :  { %v2431_v23 = vmax.f32 %v2429_v48, 0.0 }
 0x3da   :  { %2522 = vmatmul.msk.f32.vlgmr.msra.gmra.mxu3 %vm2278_vm2, %v2431_v23 }
 0x45d   :  { %v2460_v21 = vpop.f32.mrf.mxu3 }
 0x45e   :  { %v2461_v22 = vadd.f32 %v2895_v20, %v2460_v21 }
 0x460   :  { %v2523_v26 = vmul.f32 -1.442695, %v2461_v22 }
 0x462   :  { %2898 = vpow2.f32 %v2523_v26 }
 0x468   :  { %v2899_v27 = vpop.eup %2898 }
 0x469   :  { %v2466_v28 = vadd.f32 1.0, %v2899_v27 }
 0x46b   :  { %2900 = vrcp.f32 %v2466_v28  ;;  %v2478_v31 = vand.u32 2147483648, %v2466_v28  ;;  %v2476_v34 = vand.u32 2147483647, %v2466_v28  ;;  %vm2472_vm6 = vweird.f32 %v2466_v28 }
 0x46d   :  { %v2479_v38 = vor.u32 1.1754944e-38, %v2478_v31  ;;  %vm2477_vm9 = vcmp.eq.f32.partialorder %v2476_v34, 8.507059e+37 }
 0x471   :  { %v2901_v30 = vpop.eup %2900 }
 0x472   :  { %v2468_v2 = vmul.f32 %v2901_v30, %v2466_v28  ;;  %vm2473_vm5 = vweird.f32 %v2901_v30 }
 0x473   :  { %vm2474_vm7 = vmor %vm2472_vm6, %vm2473_vm5 }
 0x474   :  { %v2469_v36 = vsub.f32 1.0, %v2468_v2 }
 0x476   :  { %v2470_v56 = vmul.f32 %v2901_v30, %v2469_v36 }
 0x478   :  { %v2471_v35 = vadd.f32 %v2901_v30, %v2470_v56 }
 0x47a   :  { %v2475_v37 = vsel %vm2474_vm7, %v2901_v30, %v2471_v35 }
 0x47b   :  { %v2480_v39 = vsel %vm2477_vm9, %v2479_v38, %v2475_v37 }
 0x47c   :  { %2483 = vst.msk [vmem:[%s4277_s13] sm:$0x3] %vm2482_vm8, %v2480_v39 }

</bundles_post_ra>
